<compile_context>
chip_gen: v7x
topology: tpu7x:2x2x1
jax: 0.10.0
libtpu: 0.0.40
codegen_flags: <defaults>
</compile_context>

<pallas_src>
import jax
import jax.numpy as jnp
from jax.experimental import pallas as pl
from jax.experimental.pallas import tpu as pltpu


def vae_forward_kernel(
    x_ref, eps_ref,
    w1_ref, b1_ref,
    wh_ref, bh_ref,          # fused fc21/fc22: (n_units, 2*latent), (1, 2*latent)
    w3_ref, b3_ref,
    w4_ref, b4_ref,
    recon_ref, mu_ref, logvar_ref,
):
    bf16 = jnp.bfloat16
    x = x_ref[...]                                    # already bf16 (cast at boundary)

    # encode: h1 = relu(x @ W1 + b1)  (bf16 MXU operands, f32 accumulate)
    h1 = jnp.dot(x, w1_ref[...],
                 preferred_element_type=jnp.float32) + b1_ref[...]
    h1 = jnp.maximum(h1, 0.0)

    # fused mu/logvar head: single (n_units, 2*latent) matmul, then slice
    heads = jnp.dot(h1.astype(bf16), wh_ref[...],
                    preferred_element_type=jnp.float32) + bh_ref[...]
    latent = heads.shape[-1] // 2
    mu = heads[:, :latent]
    logvar = heads[:, latent:]

    # reparameterize in f32: z = mu + eps * exp(0.5 * logvar)
    std = jnp.exp(0.5 * logvar)
    z = mu + eps_ref[...] * std

    # decode: relu(fc3) -> tanh(fc4)
    h3 = jnp.dot(z.astype(bf16), w3_ref[...],
                 preferred_element_type=jnp.float32) + b3_ref[...]
    h3 = jnp.maximum(h3, 0.0)
    recon = jnp.tanh(
        jnp.dot(h3.astype(bf16), w4_ref[...],
                preferred_element_type=jnp.float32) + b4_ref[...]
    )

    recon_ref[...] = recon
    mu_ref[...] = mu
    logvar_ref[...] = logvar


def _round_up(x, m):
    return ((x + m - 1) // m) * m


def _vmem_budget_and_max_tile():
    """Generation-aware VMEM budget + max batch tile.

    v5e/v6e (128 MiB VMEM): 96 MiB budget, tiles up to 512 rows.
    v7x (64 MiB) or unknown: conservative 48 MiB budget, tiles up to 256 rows
    (fits every generation)."""
    cap = None
    try:
        info = pltpu.get_tpu_info()
        for name in ("vmem_capacity_bytes", "vmem_size_bytes", "vmem_bytes"):
            v = getattr(info, name, None)
            if v:
                cap = int(v)
                break
    except Exception:
        cap = None
    if cap is not None and cap >= 96 * 1024 * 1024:
        return 96 * 1024 * 1024, 512
    return 48 * 1024 * 1024, 256


def _choose_tile_b(B, max_tile):
    """Batch tile: 16-aligned minimum (bf16 sublane packing), prefer multiples
    of 128 (MXU M fill), and force >=2 grid steps for medium/large B so the
    parallel grid axis can feed both TensorCores on v7x.  Irregular batches
    are handled by the caller via padding (grid = cdiv(B, tile))."""
    min_steps = 2 if B >= 256 else 1
    tile = min(max_tile, _round_up(pl.cdiv(B, min_steps), 16))
    if tile >= 128:
        tile = (tile // 128) * 128
    return max(tile, 16)


def raw_vae_forward(x, eps, params):
    """x: [B, segment_length] f32, eps: [B, latent_dim] f32 (randn, matching
    torch.randn_like). Returns (recon, mu, logvar), all f32."""
    B, seg = x.shape
    w1, b1, w21, b21, w22, b22, w3, b3, w4, b4 = params
    n_units = w1.shape[1]
    latent = w21.shape[1]

    bf16 = jnp.bfloat16
    f32 = jnp.float32

    # bf16 MXU operands at the call boundary (halves weight + x HBM traffic);
    # biases stay f32 (added to the f32 accumulator).
    xb = x.astype(bf16)
    w1b = w1.astype(bf16)
    wh = jnp.concatenate([w21, w22], axis=1).astype(bf16)     # (n_units, 2*latent)
    bh = jnp.concatenate([b21, b22], axis=1).astype(f32)
    w3b = w3.astype(bf16)
    w4b = w4.astype(bf16)
    b1f = b1.astype(f32)
    b3f = b3.astype(f32)
    b4f = b4.astype(f32)

    vmem_limit, max_tile_b = _vmem_budget_and_max_tile()
    tile_b = _choose_tile_b(B, max_tile_b)
    steps = pl.cdiv(B, tile_b)
    padded_B = steps * tile_b
    if padded_B != B:
        # Bounded tiles for irregular batches: pad, then slice outputs back.
        xb = jnp.pad(xb, ((0, padded_B - B), (0, 0)))
        eps = jnp.pad(eps, ((0, padded_B - B), (0, 0)))

    def batch_spec(cols):
        return pl.BlockSpec((tile_b, cols), lambda i: (i, 0))

    def make_call(single_buffer_weights):
        if single_buffer_weights:
            def full(shape):
                # Grid-invariant weights: one VMEM buffer, no double-buffer churn.
                return pl.BlockSpec(shape, lambda i: (0, 0),
                                    pipeline_mode=pl.Buffered(1))
        else:
            def full(shape):
                return pl.BlockSpec(shape, lambda i: (0, 0))

        grid_spec = pltpu.PrefetchScalarGridSpec(
            num_scalar_prefetch=0,
            grid=(steps,),
            in_specs=[
                batch_spec(seg),                                    # x (bf16)
                batch_spec(latent),                                 # eps (f32)
                full((seg, n_units)), full((1, n_units)),           # fc1
                full((n_units, 2 * latent)), full((1, 2 * latent)), # fused fc21/fc22
                full((latent, n_units)), full((1, n_units)),        # fc3
                full((n_units, seg)), full((1, seg)),               # fc4
            ],
            out_specs=[
                batch_spec(seg),                                    # recon
                batch_spec(latent),                                 # mu
                batch_spec(latent),                                 # logvar
            ],
        )

        # Advisory cost estimate for XLA's scheduler.
        flops = 2 * padded_B * (seg * n_units + n_units * 2 * latent
                                + latent * n_units + n_units * seg)
        transcendentals = padded_B * (latent + seg)                 # exp + tanh
        bfsz, f32sz = 2, 4
        bytes_accessed = (
            padded_B * seg * bfsz + padded_B * latent * f32sz       # x (bf16), eps
            + (seg * n_units + n_units * 2 * latent
               + latent * n_units + n_units * seg) * bfsz           # bf16 weights
            + (n_units + 2 * latent + n_units + seg) * f32sz        # biases
            + padded_B * seg * f32sz + 2 * padded_B * latent * f32sz  # outputs
        )
        cost = pl.CostEstimate(flops=flops,
                               transcendentals=transcendentals,
                               bytes_accessed=bytes_accessed)

        return pl.pallas_call(
            vae_forward_kernel,
            out_shape=(
                jax.ShapeDtypeStruct((padded_B, seg), f32),
                jax.ShapeDtypeStruct((padded_B, latent), f32),
                jax.ShapeDtypeStruct((padded_B, latent), f32),
            ),
            grid_spec=grid_spec,
            compiler_params=pltpu.CompilerParams(
                dimension_semantics=("parallel",),
                vmem_limit_bytes=vmem_limit,
            ),
            cost_estimate=cost,
        )

    args = (xb, eps, w1b, b1f, wh, bh, w3b, b3f, w4b, b4f)
    try:
        recon, mu, logvar = make_call(True)(*args)
    except Exception:
        # pl.Buffered(1) not accepted on this jax build -> default pipelining.
        recon, mu, logvar = make_call(False)(*args)

    if padded_B != B:
        recon = recon[:B]
        mu = mu[:B]
        logvar = logvar[:B]
    return recon, mu, logvar


def init_params(key, segment_length, n_units, latent_dim):
    """Deterministic synthetic init. Weights stored as (in, out)
    (transpose of torch's nn.Linear weight layout)."""
    ks = jax.random.split(key, 10)

    def lin(kw, kb, fan_in, fan_out):
        bound = 1.0 / jnp.sqrt(fan_in)
        w = jax.random.uniform(kw, (fan_in, fan_out), jnp.float32, -bound, bound)
        b = jax.random.uniform(kb, (1, fan_out), jnp.float32, -bound, bound)
        return w, b

    w1, b1 = lin(ks[0], ks[1], segment_length, n_units)
    w21, b21 = lin(ks[2], ks[3], n_units, latent_dim)
    w22, b22 = lin(ks[4], ks[5], n_units, latent_dim)
    w3, b3 = lin(ks[6], ks[7], latent_dim, n_units)
    w4, b4 = lin(ks[8], ks[9], n_units, segment_length)
    return (w1, b1, w21, b21, w22, b22, w3, b3, w4, b4)


def reference_forward(x, eps, params, weight_dtype=jnp.float32):
    """Pure-JAX reference. weight_dtype=bf16 mirrors the kernel's mixed
    precision (bf16 matmul operands, f32 accumulation / elementwise)."""
    w1, b1, w21, b21, w22, b22, w3, b3, w4, b4 = params

    def mm(a, w):
        return jnp.dot(a.astype(weight_dtype), w.astype(weight_dtype),
                       preferred_element_type=jnp.float32)

    h1 = jnp.maximum(mm(x, w1) + b1, 0.0)
    mu = mm(h1, w21) + b21
    logvar = mm(h1, w22) + b22
    z = mu + eps * jnp.exp(0.5 * logvar)
    h3 = jnp.maximum(mm(z, w3) + b3, 0.0)
    recon = jnp.tanh(mm(h3, w4) + b4)
    return recon, mu, logvar


if __name__ == "__main__":
    # Small shapes consistent with the module (defaults are 1024/2048/256;
    # scaled down but keeping multiples of 128 for lane alignment).
    segment_length = 256
    n_units = 512
    latent_dim = 128
    batch = 16

    key = jax.random.PRNGKey(0)
    k_params, k_x, k_eps = jax.random.split(key, 3)

    params = init_params(k_params, segment_length, n_units, latent_dim)
    # x arrives as e.g. [B, 1, segment_length] audio segments; forward does
    # x.view(-1, segment_length):
    x_raw = jax.random.normal(k_x, (batch, 1, segment_length), jnp.float32)
    x = x_raw.reshape(-1, segment_length)
    # eps = torch.randn_like(std) - drawn outside the kernel for determinism.
    eps = jax.random.normal(k_eps, (batch, latent_dim), jnp.float32)

    recon, mu, logvar = raw_vae_forward(x, eps, params)
    jax.block_until_ready((recon, mu, logvar))

    # Check against a mixed-precision (bf16-weight) reference ...
    r_bf, mu_bf, lv_bf = reference_forward(x, eps, params, jnp.bfloat16)
    assert jnp.allclose(recon, r_bf, atol=1e-2, rtol=1e-2)
    assert jnp.allclose(mu, mu_bf, atol=1e-2, rtol=1e-2)
    assert jnp.allclose(logvar, lv_bf, atol=1e-2, rtol=1e-2)

    # ... and (loosely) against the full-f32 reference for semantics.
    r_f32, mu_f32, lv_f32 = reference_forward(x, eps, params, jnp.float32)
    assert jnp.allclose(recon, r_f32, atol=5e-2, rtol=5e-2)
    assert jnp.allclose(mu, mu_f32, atol=5e-2, rtol=5e-2)
    assert jnp.allclose(logvar, lv_f32, atol=5e-2, rtol=5e-2)

    print("KERNEL_OK")
</pallas_src>

<mosaic_0001>
module attributes {stable_mosaic.version = 11 : i64} {
  func.func @vae_forward_kernel(%arg0: i32, %arg1: memref<16x256xbf16, #tpu.memory_space<vmem>>, %arg2: memref<16x128xf32, #tpu.memory_space<vmem>>, %arg3: memref<256x512xbf16, #tpu.memory_space<vmem>>, %arg4: memref<1x512xf32, #tpu.memory_space<vmem>>, %arg5: memref<512x256xbf16, #tpu.memory_space<vmem>>, %arg6: memref<1x256xf32, #tpu.memory_space<vmem>>, %arg7: memref<128x512xbf16, #tpu.memory_space<vmem>>, %arg8: memref<1x512xf32, #tpu.memory_space<vmem>>, %arg9: memref<512x256xbf16, #tpu.memory_space<vmem>>, %arg10: memref<1x256xf32, #tpu.memory_space<vmem>>, %arg11: memref<16x256xf32, #tpu.memory_space<vmem>>, %arg12: memref<16x128xf32, #tpu.memory_space<vmem>>, %arg13: memref<16x128xf32, #tpu.memory_space<vmem>>) attributes {dimension_semantics = [#tpu.dimension_semantics<parallel>], iteration_bounds = array<i64: 1>, scalar_prefetch = 0 : i64, scratch_operands = 0 : i64, tpu.core_type = #tpu.core_type<tc>, window_params = [{transform_indices = @transform_0, window_bounds = array<i64: 16, 256>}, {transform_indices = @transform_1, window_bounds = array<i64: 16, 128>}, {pipeline_mode = #tpu.pipeline_mode<synchronous>, transform_indices = @transform_2, window_bounds = array<i64: 256, 512>}, {pipeline_mode = #tpu.pipeline_mode<synchronous>, transform_indices = @transform_3, window_bounds = array<i64: 1, 512>}, {pipeline_mode = #tpu.pipeline_mode<synchronous>, transform_indices = @transform_4, window_bounds = array<i64: 512, 256>}, {pipeline_mode = #tpu.pipeline_mode<synchronous>, transform_indices = @transform_5, window_bounds = array<i64: 1, 256>}, {pipeline_mode = #tpu.pipeline_mode<synchronous>, transform_indices = @transform_6, window_bounds = array<i64: 128, 512>}, {pipeline_mode = #tpu.pipeline_mode<synchronous>, transform_indices = @transform_7, window_bounds = array<i64: 1, 512>}, {pipeline_mode = #tpu.pipeline_mode<synchronous>, transform_indices = @transform_8, window_bounds = array<i64: 512, 256>}, {pipeline_mode = #tpu.pipeline_mode<synchronous>, transform_indices = @transform_9, window_bounds = array<i64: 1, 256>}, {transform_indices = @transform_10, window_bounds = array<i64: 16, 256>}, {transform_indices = @transform_11, window_bounds = array<i64: 16, 128>}, {transform_indices = @transform_12, window_bounds = array<i64: 16, 128>}]} {
    %c0 = arith.constant 0 : index
    %c0_0 = arith.constant 0 : index
    %0 = vector.load %arg1[%c0, %c0_0] : memref<16x256xbf16, #tpu.memory_space<vmem>>, vector<16x256xbf16>
    %c0_1 = arith.constant 0 : index
    %c0_2 = arith.constant 0 : index
    %1 = vector.load %arg3[%c0_1, %c0_2] : memref<256x512xbf16, #tpu.memory_space<vmem>>, vector<256x512xbf16>
    %cst = arith.constant dense<0.000000e+00> : vector<16x512xf32>
    %2 = tpu.matmul %0, %1, %cst {dimension_numbers = #tpu.dot_dimension_numbers<[1], [0], [0], [1], [0, 0, 1, 1], [], []>} : vector<16x256xbf16>, vector<256x512xbf16>, vector<16x512xf32> -> vector<16x512xf32>
    %c0_3 = arith.constant 0 : index
    %c0_4 = arith.constant 0 : index
    %3 = vector.load %arg4[%c0_3, %c0_4] : memref<1x512xf32, #tpu.memory_space<vmem>>, vector<1x512xf32>
    %4 = vector.broadcast %3 : vector<1x512xf32> to vector<16x512xf32>
    %5 = arith.addf %2, %4 : vector<16x512xf32>
    %cst_5 = arith.constant 0.000000e+00 : f32
    %6 = vector.broadcast %cst_5 : f32 to vector<16x512xf32>
    %7 = arith.maximumf %5, %6 : vector<16x512xf32>
    %8 = arith.truncf %7 : vector<16x512xf32> to vector<16x512xbf16>
    %c0_6 = arith.constant 0 : index
    %c0_7 = arith.constant 0 : index
    %9 = vector.load %arg5[%c0_6, %c0_7] : memref<512x256xbf16, #tpu.memory_space<vmem>>, vector<512x256xbf16>
    %cst_8 = arith.constant dense<0.000000e+00> : vector<16x256xf32>
    %10 = tpu.matmul %8, %9, %cst_8 {dimension_numbers = #tpu.dot_dimension_numbers<[1], [0], [0], [1], [0, 0, 1, 1], [], []>} : vector<16x512xbf16>, vector<512x256xbf16>, vector<16x256xf32> -> vector<16x256xf32>
    %c0_9 = arith.constant 0 : index
    %c0_10 = arith.constant 0 : index
    %11 = vector.load %arg6[%c0_9, %c0_10] : memref<1x256xf32, #tpu.memory_space<vmem>>, vector<1x256xf32>
    %12 = vector.broadcast %11 : vector<1x256xf32> to vector<16x256xf32>
    %13 = arith.addf %10, %12 : vector<16x256xf32>
    %14 = vector.extract_strided_slice %13 {offsets = [0, 0], sizes = [16, 128], strides = [1, 1]} : vector<16x256xf32> to vector<16x128xf32>
    %15 = vector.extract_strided_slice %13 {offsets = [0, 128], sizes = [16, 128], strides = [1, 1]} : vector<16x256xf32> to vector<16x128xf32>
    %cst_11 = arith.constant 5.000000e-01 : f32
    %16 = vector.broadcast %cst_11 : f32 to vector<16x128xf32>
    %17 = arith.mulf %16, %15 : vector<16x128xf32>
    %18 = math.exp %17 : vector<16x128xf32>
    %c0_12 = arith.constant 0 : index
    %c0_13 = arith.constant 0 : index
    %19 = vector.load %arg2[%c0_12, %c0_13] : memref<16x128xf32, #tpu.memory_space<vmem>>, vector<16x128xf32>
    %20 = arith.mulf %19, %18 : vector<16x128xf32>
    %21 = arith.addf %14, %20 : vector<16x128xf32>
    %22 = arith.truncf %21 : vector<16x128xf32> to vector<16x128xbf16>
    %c0_14 = arith.constant 0 : index
    %c0_15 = arith.constant 0 : index
    %23 = vector.load %arg7[%c0_14, %c0_15] : memref<128x512xbf16, #tpu.memory_space<vmem>>, vector<128x512xbf16>
    %cst_16 = arith.constant dense<0.000000e+00> : vector<16x512xf32>
    %24 = tpu.matmul %22, %23, %cst_16 {dimension_numbers = #tpu.dot_dimension_numbers<[1], [0], [0], [1], [0, 0, 1, 1], [], []>} : vector<16x128xbf16>, vector<128x512xbf16>, vector<16x512xf32> -> vector<16x512xf32>
    %c0_17 = arith.constant 0 : index
    %c0_18 = arith.constant 0 : index
    %25 = vector.load %arg8[%c0_17, %c0_18] : memref<1x512xf32, #tpu.memory_space<vmem>>, vector<1x512xf32>
    %26 = vector.broadcast %25 : vector<1x512xf32> to vector<16x512xf32>
    %27 = arith.addf %24, %26 : vector<16x512xf32>
    %cst_19 = arith.constant 0.000000e+00 : f32
    %28 = vector.broadcast %cst_19 : f32 to vector<16x512xf32>
    %29 = arith.maximumf %27, %28 : vector<16x512xf32>
    %30 = arith.truncf %29 : vector<16x512xf32> to vector<16x512xbf16>
    %c0_20 = arith.constant 0 : index
    %c0_21 = arith.constant 0 : index
    %31 = vector.load %arg9[%c0_20, %c0_21] : memref<512x256xbf16, #tpu.memory_space<vmem>>, vector<512x256xbf16>
    %cst_22 = arith.constant dense<0.000000e+00> : vector<16x256xf32>
    %32 = tpu.matmul %30, %31, %cst_22 {dimension_numbers = #tpu.dot_dimension_numbers<[1], [0], [0], [1], [0, 0, 1, 1], [], []>} : vector<16x512xbf16>, vector<512x256xbf16>, vector<16x256xf32> -> vector<16x256xf32>
    %c0_23 = arith.constant 0 : index
    %c0_24 = arith.constant 0 : index
    %33 = vector.load %arg10[%c0_23, %c0_24] : memref<1x256xf32, #tpu.memory_space<vmem>>, vector<1x256xf32>
    %34 = vector.broadcast %33 : vector<1x256xf32> to vector<16x256xf32>
    %35 = arith.addf %32, %34 : vector<16x256xf32>
    %36 = math.tanh %35 : vector<16x256xf32>
    %c0_25 = arith.constant 0 : index
    %c0_26 = arith.constant 0 : index
    %37 = vector.load %arg11[%c0_25, %c0_26] : memref<16x256xf32, #tpu.memory_space<vmem>>, vector<16x256xf32>
    tpu.vector_store %arg11[%c0_25, %c0_26], %36 {strides = array<i32>} : memref<16x256xf32, #tpu.memory_space<vmem>>, vector<16x256xf32>,
    %c0_27 = arith.constant 0 : index
    %c0_28 = arith.constant 0 : index
    %38 = vector.load %arg12[%c0_27, %c0_28] : memref<16x128xf32, #tpu.memory_space<vmem>>, vector<16x128xf32>
    tpu.vector_store %arg12[%c0_27, %c0_28], %14 {strides = array<i32>} : memref<16x128xf32, #tpu.memory_space<vmem>>, vector<16x128xf32>,
    %c0_29 = arith.constant 0 : index
    %c0_30 = arith.constant 0 : index
    %39 = vector.load %arg13[%c0_29, %c0_30] : memref<16x128xf32, #tpu.memory_space<vmem>>, vector<16x128xf32>
    tpu.vector_store %arg13[%c0_29, %c0_30], %15 {strides = array<i32>} : memref<16x128xf32, #tpu.memory_space<vmem>>, vector<16x128xf32>,
    return
  }
  func.func @transform_0(%arg0: i32) -> (i32, i32) {
    %c0_i32 = arith.constant 0 : i32
    %c0_i32_0 = arith.constant 0 : i32
    return %arg0, %c0_i32 : i32, i32
  }
  func.func @transform_1(%arg0: i32) -> (i32, i32) {
    %c0_i32 = arith.constant 0 : i32
    %c0_i32_0 = arith.constant 0 : i32
    return %arg0, %c0_i32 : i32, i32
  }
  func.func @transform_2(%arg0: i32) -> (i32, i32) {
    %c0_i32 = arith.constant 0 : i32
    %c0_i32_0 = arith.constant 0 : i32
    %c0_i32_1 = arith.constant 0 : i32
    return %c0_i32, %c0_i32_0 : i32, i32
  }
  func.func @transform_3(%arg0: i32) -> (i32, i32) {
    %c0_i32 = arith.constant 0 : i32
    %c0_i32_0 = arith.constant 0 : i32
    %c0_i32_1 = arith.constant 0 : i32
    return %c0_i32, %c0_i32_0 : i32, i32
  }
  func.func @transform_4(%arg0: i32) -> (i32, i32) {
    %c0_i32 = arith.constant 0 : i32
    %c0_i32_0 = arith.constant 0 : i32
    %c0_i32_1 = arith.constant 0 : i32
    return %c0_i32, %c0_i32_0 : i32, i32
  }
  func.func @transform_5(%arg0: i32) -> (i32, i32) {
    %c0_i32 = arith.constant 0 : i32
    %c0_i32_0 = arith.constant 0 : i32
    %c0_i32_1 = arith.constant 0 : i32
    return %c0_i32, %c0_i32_0 : i32, i32
  }
  func.func @transform_6(%arg0: i32) -> (i32, i32) {
    %c0_i32 = arith.constant 0 : i32
    %c0_i32_0 = arith.constant 0 : i32
    %c0_i32_1 = arith.constant 0 : i32
    return %c0_i32, %c0_i32_0 : i32, i32
  }
  func.func @transform_7(%arg0: i32) -> (i32, i32) {
    %c0_i32 = arith.constant 0 : i32
    %c0_i32_0 = arith.constant 0 : i32
    %c0_i32_1 = arith.constant 0 : i32
    return %c0_i32, %c0_i32_0 : i32, i32
  }
  func.func @transform_8(%arg0: i32) -> (i32, i32) {
    %c0_i32 = arith.constant 0 : i32
    %c0_i32_0 = arith.constant 0 : i32
    %c0_i32_1 = arith.constant 0 : i32
    return %c0_i32, %c0_i32_0 : i32, i32
  }
  func.func @transform_9(%arg0: i32) -> (i32, i32) {
    %c0_i32 = arith.constant 0 : i32
    %c0_i32_0 = arith.constant 0 : i32
    %c0_i32_1 = arith.constant 0 : i32
    return %c0_i32, %c0_i32_0 : i32, i32
  }
  func.func @transform_10(%arg0: i32) -> (i32, i32) {
    %c0_i32 = arith.constant 0 : i32
    %c0_i32_0 = arith.constant 0 : i32
    return %arg0, %c0_i32 : i32, i32
  }
  func.func @transform_11(%arg0: i32) -> (i32, i32) {
    %c0_i32 = arith.constant 0 : i32
    %c0_i32_0 = arith.constant 0 : i32
    return %arg0, %c0_i32 : i32, i32
  }
  func.func @transform_12(%arg0: i32) -> (i32, i32) {
    %c0_i32 = arith.constant 0 : i32
    %c0_i32_0 = arith.constant 0 : i32
    return %arg0, %c0_i32 : i32, i32
  }
}

module attributes {stable_mosaic.version = 11 : i64} {
  func.func @vae_forward_kernel(%arg0: i32, %arg1: memref<16x256xbf16, #tpu.memory_space<vmem>>, %arg2: memref<16x128xf32, #tpu.memory_space<vmem>>, %arg3: memref<256x512xbf16, #tpu.memory_space<vmem>>, %arg4: memref<1x512xf32, #tpu.memory_space<vmem>>, %arg5: memref<512x256xbf16, #tpu.memory_space<vmem>>, %arg6: memref<1x256xf32, #tpu.memory_space<vmem>>, %arg7: memref<128x512xbf16, #tpu.memory_space<vmem>>, %arg8: memref<1x512xf32, #tpu.memory_space<vmem>>, %arg9: memref<512x256xbf16, #tpu.memory_space<vmem>>, %arg10: memref<1x256xf32, #tpu.memory_space<vmem>>, %arg11: memref<16x256xf32, #tpu.memory_space<vmem>>, %arg12: memref<16x128xf32, #tpu.memory_space<vmem>>, %arg13: memref<16x128xf32, #tpu.memory_space<vmem>>) attributes {dimension_semantics = [#tpu.dimension_semantics<parallel>], iteration_bounds = array<i64: 1>, scalar_prefetch = 0 : i64, scratch_operands = 0 : i64, tpu.core_type = #tpu.core_type<tc>, window_params = [{transform_indices = @transform_0, window_bounds = array<i64: 16, 256>}, {transform_indices = @transform_1, window_bounds = array<i64: 16, 128>}, {pipeline_mode = #tpu.pipeline_mode<synchronous>, transform_indices = @transform_2, window_bounds = array<i64: 256, 512>}, {pipeline_mode = #tpu.pipeline_mode<synchronous>, transform_indices = @transform_3, window_bounds = array<i64: 1, 512>}, {pipeline_mode = #tpu.pipeline_mode<synchronous>, transform_indices = @transform_4, window_bounds = array<i64: 512, 256>}, {pipeline_mode = #tpu.pipeline_mode<synchronous>, transform_indices = @transform_5, window_bounds = array<i64: 1, 256>}, {pipeline_mode = #tpu.pipeline_mode<synchronous>, transform_indices = @transform_6, window_bounds = array<i64: 128, 512>}, {pipeline_mode = #tpu.pipeline_mode<synchronous>, transform_indices = @transform_7, window_bounds = array<i64: 1, 512>}, {pipeline_mode = #tpu.pipeline_mode<synchronous>, transform_indices = @transform_8, window_bounds = array<i64: 512, 256>}, {pipeline_mode = #tpu.pipeline_mode<synchronous>, transform_indices = @transform_9, window_bounds = array<i64: 1, 256>}, {transform_indices = @transform_10, window_bounds = array<i64: 16, 256>}, {transform_indices = @transform_11, window_bounds = array<i64: 16, 128>}, {transform_indices = @transform_12, window_bounds = array<i64: 16, 128>}]} {
    %c0 = arith.constant 0 : index
    %c0_0 = arith.constant 0 : index
    %0 = vector.load %arg1[%c0, %c0_0] : memref<16x256xbf16, #tpu.memory_space<vmem>>, vector<16x256xbf16>
    %c0_1 = arith.constant 0 : index
    %c0_2 = arith.constant 0 : index
    %1 = vector.load %arg3[%c0_1, %c0_2] : memref<256x512xbf16, #tpu.memory_space<vmem>>, vector<256x512xbf16>
    %cst = arith.constant dense<0.000000e+00> : vector<16x512xf32>
    %2 = tpu.matmul %0, %1, %cst {dimension_numbers = #tpu.dot_dimension_numbers<[1], [0], [0], [1], [0, 0, 1, 1], [], []>} : vector<16x256xbf16>, vector<256x512xbf16>, vector<16x512xf32> -> vector<16x512xf32>
    %c0_3 = arith.constant 0 : index
    %c0_4 = arith.constant 0 : index
    %3 = vector.load %arg4[%c0_3, %c0_4] : memref<1x512xf32, #tpu.memory_space<vmem>>, vector<1x512xf32>
    %4 = vector.broadcast %3 : vector<1x512xf32> to vector<16x512xf32>
    %5 = arith.addf %2, %4 : vector<16x512xf32>
    %cst_5 = arith.constant 0.000000e+00 : f32
    %6 = vector.broadcast %cst_5 : f32 to vector<16x512xf32>
    %7 = arith.maximumf %5, %6 : vector<16x512xf32>
    %8 = arith.truncf %7 : vector<16x512xf32> to vector<16x512xbf16>
    %c0_6 = arith.constant 0 : index
    %c0_7 = arith.constant 0 : index
    %9 = vector.load %arg5[%c0_6, %c0_7] : memref<512x256xbf16, #tpu.memory_space<vmem>>, vector<512x256xbf16>
    %cst_8 = arith.constant dense<0.000000e+00> : vector<16x256xf32>
    %10 = tpu.matmul %8, %9, %cst_8 {dimension_numbers = #tpu.dot_dimension_numbers<[1], [0], [0], [1], [0, 0, 1, 1], [], []>} : vector<16x512xbf16>, vector<512x256xbf16>, vector<16x256xf32> -> vector<16x256xf32>
    %c0_9 = arith.constant 0 : index
    %c0_10 = arith.constant 0 : index
    %11 = vector.load %arg6[%c0_9, %c0_10] : memref<1x256xf32, #tpu.memory_space<vmem>>, vector<1x256xf32>
    %12 = vector.broadcast %11 : vector<1x256xf32> to vector<16x256xf32>
    %13 = arith.addf %10, %12 : vector<16x256xf32>
    %14 = vector.extract_strided_slice %13 {offsets = [0, 0], sizes = [16, 128], strides = [1, 1]} : vector<16x256xf32> to vector<16x128xf32>
    %15 = vector.extract_strided_slice %13 {offsets = [0, 128], sizes = [16, 128], strides = [1, 1]} : vector<16x256xf32> to vector<16x128xf32>
    %cst_11 = arith.constant 5.000000e-01 : f32
    %16 = vector.broadcast %cst_11 : f32 to vector<16x128xf32>
    %17 = arith.mulf %16, %15 : vector<16x128xf32>
    %18 = math.exp %17 : vector<16x128xf32>
    %c0_12 = arith.constant 0 : index
    %c0_13 = arith.constant 0 : index
    %19 = vector.load %arg2[%c0_12, %c0_13] : memref<16x128xf32, #tpu.memory_space<vmem>>, vector<16x128xf32>
    %20 = arith.mulf %19, %18 : vector<16x128xf32>
    %21 = arith.addf %14, %20 : vector<16x128xf32>
    %22 = arith.truncf %21 : vector<16x128xf32> to vector<16x128xbf16>
    %c0_14 = arith.constant 0 : index
    %c0_15 = arith.constant 0 : index
    %23 = vector.load %arg7[%c0_14, %c0_15] : memref<128x512xbf16, #tpu.memory_space<vmem>>, vector<128x512xbf16>
    %cst_16 = arith.constant dense<0.000000e+00> : vector<16x512xf32>
    %24 = tpu.matmul %22, %23, %cst_16 {dimension_numbers = #tpu.dot_dimension_numbers<[1], [0], [0], [1], [0, 0, 1, 1], [], []>} : vector<16x128xbf16>, vector<128x512xbf16>, vector<16x512xf32> -> vector<16x512xf32>
    %c0_17 = arith.constant 0 : index
    %c0_18 = arith.constant 0 : index
    %25 = vector.load %arg8[%c0_17, %c0_18] : memref<1x512xf32, #tpu.memory_space<vmem>>, vector<1x512xf32>
    %26 = vector.broadcast %25 : vector<1x512xf32> to vector<16x512xf32>
    %27 = arith.addf %24, %26 : vector<16x512xf32>
    %cst_19 = arith.constant 0.000000e+00 : f32
    %28 = vector.broadcast %cst_19 : f32 to vector<16x512xf32>
    %29 = arith.maximumf %27, %28 : vector<16x512xf32>
    %30 = arith.truncf %29 : vector<16x512xf32> to vector<16x512xbf16>
    %c0_20 = arith.constant 0 : index
    %c0_21 = arith.constant 0 : index
    %31 = vector.load %arg9[%c0_20, %c0_21] : memref<512x256xbf16, #tpu.memory_space<vmem>>, vector<512x256xbf16>
    %cst_22 = arith.constant dense<0.000000e+00> : vector<16x256xf32>
    %32 = tpu.matmul %30, %31, %cst_22 {dimension_numbers = #tpu.dot_dimension_numbers<[1], [0], [0], [1], [0, 0, 1, 1], [], []>} : vector<16x512xbf16>, vector<512x256xbf16>, vector<16x256xf32> -> vector<16x256xf32>
    %c0_23 = arith.constant 0 : index
    %c0_24 = arith.constant 0 : index
    %33 = vector.load %arg10[%c0_23, %c0_24] : memref<1x256xf32, #tpu.memory_space<vmem>>, vector<1x256xf32>
    %34 = vector.broadcast %33 : vector<1x256xf32> to vector<16x256xf32>
    %35 = arith.addf %32, %34 : vector<16x256xf32>
    %36 = math.tanh %35 : vector<16x256xf32>
    %c0_25 = arith.constant 0 : index
    %c0_26 = arith.constant 0 : index
    %37 = vector.load %arg11[%c0_25, %c0_26] : memref<16x256xf32, #tpu.memory_space<vmem>>, vector<16x256xf32>
    tpu.vector_store %arg11[%c0_25, %c0_26], %36 {strides = array<i32>} : memref<16x256xf32, #tpu.memory_space<vmem>>, vector<16x256xf32>,
    %c0_27 = arith.constant 0 : index
    %c0_28 = arith.constant 0 : index
    %38 = vector.load %arg12[%c0_27, %c0_28] : memref<16x128xf32, #tpu.memory_space<vmem>>, vector<16x128xf32>
    tpu.vector_store %arg12[%c0_27, %c0_28], %14 {strides = array<i32>} : memref<16x128xf32, #tpu.memory_space<vmem>>, vector<16x128xf32>,
    %c0_29 = arith.constant 0 : index
    %c0_30 = arith.constant 0 : index
    %39 = vector.load %arg13[%c0_29, %c0_30] : memref<16x128xf32, #tpu.memory_space<vmem>>, vector<16x128xf32>
    tpu.vector_store %arg13[%c0_29, %c0_30], %15 {strides = array<i32>} : memref<16x128xf32, #tpu.memory_space<vmem>>, vector<16x128xf32>,
    return
  }
  func.func @transform_0(%arg0: i32) -> (i32, i32) {
    %c0_i32 = arith.constant 0 : i32
    %c0_i32_0 = arith.constant 0 : i32
    return %arg0, %c0_i32 : i32, i32
  }
  func.func @transform_1(%arg0: i32) -> (i32, i32) {
    %c0_i32 = arith.constant 0 : i32
    %c0_i32_0 = arith.constant 0 : i32
    return %arg0, %c0_i32 : i32, i32
  }
  func.func @transform_2(%arg0: i32) -> (i32, i32) {
    %c0_i32 = arith.constant 0 : i32
    %c0_i32_0 = arith.constant 0 : i32
    %c0_i32_1 = arith.constant 0 : i32
    return %c0_i32, %c0_i32_0 : i32, i32
  }
  func.func @transform_3(%arg0: i32) -> (i32, i32) {
    %c0_i32 = arith.constant 0 : i32
    %c0_i32_0 = arith.constant 0 : i32
    %c0_i32_1 = arith.constant 0 : i32
    return %c0_i32, %c0_i32_0 : i32, i32
  }
  func.func @transform_4(%arg0: i32) -> (i32, i32) {
    %c0_i32 = arith.constant 0 : i32
    %c0_i32_0 = arith.constant 0 : i32
    %c0_i32_1 = arith.constant 0 : i32
    return %c0_i32, %c0_i32_0 : i32, i32
  }
  func.func @transform_5(%arg0: i32) -> (i32, i32) {
    %c0_i32 = arith.constant 0 : i32
    %c0_i32_0 = arith.constant 0 : i32
    %c0_i32_1 = arith.constant 0 : i32
    return %c0_i32, %c0_i32_0 : i32, i32
  }
  func.func @transform_6(%arg0: i32) -> (i32, i32) {
    %c0_i32 = arith.constant 0 : i32
    %c0_i32_0 = arith.constant 0 : i32
    %c0_i32_1 = arith.constant 0 : i32
    return %c0_i32, %c0_i32_0 : i32, i32
  }
  func.func @transform_7(%arg0: i32) -> (i32, i32) {
    %c0_i32 = arith.constant 0 : i32
    %c0_i32_0 = arith.constant 0 : i32
    %c0_i32_1 = arith.constant 0 : i32
    return %c0_i32, %c0_i32_0 : i32, i32
  }
  func.func @transform_8(%arg0: i32) -> (i32, i32) {
    %c0_i32 = arith.constant 0 : i32
    %c0_i32_0 = arith.constant 0 : i32
    %c0_i32_1 = arith.constant 0 : i32
    return %c0_i32, %c0_i32_0 : i32, i32
  }
  func.func @transform_9(%arg0: i32) -> (i32, i32) {
    %c0_i32 = arith.constant 0 : i32
    %c0_i32_0 = arith.constant 0 : i32
    %c0_i32_1 = arith.constant 0 : i32
    return %c0_i32, %c0_i32_0 : i32, i32
  }
  func.func @transform_10(%arg0: i32) -> (i32, i32) {
    %c0_i32 = arith.constant 0 : i32
    %c0_i32_0 = arith.constant 0 : i32
    return %arg0, %c0_i32 : i32, i32
  }
  func.func @transform_11(%arg0: i32) -> (i32, i32) {
    %c0_i32 = arith.constant 0 : i32
    %c0_i32_0 = arith.constant 0 : i32
    return %arg0, %c0_i32 : i32, i32
  }
  func.func @transform_12(%arg0: i32) -> (i32, i32) {
    %c0_i32 = arith.constant 0 : i32
    %c0_i32_0 = arith.constant 0 : i32
    return %arg0, %c0_i32 : i32, i32
  }
}

</mosaic_0001>

<bundles_post_ra>
// kernel: tpu_custom_call.1
= control target key start
LH: loop header
LB: loop body
LE: loop exit
PB: predicated region body
PF: predicated region fallthrough
CT: control target
= control target key end

     0   :  { %18 = vsyncpa [#allocation3], 0  ;;  %s3084_s0 = inlined_call_operand.hbm [shape: bf16[16,256], index: 0, kind: input, shape index: {}]   ;;  %s3085_s1 = inlined_call_operand.hbm [shape: f32[16,128], index: 1, kind: input, shape index: {}]   ;;  %s3086_s2 = inlined_call_operand.hbm [shape: bf16[256,512], index: 2, kind: input, shape index: {}]   ;;  %s3087_s3 = inlined_call_operand.vmem [shape: f32[1,512], index: 3, kind: input, shape index: {}]   ;;  %s3088_s4 = inlined_call_operand.hbm [shape: bf16[512,256], index: 4, kind: input, shape index: {}]   ;;  %s3089_s5 = inlined_call_operand.vmem [shape: f32[1,256], index: 5, kind: input, shape index: {}]   ;;  %s3090_s6 = inlined_call_operand.hbm [shape: bf16[128,512], index: 6, kind: input, shape index: {}]   ;;  %s3091_s7 = inlined_call_operand.vmem [shape: f32[1,512], index: 7, kind: input, shape index: {}]   ;;  %s3092_s8 = inlined_call_operand.hbm [shape: bf16[512,256], index: 8, kind: input, shape index: {}]   ;;  %s3093_s9 = inlined_call_operand.vmem [shape: f32[1,256], index: 9, kind: input, shape index: {}]   ;;  %s3094_s10 = inlined_call_operand.hbm [shape: f32[16,256], index: 10, kind: output, shape index: {0}]   ;;  %s3095_s11 = inlined_call_operand.hbm [shape: f32[16,128], index: 11, kind: output, shape index: {1}]   ;;  %s3096_s12 = inlined_call_operand.hbm [shape: f32[16,128], index: 12, kind: output, shape index: {2}]  }
   0x1   :  { %19 = vsyncpa [#allocation6], 0 }
   0x2   :  { %20 = vsyncpa [#allocation9], 0 }
   0x3   :  { %21 = vsyncpa [#allocation12], 0 }
   0x4   :  { %22 = vsyncpa [#allocation4], 0 }
   0x5   :  { %23 = vsyncpa [#allocation15], 0  ;;  %s2808_s21 = smov [#allocation5]   ;;  %s2809_s23 = smov [#allocation8]  }
   0x6   :  { %s41_s22 = sshll.u32 %s2808_s21, 4  ;;  %s67_s24 = sshll.u32 %s2809_s23, 4  ;;  %s42_s22 = int_to_ptr.vmem [resolvable:$true] %s41_s22  ;;  %s2887_s24 = int_to_ptr.vmem [resolvable:$true] %s67_s24 }
   0x7   :  { %s2598_s27 = scalar_lea.hbm %s3085_s1, 256 }
   0x8   :  { %p2599_p0 = scmp.ne.s32.totalorder %s3085_s1, %s2598_s27  ;;  %p2602_p1 = scmp.lt.u32.totalorder %s2598_s27, %s3085_s1 }
   0xa   :  { %p2604_p2 = pnand %p2602_p1, %p2599_p0 }
   0xc   :  { %2607 = shalt.err (!%p2604_p2)
}
   0xd   :  { %s2608_s14 = scalar_lea.vmem %s42_s22, 256  ;;  %p2613_p4 = scmp.lt.s32.totalorder %s42_s22, %s42_s22 }
   0xe   :  { %p2609_p3 = scmp.ne.s32.totalorder %s42_s22, %s2608_s14  ;;  %p2614_p5 = scmp.lt.s32.totalorder %s2608_s14, %s2608_s14 }
  0x10   :  { %p2615_p6 = por %p2614_p5, %p2613_p4 }
  0x12   :  { %p2616_p7 = pnand %p2615_p6, %p2609_p3 }
  0x14   :  { %2619 = shalt.err (!%p2616_p7)
}
  0x15   :  { %s2810_s15 = smov 128   ;;  %s2811_s16 = smov 8  }
  0x16   :  { %47 = dma.hbm_to_vmem [thread:$0]  %s3085_s1, 256, %s42_s22, [#allocation6], %s2810_s15, %s2810_s15, %s2811_s16  }
  0x17   :  { %s2620_s21 = scalar_lea.hbm %s3088_s4, 8192 }
  0x18   :  { %p2621_p8 = scmp.ne.s32.totalorder %s3088_s4, %s2620_s21  ;;  %p2624_p9 = scmp.lt.u32.totalorder %s2620_s21, %s3088_s4 }
  0x1a   :  { %p2626_p10 = pnand %p2624_p9, %p2621_p8 }
  0x1c   :  { %2629 = shalt.err (!%p2626_p10)
}
  0x1d   :  { %s2630_s28 = scalar_lea.vmem %s2887_s24, 8192  ;;  %p2635_p12 = scmp.lt.s32.totalorder %s2887_s24, %s2887_s24 }
  0x1e   :  { %p2631_p11 = scmp.ne.s32.totalorder %s2887_s24, %s2630_s28  ;;  %p2636_p13 = scmp.lt.s32.totalorder %s2630_s28, %s2630_s28 }
  0x20   :  { %p2637_p0 = por %p2636_p13, %p2635_p12 }
  0x22   :  { %p2638_p1 = pnand %p2637_p0, %p2631_p11 }
  0x24   :  { %2641 = shalt.err (!%p2638_p1)
}
  0x25   :  { %73 = dma.hbm_to_vmem [thread:$0]  %s3088_s4, 8192, %s2887_s24, [#allocation9], %s2810_s15, %s2810_s15, %s2811_s16  }
  0x26   :  { %s2812_s29 = smov [#allocation2]   ;;  %s2813_s13 = smov [#allocation7]  }
  0x27   :  { %s29_s30 = sshll.u32 %s2812_s29, 4  ;;  %s53_s14 = sshll.u32 %s2813_s13, 4  ;;  %s30_s30 = int_to_ptr.vmem [resolvable:$true] %s29_s30  ;;  %s2924_s14 = int_to_ptr.vmem [resolvable:$true] %s53_s14 }
  0x28   :  { %s2642_s19 = scalar_lea.hbm %s3084_s0, 256 }
  0x29   :  { %p2643_p2 = scmp.ne.s32.totalorder %s3084_s0, %s2642_s19  ;;  %p2646_p3 = scmp.lt.u32.totalorder %s2642_s19, %s3084_s0 }
  0x2b   :  { %p2648_p4 = pnand %p2646_p3, %p2643_p2 }
  0x2d   :  { %2651 = shalt.err (!%p2648_p4)
}
  0x2e   :  { %s2652_s4 = scalar_lea.vmem %s30_s30, 256  ;;  %p2657_p6 = scmp.lt.s32.totalorder %s30_s30, %s30_s30 }
  0x2f   :  { %p2653_p5 = scmp.ne.s32.totalorder %s30_s30, %s2652_s4  ;;  %p2658_p7 = scmp.lt.s32.totalorder %s2652_s4, %s2652_s4 }
  0x31   :  { %p2659_p8 = por %p2658_p7, %p2657_p6 }
  0x33   :  { %p2660_p9 = pnand %p2659_p8, %p2653_p5 }
  0x35   :  { %2663 = shalt.err (!%p2660_p9)
}
  0x36   :  { %35 = dma.hbm_to_vmem [thread:$0]  %s3084_s0, 256, %s30_s30, [#allocation3], %s2810_s15, %s2810_s15, %s2811_s16  }
  0x37   :  { %s2664_s1 = scalar_lea.hbm %s3086_s2, 8192 }
  0x38   :  { %p2665_p10 = scmp.ne.s32.totalorder %s3086_s2, %s2664_s1  ;;  %p2668_p11 = scmp.lt.u32.totalorder %s2664_s1, %s3086_s2 }
  0x3a   :  { %p2670_p12 = pnand %p2668_p11, %p2665_p10 }
  0x3c   :  { %2673 = shalt.err (!%p2670_p12)
}
  0x3d   :  { %s2674_s18 = scalar_lea.vmem %s2924_s14, 8192  ;;  %p2679_p0 = scmp.lt.s32.totalorder %s2924_s14, %s2924_s14 }
  0x3e   :  { %p2675_p13 = scmp.ne.s32.totalorder %s2924_s14, %s2674_s18  ;;  %p2680_p1 = scmp.lt.s32.totalorder %s2674_s18, %s2674_s18 }
  0x40   :  { %p2681_p2 = por %p2680_p1, %p2679_p0 }
  0x42   :  { %p2682_p3 = pnand %p2681_p2, %p2675_p13 }
  0x44   :  { %2685 = shalt.err (!%p2682_p3)
}
  0x45   :  { %s2814_s0 = smov 256   ;;  %s2815_s30 = smov 16  }
  0x46   :  { %59 = dma.hbm_to_vmem [thread:$0]  %s3086_s2, 8192, %s2924_s14, [#allocation6], %s2814_s0, %s2814_s0, %s2815_s30  }
  0x47   :  { %s2816_s21 = smov [#allocation10]   ;;  %s2817_s25 = smov [#allocation11]  }
  0x48   :  { %s81_s23 = sshll.u32 %s2816_s21, 4  ;;  %s95_s4 = sshll.u32 %s2817_s25, 4  ;;  %s82_s23 = int_to_ptr.vmem [resolvable:$true] %s81_s23  ;;  %s2961_s4 = int_to_ptr.vmem [resolvable:$true] %s95_s4 }
  0x49   :  { %s2686_s27 = scalar_lea.hbm %s3090_s6, 4096 }
  0x4a   :  { %p2687_p4 = scmp.ne.s32.totalorder %s3090_s6, %s2686_s27  ;;  %p2690_p5 = scmp.lt.u32.totalorder %s2686_s27, %s3090_s6 }
  0x4c   :  { %p2692_p6 = pnand %p2690_p5, %p2687_p4 }
  0x4e   :  { %2695 = shalt.err (!%p2692_p6)
}
  0x4f   :  { %s2696_s2 = scalar_lea.vmem %s82_s23, 4096  ;;  %p2701_p8 = scmp.lt.s32.totalorder %s82_s23, %s82_s23 }
  0x50   :  { %p2697_p7 = scmp.ne.s32.totalorder %s82_s23, %s2696_s2  ;;  %p2702_p9 = scmp.lt.s32.totalorder %s2696_s2, %s2696_s2 }
  0x52   :  { %p2703_p10 = por %p2702_p9, %p2701_p8 }
  0x54   :  { %p2704_p11 = pnand %p2703_p10, %p2697_p7 }
  0x56   :  { %2707 = shalt.err (!%p2704_p11)
}
  0x57   :  { %87 = dma.hbm_to_vmem [thread:$0]  %s3090_s6, 4096, %s82_s23, [#allocation9], %s2814_s0, %s2814_s0, %s2815_s30  }
  0x58   :  { %s2708_s19 = scalar_lea.hbm %s3092_s8, 8192 }
  0x59   :  { %p2709_p12 = scmp.ne.s32.totalorder %s3092_s8, %s2708_s19  ;;  %p2712_p13 = scmp.lt.u32.totalorder %s2708_s19, %s3092_s8 }
  0x5b   :  { %p2714_p0 = pnand %p2712_p13, %p2709_p12 }
  0x5d   :  { %2717 = shalt.err (!%p2714_p0)
}
  0x5e   :  { %s2718_s26 = scalar_lea.vmem %s2961_s4, 8192  ;;  %p2723_p2 = scmp.lt.s32.totalorder %s2961_s4, %s2961_s4 }
  0x5f   :  { %p2719_p1 = scmp.ne.s32.totalorder %s2961_s4, %s2718_s26  ;;  %p2724_p3 = scmp.lt.s32.totalorder %s2718_s26, %s2718_s26 }
  0x61   :  { %p2725_p4 = por %p2724_p3, %p2723_p2 }
  0x63   :  { %p2726_p5 = pnand %p2725_p4, %p2719_p1 }
  0x65   :  { %2729 = shalt.err (!%p2726_p5)
}
  0x66   :  { %101 = dma.hbm_to_vmem [thread:$0]  %s3092_s8, 8192, %s2961_s4, [#allocation12], %s2810_s15, %s2810_s15, %s2811_s16  }
  0x67   :  { %2796 = dma.done.wait [#allocation3], 256  }
  0x68   :  { %2797 = vsyncadd [#allocation3], 4294967040 }
  0x69   :  { %2798 = dma.done.wait [#allocation6], 8448  }
  0x6a   :  { %2799 = vsyncadd [#allocation6], 4294958848 }
  0x6b   :  { %2800 = dma.done.wait [#allocation9], 12288  }
  0x6c   :  { %2801 = vsyncadd [#allocation9], 4294955008 }
  0x6d   :  { %2802 = dma.done.wait [#allocation12], 8192  }
  0x6e   :  { %2803 = vsyncadd [#allocation12], 4294959104  ;;  %v2247_v0 = vld [vmem:[#allocation7 + $0x4] ss:$16 sps:$4 sm:$0xff]   ;;  %v2249_v1 = vld [vmem:[#allocation7] ss:$16 sps:$4 sm:$0xff]  }
  0x6f   :  { %541 = vmatprep.subr.bf16.mxu0 %v2247_v0  ;;  %v2250_v2 = vld [vmem:[#allocation7 + $0x24] ss:$16 sps:$4 sm:$0xff]   ;;  %v2252_v3 = vld [vmem:[#allocation7 + $0x20] ss:$16 sps:$4 sm:$0xff]   ;;  %v2294_v13 = vld [vmem:[#allocation7 + $0xc] ss:$16 sps:$4 sm:$0xff]  }
  0x70   :  { %542 = vmatpush1.bf16.msra.mxu0 %v2249_v1  ;;  %v2253_v4 = vld [vmem:[#allocation7 + $0x44] ss:$16 sps:$4 sm:$0xff]   ;;  %v2255_v5 = vld [vmem:[#allocation7 + $0x40] ss:$16 sps:$4 sm:$0xff]   ;;  %v2297_v15 = vld [vmem:[#allocation7 + $0x8] ss:$16 sps:$4 sm:$0xff]   ;;  %584 = vmatprep.subr.bf16.mxu1 %v2294_v13 }
  0x71   :  { %543 = vmatprep.subr.bf16.mxu0 %v2250_v2  ;;  %v2256_v6 = vld [vmem:[#allocation7 + $0x64] ss:$16 sps:$4 sm:$0xff]   ;;  %v2258_v7 = vld [vmem:[#allocation7 + $0x60] ss:$16 sps:$4 sm:$0xff]   ;;  %585 = vmatpush1.bf16.msra.mxu1 %v2297_v15  ;;  %v2301_v18 = vld [vmem:[#allocation7 + $0x2c] ss:$16 sps:$4 sm:$0xff]  }
  0x72   :  { %v2259_v8 = vld [vmem:[#allocation7 + $0x84] ss:$16 sps:$4 sm:$0xff]   ;;  %v2261_v9 = vld [vmem:[#allocation7 + $0x80] ss:$16 sps:$4 sm:$0xff]   ;;  %v2303_v19 = vld [vmem:[#allocation7 + $0x28] ss:$16 sps:$4 sm:$0xff]   ;;  %586 = vmatprep.subr.bf16.mxu1 %v2301_v18 }
  0x73   :  { %v2262_v10 = vld [vmem:[#allocation7 + $0xa4] ss:$16 sps:$4 sm:$0xff]   ;;  %v2264_v11 = vld [vmem:[#allocation7 + $0xa0] ss:$16 sps:$4 sm:$0xff]   ;;  %v2304_v20 = vld [vmem:[#allocation7 + $0x4c] ss:$16 sps:$4 sm:$0xff]  }
  0x74   :  { %544 = vmatpush1.bf16.msra.mxu0 %v2252_v3  ;;  %v2265_v12 = vld [vmem:[#allocation7 + $0xc4] ss:$16 sps:$4 sm:$0xff]   ;;  %v2267_v14 = vld [vmem:[#allocation7 + $0xc0] ss:$16 sps:$4 sm:$0xff]   ;;  %v2306_v23 = vld [vmem:[#allocation7 + $0x48] ss:$16 sps:$4 sm:$0xff]  }
  0x75   :  { %545 = vmatprep.subr.bf16.mxu0 %v2253_v4  ;;  %v2268_v16 = vld [vmem:[#allocation7 + $0xe4] ss:$16 sps:$4 sm:$0xff]   ;;  %v2270_v21 = vld [vmem:[#allocation7 + $0xe0] ss:$16 sps:$4 sm:$0xff]   ;;  %587 = vmatpush1.bf16.msra.mxu1 %v2303_v19  ;;  %v2307_v24 = vld [vmem:[#allocation7 + $0x6c] ss:$16 sps:$4 sm:$0xff]  }
  0x76   :  { %v2300_v17 = vld [vmem:[#allocation2 + $0x4] ss:$8 sps:$4 sm:$0xff]   ;;  %588 = vmatprep.subr.bf16.mxu1 %v2304_v20  ;;  %v2273_v25 = vld [vmem:[#allocation7 + $0x100] ss:$16 sps:$4 sm:$0xff]   ;;  %v2309_v27 = vld [vmem:[#allocation7 + $0x68] ss:$16 sps:$4 sm:$0xff]  }
  0x77   :  { %573 = vmatprep.mubr.bf16.mxu0 %v2300_v17  ;;  %616 = vmatprep.mubr.bf16.mxu1 %v2300_v17  ;;  %v2271_v22 = vld [vmem:[#allocation7 + $0x104] ss:$16 sps:$4 sm:$0xff]   ;;  %v2310_v28 = vld [vmem:[#allocation7 + $0x8c] ss:$16 sps:$4 sm:$0xff]   ;;  %v2276_v29 = vld [vmem:[#allocation7 + $0x120] ss:$16 sps:$4 sm:$0xff]  }
  0x78   :  { %546 = vmatpush1.bf16.msra.mxu0 %v2255_v5  ;;  %v2274_v26 = vld [vmem:[#allocation7 + $0x124] ss:$16 sps:$4 sm:$0xff]   ;;  %v2312_v31 = vld [vmem:[#allocation7 + $0x88] ss:$16 sps:$4 sm:$0xff]   ;;  %v2313_v32 = vld [vmem:[#allocation7 + $0xac] ss:$16 sps:$4 sm:$0xff]  }
  0x79   :  { %547 = vmatprep.subr.bf16.mxu0 %v2256_v6  ;;  %589 = vmatpush1.bf16.msra.mxu1 %v2306_v23  ;;  %v2277_v30 = vld [vmem:[#allocation7 + $0x144] ss:$16 sps:$4 sm:$0xff]   ;;  %v2279_v33 = vld [vmem:[#allocation7 + $0x140] ss:$16 sps:$4 sm:$0xff]   ;;  %v2315_v35 = vld [vmem:[#allocation7 + $0xa8] ss:$16 sps:$4 sm:$0xff]  }
  0x7a   :  { %590 = vmatprep.subr.bf16.mxu1 %v2307_v24  ;;  %v2280_v34 = vld [vmem:[#allocation7 + $0x164] ss:$16 sps:$4 sm:$0xff]   ;;  %v2316_v36 = vld [vmem:[#allocation7 + $0xcc] ss:$16 sps:$4 sm:$0xff]   ;;  %v2282_v37 = vld [vmem:[#allocation7 + $0x160] ss:$16 sps:$4 sm:$0xff]  }
  0x7b   :  { %v2283_v38 = vld [vmem:[#allocation7 + $0x184] ss:$16 sps:$4 sm:$0xff]   ;;  %v2318_v39 = vld [vmem:[#allocation7 + $0xc8] ss:$16 sps:$4 sm:$0xff]   ;;  %v2319_v40 = vld [vmem:[#allocation7 + $0xec] ss:$16 sps:$4 sm:$0xff]  }
  0x7c   :  { %548 = vmatpush1.bf16.msra.mxu0 %v2258_v7  ;;  %v2285_v41 = vld [vmem:[#allocation7 + $0x180] ss:$16 sps:$4 sm:$0xff]   ;;  %v2286_v42 = vld [vmem:[#allocation7 + $0x1a4] ss:$16 sps:$4 sm:$0xff]   ;;  %v2321_v43 = vld [vmem:[#allocation7 + $0xe8] ss:$16 sps:$4 sm:$0xff]  }
  0x7d   :  { %549 = vmatprep.subr.bf16.mxu0 %v2259_v8  ;;  %591 = vmatpush1.bf16.msra.mxu1 %v2309_v27  ;;  %v2322_v44 = vld [vmem:[#allocation7 + $0x10c] ss:$16 sps:$4 sm:$0xff]   ;;  %v2288_v45 = vld [vmem:[#allocation7 + $0x1a0] ss:$16 sps:$4 sm:$0xff]   ;;  %v2289_v46 = vld [vmem:[#allocation7 + $0x1c4] ss:$16 sps:$4 sm:$0xff]  }
  0x7e   :  { %592 = vmatprep.subr.bf16.mxu1 %v2310_v28  ;;  %v2324_v47 = vld [vmem:[#allocation7 + $0x108] ss:$16 sps:$4 sm:$0xff]   ;;  %v2325_v48 = vld [vmem:[#allocation7 + $0x12c] ss:$16 sps:$4 sm:$0xff]   ;;  %v2291_v49 = vld [vmem:[#allocation7 + $0x1c0] ss:$16 sps:$4 sm:$0xff]  }
  0x7f   :  { %v2292_v50 = vld [vmem:[#allocation7 + $0x1e4] ss:$16 sps:$4 sm:$0xff]   ;;  %v2327_v51 = vld [vmem:[#allocation7 + $0x128] ss:$16 sps:$4 sm:$0xff]   ;;  %v2328_v52 = vld [vmem:[#allocation7 + $0x14c] ss:$16 sps:$4 sm:$0xff]  }
  0x80   :  { %550 = vmatpush1.bf16.msra.mxu0 %v2261_v9  ;;  %v2296_v53 = vld [vmem:[#allocation7 + $0x1e0] ss:$16 sps:$4 sm:$0xff]   ;;  %v2330_v54 = vld [vmem:[#allocation7 + $0x148] ss:$16 sps:$4 sm:$0xff]   ;;  %v2348_v56 = vld [vmem:[#allocation8 + $0x4] ss:$8 sps:$4 sm:$0xff]  }
  0x81   :  { %551 = vmatprep.subr.bf16.mxu0 %v2262_v10  ;;  %593 = vmatpush1.bf16.msra.mxu1 %v2312_v31  ;;  %v2298_v55 = vld [vmem:[#allocation2] ss:$8 sps:$4 sm:$0xff]   ;;  %v2331_v57 = vld [vmem:[#allocation7 + $0x16c] ss:$16 sps:$4 sm:$0xff]   ;;  %v2349_v62 = vld [vmem:[#allocation8 + $0x10] ss:$8 sps:$4 sm:$0xff]  }
  0x82   :  { %594 = vmatprep.subr.bf16.mxu1 %v2313_v32  ;;  %v2333_v58 = vld [vmem:[#allocation7 + $0x168] ss:$16 sps:$4 sm:$0xff]   ;;  %v2351_v60 = vld [vmem:[#allocation8 + $0x14] ss:$8 sps:$4 sm:$0xff]   ;;  %v2354_v0 = vld [vmem:[#allocation8 + $0x24] ss:$8 sps:$4 sm:$0xff]  }
  0x83   :  { %v2346_v59 = vld [vmem:[#allocation8] ss:$8 sps:$4 sm:$0xff]   ;;  %v2334_v61 = vld [vmem:[#allocation7 + $0x18c] ss:$16 sps:$4 sm:$0xff]   ;;  %v2355_v6 = vld [vmem:[#allocation8 + $0x30] ss:$8 sps:$4 sm:$0xff]  }
  0x84   :  { %552 = vmatpush1.bf16.msra.mxu0 %v2264_v11  ;;  %v2336_v63 = vld [vmem:[#allocation7 + $0x188] ss:$16 sps:$4 sm:$0xff]   ;;  %v2337_v1 = vld [vmem:[#allocation7 + $0x1ac] ss:$16 sps:$4 sm:$0xff]  }
  0x85   :  { %553 = vmatprep.subr.bf16.mxu0 %v2265_v12  ;;  %595 = vmatpush1.bf16.msra.mxu1 %v2315_v35  ;;  %v2352_v2 = vld [vmem:[#allocation8 + $0x20] ss:$8 sps:$4 sm:$0xff]   ;;  %v2357_v4 = vld [vmem:[#allocation8 + $0x34] ss:$8 sps:$4 sm:$0xff]   ;;  %v2360_v8 = vld [vmem:[#allocation8 + $0x44] ss:$8 sps:$4 sm:$0xff]  }
  0x86   :  { %596 = vmatprep.subr.bf16.mxu1 %v2316_v36  ;;  %v2339_v3 = vld [vmem:[#allocation7 + $0x1a8] ss:$16 sps:$4 sm:$0xff]   ;;  %v2340_v5 = vld [vmem:[#allocation7 + $0x1cc] ss:$16 sps:$4 sm:$0xff]  }
  0x87   :  { %v2342_v7 = vld [vmem:[#allocation7 + $0x1c8] ss:$16 sps:$4 sm:$0xff]   ;;  %v2343_v9 = vld [vmem:[#allocation7 + $0x1ec] ss:$16 sps:$4 sm:$0xff]  }
  0x88   :  { %554 = vmatpush1.bf16.msra.mxu0 %v2267_v14  ;;  %v2358_v10 = vld [vmem:[#allocation8 + $0x40] ss:$8 sps:$4 sm:$0xff]   ;;  %v2363_v12 = vld [vmem:[#allocation8 + $0x54] ss:$8 sps:$4 sm:$0xff]   ;;  %v2361_v13 = vld [vmem:[#allocation8 + $0x50] ss:$8 sps:$4 sm:$0xff]  }
  0x89   :  { %555 = vmatprep.subr.bf16.mxu0 %v2268_v16  ;;  %597 = vmatpush1.bf16.msra.mxu1 %v2318_v39  ;;  %v2345_v11 = vld [vmem:[#allocation7 + $0x1e8] ss:$16 sps:$4 sm:$0xff]   ;;  %v2366_v14 = vld [vmem:[#allocation8 + $0x64] ss:$8 sps:$4 sm:$0xff]   ;;  %v2369_v16 = vld [vmem:[#allocation8 + $0x74] ss:$8 sps:$4 sm:$0xff]   ;;  %v191_v39 = vlaneseq }
  0x8a   :  { %598 = vmatprep.subr.bf16.mxu1 %v2319_v40  ;;  %v2364_v15 = vld [vmem:[#allocation8 + $0x60] ss:$8 sps:$4 sm:$0xff]   ;;  %v2367_v17 = vld [vmem:[#allocation8 + $0x70] ss:$8 sps:$4 sm:$0xff]   ;;  %v2372_v18 = vld [vmem:[#allocation8 + $0x84] ss:$8 sps:$4 sm:$0xff]  }
  0x8b   :  { %v2370_v19 = vld [vmem:[#allocation8 + $0x80] ss:$8 sps:$4 sm:$0xff]   ;;  %v2375_v20 = vld [vmem:[#allocation8 + $0x94] ss:$8 sps:$4 sm:$0xff]   ;;  %v2998_v40 = vshrl.u32 %v191_v39, 7 }
  0x8c   :  { %556 = vmatpush1.bf16.msra.mxu0 %v2270_v21  ;;  %v2373_v21 = vld [vmem:[#allocation8 + $0x90] ss:$8 sps:$4 sm:$0xff]   ;;  %v2376_v23 = vld [vmem:[#allocation8 + $0xa0] ss:$8 sps:$4 sm:$0xff]   ;;  %v2381_v24 = vld [vmem:[#allocation8 + $0xb4] ss:$8 sps:$4 sm:$0xff]  }
  0x8d   :  { %557 = vmatprep.subr.bf16.mxu0 %v2271_v22  ;;  %599 = vmatpush1.bf16.msra.mxu1 %v2321_v43  ;;  %v2378_v22 = vld [vmem:[#allocation8 + $0xa4] ss:$8 sps:$4 sm:$0xff]   ;;  %v2382_v27 = vld [vmem:[#allocation8 + $0xc0] ss:$8 sps:$4 sm:$0xff]   ;;  %v2387_v28 = vld [vmem:[#allocation8 + $0xd4] ss:$8 sps:$4 sm:$0xff]  }
  0x8e   :  { %600 = vmatprep.subr.bf16.mxu1 %v2322_v44  ;;  %v2388_v31 = vld [vmem:[#allocation8 + $0xe0] ss:$8 sps:$4 sm:$0xff]   ;;  %v2393_v32 = vld [vmem:[#allocation8 + $0xf4] ss:$8 sps:$4 sm:$0xff]   ;;  %v3007_v43 = vsub.s32 1, %v2998_v40 }
  0x8f   :  { %v2445_v35 = vld [vmem:[#allocation10 + $0x8] ss:$16 sps:$4 sm:$0xff]   ;;  %v2447_v36 = vld [vmem:[#allocation10 + $0xc] ss:$16 sps:$4 sm:$0xff]  }
  0x90   :  { %558 = vmatpush1.bf16.msra.mxu0 %v2273_v25  ;;  %v2379_v25 = vld [vmem:[#allocation8 + $0xb0] ss:$8 sps:$4 sm:$0xff]   ;;  %v2435_v39 = vld [vmem:[#allocation8 + $0x1d4] ss:$8 sps:$4 sm:$0xff]  }
  0x91   :  { %559 = vmatprep.subr.bf16.mxu0 %v2274_v26  ;;  %601 = vmatpush1.bf16.msra.mxu1 %v2324_v47  ;;  %v2384_v26 = vld [vmem:[#allocation8 + $0xc4] ss:$8 sps:$4 sm:$0xff]  }
  0x92   :  { %602 = vmatprep.subr.bf16.mxu1 %v2325_v48 }
  0x94   :  { %560 = vmatpush1.bf16.msra.mxu0 %v2276_v29  ;;  %v2385_v29 = vld [vmem:[#allocation8 + $0xd0] ss:$8 sps:$4 sm:$0xff]  }
  0x95   :  { %561 = vmatprep.subr.bf16.mxu0 %v2277_v30  ;;  %603 = vmatpush1.bf16.msra.mxu1 %v2327_v51  ;;  %v2390_v30 = vld [vmem:[#allocation8 + $0xe4] ss:$8 sps:$4 sm:$0xff]  }
  0x96   :  { %604 = vmatprep.subr.bf16.mxu1 %v2328_v52 }
  0x98   :  { %562 = vmatpush1.bf16.msra.mxu0 %v2279_v33  ;;  %v2391_v33 = vld [vmem:[#allocation8 + $0xf0] ss:$8 sps:$4 sm:$0xff]  }
  0x99   :  { %563 = vmatprep.subr.bf16.mxu0 %v2280_v34  ;;  %605 = vmatpush1.bf16.msra.mxu1 %v2330_v54  ;;  %v2396_v34 = vld [vmem:[#allocation8 + $0x104] ss:$8 sps:$4 sm:$0xff]  }
  0x9a   :  { %606 = vmatprep.subr.bf16.mxu1 %v2331_v57 }
  0x9c   :  { %564 = vmatpush1.bf16.msra.mxu0 %v2282_v37  ;;  %v2453_v37 = vld [vmem:[#allocation10 + $0x2c] ss:$16 sps:$4 sm:$0xff]  }
  0x9d   :  { %565 = vmatprep.subr.bf16.mxu0 %v2283_v38  ;;  %607 = vmatpush1.bf16.msra.mxu1 %v2333_v58  ;;  %v2451_v38 = vld [vmem:[#allocation10 + $0x28] ss:$16 sps:$4 sm:$0xff]  }
  0x9e   :  { %608 = vmatprep.subr.bf16.mxu1 %v2334_v61  ;;  %v2399_v61 = vld [vmem:[#allocation8 + $0x114] ss:$8 sps:$4 sm:$0xff]  }
  0xa0   :  { %566 = vmatpush1.bf16.msra.mxu0 %v2285_v41  ;;  %v3001_v41 = vsub.s32 0, %v2998_v40 }
  0xa1   :  { %567 = vmatprep.subr.bf16.mxu0 %v2286_v42  ;;  %609 = vmatpush1.bf16.msra.mxu1 %v2336_v63  ;;  %v189_v42 = vld [vmem:[%s3087_s3] sm:$0xf]  ;;  %v2402_v63 = vld [vmem:[#allocation8 + $0x124] ss:$8 sps:$4 sm:$0xff]  }
  0xa2   :  { %610 = vmatprep.subr.bf16.mxu1 %v2337_v1  ;;  %v194_v44 = vrot.slane %v189_v42, %v3001_v41  ;;  %v205_v1 = vsub.s32 3, %v2998_v40 }
  0xa4   :  { %568 = vmatpush1.bf16.msra.mxu0 %v2288_v45  ;;  %v198_v45 = vrot.slane %v189_v42, %v3007_v43 }
  0xa5   :  { %569 = vmatprep.subr.bf16.mxu0 %v2289_v46  ;;  %611 = vmatpush1.bf16.msra.mxu1 %v2339_v3  ;;  %v2405_v3 = vld [vmem:[#allocation8 + $0x134] ss:$8 sps:$4 sm:$0xff]  }
  0xa6   :  { %612 = vmatprep.subr.bf16.mxu1 %v2340_v5  ;;  %v206_v5 = vrot.slane %v189_v42, %v205_v1 }
  0xa8   :  { %570 = vmatpush1.bf16.msra.mxu0 %v2291_v49 }
  0xa9   :  { %571 = vmatprep.subr.bf16.mxu0 %v2292_v50  ;;  %613 = vmatpush1.bf16.msra.mxu1 %v2342_v7  ;;  %v2408_v7 = vld [vmem:[#allocation8 + $0x144] ss:$8 sps:$4 sm:$0xff]  }
  0xaa   :  { %614 = vmatprep.subr.bf16.mxu1 %v2343_v9 }
  0xac   :  { %572 = vmatpush1.bf16.msra.mxu0 %v2296_v53 }
  0xad   :  { %1035 = vmatprep.subr.bf16.mxu0 %v2348_v56  ;;  %615 = vmatpush1.bf16.msra.mxu1 %v2345_v11 }
  0xae   :  { %1391 = vmatprep.subr.bf16.mxu1 %v2447_v36  ;;  %v2427_v36 = vld [vmem:[#allocation8 + $0x1b0] ss:$8 sps:$4 sm:$0xff]  }
  0xaf   :  { %574 = vmatmul.mubr.bf16.vlgmr.msra.gmra.mrb[0].mxu0 %v2298_v55 }
  0xb0   :  { %1036 = vmatpush1.bf16.msra.mxu0 %v2346_v59  ;;  %617 = vmatmul.mubr.bf16.vlgmr.msra.gmra.mrb[0].mxu1 %v2298_v55 }
  0xb1   :  { %1037 = vmatprep.subr.bf16.mxu0 %v2351_v60  ;;  %1392 = vmatpush1.bf16.msra.mxu1 %v2445_v35  ;;  %v2394_v60 = vld [vmem:[#allocation8 + $0x100] ss:$8 sps:$4 sm:$0xff]   ;;  %v2429_v35 = vld [vmem:[#allocation8 + $0x1b4] ss:$8 sps:$4 sm:$0xff]  }
  0xb2   :  { %1393 = vmatprep.subr.bf16.mxu1 %v2453_v37  ;;  %v2432_v37 = vld [vmem:[#allocation8 + $0x1c4] ss:$8 sps:$4 sm:$0xff]  }
  0xb4   :  { %1038 = vmatpush1.bf16.msra.mxu0 %v2349_v62  ;;  %v2397_v62 = vld [vmem:[#allocation8 + $0x110] ss:$8 sps:$4 sm:$0xff]  }
  0xb5   :  { %1039 = vmatprep.subr.bf16.mxu0 %v2354_v0  ;;  %1394 = vmatpush1.bf16.msra.mxu1 %v2451_v38  ;;  %v201_v0 = vsub.s32 2, %v2998_v40  ;;  %v2430_v38 = vld [vmem:[#allocation8 + $0x1c0] ss:$8 sps:$4 sm:$0xff]  }
  0xb8   :  { %1040 = vmatpush1.bf16.msra.mxu0 %v2352_v2  ;;  %v2400_v2 = vld [vmem:[#allocation8 + $0x120] ss:$8 sps:$4 sm:$0xff]  }
  0xb9   :  { %1041 = vmatprep.subr.bf16.mxu0 %v2357_v4  ;;  %v202_v4 = vrot.slane %v189_v42, %v201_v0  ;;  %v2433_v42 = vld [vmem:[#allocation8 + $0x1d0] ss:$8 sps:$4 sm:$0xff]  }
  0xbc   :  { %1042 = vmatpush1.bf16.msra.mxu0 %v2355_v6  ;;  %v2403_v6 = vld [vmem:[#allocation8 + $0x130] ss:$8 sps:$4 sm:$0xff]  }
  0xbd   :  { %1043 = vmatprep.subr.bf16.mxu0 %v2360_v8 }
  0xc0   :  { %1044 = vmatpush1.bf16.msra.mxu0 %v2358_v10 }
  0xc1   :  { %1045 = vmatprep.subr.bf16.mxu0 %v2363_v12 }
  0xc4   :  { %1046 = vmatpush1.bf16.msra.mxu0 %v2361_v13  ;;  %v2406_v13 = vld [vmem:[#allocation8 + $0x140] ss:$8 sps:$4 sm:$0xff]  }
  0xc5   :  { %1047 = vmatprep.subr.bf16.mxu0 %v2366_v14 }
  0xc8   :  { %1048 = vmatpush1.bf16.msra.mxu0 %v2364_v15 }
  0xc9   :  { %1049 = vmatprep.subr.bf16.mxu0 %v2369_v16 }
  0xcc   :  { %1050 = vmatpush1.bf16.msra.mxu0 %v2367_v17  ;;  %v2411_v17 = vld [vmem:[#allocation8 + $0x154] ss:$8 sps:$4 sm:$0xff]  }
  0xcd   :  { %1051 = vmatprep.subr.bf16.mxu0 %v2372_v18 }
  0xd0   :  { %1052 = vmatpush1.bf16.msra.mxu0 %v2370_v19 }
  0xd1   :  { %1053 = vmatprep.subr.bf16.mxu0 %v2375_v20 }
  0xd4   :  { %1054 = vmatpush1.bf16.msra.mxu0 %v2373_v21 }
  0xd5   :  { %1055 = vmatprep.subr.bf16.mxu0 %v2378_v22  ;;  %v2409_v22 = vld [vmem:[#allocation8 + $0x150] ss:$8 sps:$4 sm:$0xff]  }
  0xd8   :  { %1056 = vmatpush1.bf16.msra.mxu0 %v2376_v23 }
  0xd9   :  { %1057 = vmatprep.subr.bf16.mxu0 %v2381_v24  ;;  %v2414_v24 = vld [vmem:[#allocation8 + $0x164] ss:$8 sps:$4 sm:$0xff]  }
  0xdc   :  { %1058 = vmatpush1.bf16.msra.mxu0 %v2379_v25 }
  0xdd   :  { %1059 = vmatprep.subr.bf16.mxu0 %v2384_v26  ;;  %v2412_v26 = vld [vmem:[#allocation8 + $0x160] ss:$8 sps:$4 sm:$0xff]  }
  0xe0   :  { %1060 = vmatpush1.bf16.msra.mxu0 %v2382_v27  ;;  %v2417_v27 = vld [vmem:[#allocation8 + $0x174] ss:$8 sps:$4 sm:$0xff]  }
  0xe1   :  { %1061 = vmatprep.subr.bf16.mxu0 %v2387_v28  ;;  %v2415_v28 = vld [vmem:[#allocation8 + $0x170] ss:$8 sps:$4 sm:$0xff]  }
  0xe4   :  { %1062 = vmatpush1.bf16.msra.mxu0 %v2385_v29  ;;  %v2420_v29 = vld [vmem:[#allocation8 + $0x184] ss:$8 sps:$4 sm:$0xff]  }
  0xe5   :  { %1063 = vmatprep.subr.bf16.mxu0 %v2390_v30  ;;  %v2418_v30 = vld [vmem:[#allocation8 + $0x180] ss:$8 sps:$4 sm:$0xff]  }
  0xe8   :  { %1064 = vmatpush1.bf16.msra.mxu0 %v2388_v31  ;;  %v2423_v31 = vld [vmem:[#allocation8 + $0x194] ss:$8 sps:$4 sm:$0xff]  }
  0xe9   :  { %1065 = vmatprep.subr.bf16.mxu0 %v2393_v32  ;;  %v2421_v32 = vld [vmem:[#allocation8 + $0x190] ss:$8 sps:$4 sm:$0xff]  }
  0xec   :  { %1066 = vmatpush1.bf16.msra.mxu0 %v2391_v33  ;;  %v2426_v33 = vld [vmem:[#allocation8 + $0x1a4] ss:$8 sps:$4 sm:$0xff]  }
  0xed   :  { %1078 = vmatprep.subr.bf16.mxu0 %v2396_v34  ;;  %v2424_v34 = vld [vmem:[#allocation8 + $0x1a0] ss:$8 sps:$4 sm:$0xff]  }
 0x182   :  { %v575_v46 = vpop.f32.mrb[0].mxu0 }
 0x183   :  { %v576_v47 = vadd.f32 %v575_v46, %v194_v44  ;;  %v577_v48 = vpop.f32.mrb[1].mxu0  ;;  %v618_v8 = vpop.f32.mrb[0].mxu1  ;;  %v2441_v46 = vld [vmem:[#allocation8 + $0x1f4] ss:$8 sps:$4 sm:$0xff]  }
 0x184   :  { %v578_v49 = vadd.f32 %v577_v48, %v198_v45  ;;  %v579_v50 = vpop.f32.mrb[2].mxu0  ;;  %v619_v9 = vadd.f32 %v618_v8, %v202_v4  ;;  %v620_v10 = vpop.f32.mrb[1].mxu1  ;;  %v2444_v48 = vld [vmem:[#allocation10 + $0x4] ss:$16 sps:$4 sm:$0xff]   ;;  %v2818_v8 = vmov 0  }
 0x185   :  { %v580_v51 = vadd.f32 %v579_v50, %v194_v44  ;;  %v581_v52 = vpop.f32.mrb[3].mxu0  ;;  %v627_v54 = vmax.f32 %v576_v47, 0.0  ;;  %v621_v11 = vadd.f32 %v620_v10, %v206_v5  ;;  %v622_v12 = vpop.f32.mrb[2].mxu1  ;;  %v2438_v44 = vld [vmem:[#allocation8 + $0x1e4] ss:$8 sps:$4 sm:$0xff]   ;;  %1423 = vmatprep.mubr.bf16.mxu1 %v2818_v8 }
 0x186   :  { %v582_v53 = vadd.f32 %v581_v52, %v198_v45  ;;  %v628_v56 = vmax.f32 %v578_v49, 0.0  ;;  %v629_v14 = vmax.f32 %v619_v9, 0.0  ;;  %v623_v15 = vadd.f32 %v622_v12, %v202_v4  ;;  %v624_v16 = vpop.f32.mrb[3].mxu1  ;;  %v2436_v45 = vld [vmem:[#allocation8 + $0x1e0] ss:$8 sps:$4 sm:$0xff]  }
 0x187   :  { %v631_v55 = vmax.f32 %v580_v51, 0.0  ;;  %v630_v18 = vmax.f32 %v621_v11, 0.0  ;;  %v625_v19 = vadd.f32 %v624_v16, %v206_v5  ;;  %v2439_v47 = vld [vmem:[#allocation8 + $0x1f0] ss:$8 sps:$4 sm:$0xff]   ;;  %v2450_v50 = vld [vmem:[#allocation10 + $0x24] ss:$16 sps:$4 sm:$0xff]  }
 0x188   :  { %v632_v57 = vmax.f32 %v582_v53, 0.0  ;;  %v633_v20 = vmax.f32 %v623_v15, 0.0  ;;  %v2442_v49 = vld [vmem:[#allocation10] ss:$16 sps:$4 sm:$0xff]   ;;  %v2456_v52 = vld [vmem:[#allocation10 + $0x44] ss:$16 sps:$4 sm:$0xff]  }
 0x189   :  { %v635_v58 = vpack.c.bf16 %v631_v55, %v627_v54  ;;  %v634_v21 = vmax.f32 %v625_v19, 0.0  ;;  %v2448_v51 = vld [vmem:[#allocation10 + $0x20] ss:$16 sps:$4 sm:$0xff]   ;;  %v2459_v53 = vld [vmem:[#allocation10 + $0x4c] ss:$16 sps:$4 sm:$0xff]  }
 0x18a   :  { %v636_v59 = vpack.c.bf16 %v632_v57, %v628_v56  ;;  %v637_v23 = vpack.c.bf16 %v633_v20, %v629_v14  ;;  %v2454_v54 = vld [vmem:[#allocation10 + $0x40] ss:$16 sps:$4 sm:$0xff]   ;;  %v2457_v55 = vld [vmem:[#allocation10 + $0x48] ss:$16 sps:$4 sm:$0xff]   ;;  %1395 = vmatprep.subr.bf16.mxu1 %v2459_v53  ;;  %v2462_v56 = vld [vmem:[#allocation10 + $0x64] ss:$16 sps:$4 sm:$0xff]  }
 0x18b   :  { %v638_v25 = vpack.c.bf16 %v634_v21, %v630_v18  ;;  %1396 = vmatpush1.bf16.msra.mxu1 %v2457_v55  ;;  %v2465_v57 = vld [vmem:[#allocation10 + $0x6c] ss:$16 sps:$4 sm:$0xff]   ;;  %v2472_v4 = vld [vmem:[#allocation10 + $0xa0] ss:$16 sps:$4 sm:$0xff]   ;;  %v2475_v5 = vld [vmem:[#allocation10 + $0xa8] ss:$16 sps:$4 sm:$0xff]  }
 0x18c   :  { %1067 = vmatprep.mubr.bf16.mxu0 %v636_v59  ;;  %v2463_v59 = vld [vmem:[#allocation10 + $0x68] ss:$16 sps:$4 sm:$0xff]   ;;  %1397 = vmatprep.subr.bf16.mxu1 %v2465_v57  ;;  %v2478_v9 = vld [vmem:[#allocation10 + $0xc0] ss:$16 sps:$4 sm:$0xff]   ;;  %v2486_v11 = vld [vmem:[#allocation10 + $0xe4] ss:$16 sps:$4 sm:$0xff]  }
 0x18d   :  { %1068 = vmatmul.mubr.bf16.vlgmr.msra.gmra.mrb[4].mxu0 %v635_v58  ;;  %v2460_v58 = vld [vmem:[#allocation10 + $0x60] ss:$16 sps:$4 sm:$0xff]   ;;  %v2481_v10 = vld [vmem:[#allocation10 + $0xc8] ss:$16 sps:$4 sm:$0xff]   ;;  %v2489_v12 = vld [vmem:[#allocation10 + $0xec] ss:$16 sps:$4 sm:$0xff]  }
 0x18e   :  { %1079 = vmatpush1.bf16.msra.mxu0 %v2394_v60  ;;  %1110 = vmatprep.mubr.bf16.mxu0 %v638_v25  ;;  %v2468_v60 = vld [vmem:[#allocation10 + $0x84] ss:$16 sps:$4 sm:$0xff]   ;;  %v2487_v14 = vld [vmem:[#allocation10 + $0xe8] ss:$16 sps:$4 sm:$0xff]   ;;  %v703_v16 = vld [vmem:[%s3089_s5] sm:$0x3] }
 0x18f   :  { %1080 = vmatprep.subr.bf16.mxu0 %v2399_v61  ;;  %1398 = vmatpush1.bf16.msra.mxu1 %v2463_v59  ;;  %v2471_v61 = vld [vmem:[#allocation10 + $0x8c] ss:$16 sps:$4 sm:$0xff]   ;;  %v712_v18 = vrot.slane %v703_v16, %v3007_v43  ;;  %v2505_v53 = vld [vmem:[#allocation11 + $0x50] ss:$8 sps:$4 sm:$0xff]   ;;  %v2508_v55 = vld [vmem:[#allocation11 + $0x60] ss:$8 sps:$4 sm:$0xff]  }
 0x190   :  { %1399 = vmatprep.subr.bf16.mxu1 %v2471_v61  ;;  %v2492_v15 = vld [vmem:[#allocation11 + $0x4] ss:$8 sps:$4 sm:$0xff]   ;;  %v2511_v57 = vld [vmem:[#allocation11 + $0x70] ss:$8 sps:$4 sm:$0xff]   ;;  %v2514_v59 = vld [vmem:[#allocation11 + $0x80] ss:$8 sps:$4 sm:$0xff]  }
 0x191   :  { %v2517_v61 = vld [vmem:[#allocation11 + $0x90] ss:$8 sps:$4 sm:$0xff]  }
 0x192   :  { %1081 = vmatpush1.bf16.msra.mxu0 %v2397_v62  ;;  %v2466_v62 = vld [vmem:[#allocation10 + $0x80] ss:$16 sps:$4 sm:$0xff]  }
 0x193   :  { %1082 = vmatprep.subr.bf16.mxu0 %v2402_v63  ;;  %v2469_v63 = vld [vmem:[#allocation10 + $0x88] ss:$16 sps:$4 sm:$0xff]  }
 0x194   :  { %1400 = vmatpush1.bf16.msra.mxu1 %v2469_v63  ;;  %v2520_v63 = vld [vmem:[#allocation11 + $0xa0] ss:$8 sps:$4 sm:$0xff]  }
 0x196   :  { %1083 = vmatpush1.bf16.msra.mxu0 %v2400_v2  ;;  %v2474_v2 = vld [vmem:[#allocation10 + $0xa4] ss:$16 sps:$4 sm:$0xff]  }
 0x197   :  { %1084 = vmatprep.subr.bf16.mxu0 %v2405_v3  ;;  %v2477_v3 = vld [vmem:[#allocation10 + $0xac] ss:$16 sps:$4 sm:$0xff]  }
 0x198   :  { %1401 = vmatprep.subr.bf16.mxu1 %v2477_v3  ;;  %v2523_v3 = vld [vmem:[#allocation11 + $0xb0] ss:$8 sps:$4 sm:$0xff]  }
 0x199   :  { %1402 = vmatpush1.bf16.msra.mxu1 %v2475_v5  ;;  %v2526_v5 = vld [vmem:[#allocation11 + $0xc0] ss:$8 sps:$4 sm:$0xff]  }
 0x19a   :  { %1085 = vmatpush1.bf16.msra.mxu0 %v2403_v6  ;;  %v2480_v6 = vld [vmem:[#allocation10 + $0xc4] ss:$16 sps:$4 sm:$0xff]  }
 0x19b   :  { %1086 = vmatprep.subr.bf16.mxu0 %v2408_v7  ;;  %v2483_v7 = vld [vmem:[#allocation10 + $0xcc] ss:$16 sps:$4 sm:$0xff]  }
 0x19c   :  { %1403 = vmatprep.subr.bf16.mxu1 %v2483_v7  ;;  %v2529_v7 = vld [vmem:[#allocation11 + $0xd0] ss:$8 sps:$4 sm:$0xff]  }
 0x19d   :  { %1404 = vmatpush1.bf16.msra.mxu1 %v2481_v10  ;;  %v2537_v10 = vld [vmem:[#allocation11 + $0xf4] ss:$8 sps:$4 sm:$0xff]  }
 0x19e   :  { %1087 = vmatpush1.bf16.msra.mxu0 %v2406_v13  ;;  %v2484_v13 = vld [vmem:[#allocation10 + $0xe0] ss:$16 sps:$4 sm:$0xff]   ;;  %1405 = vmatprep.subr.bf16.mxu1 %v2489_v12  ;;  %v2540_v12 = vld [vmem:[#allocation11 + $0x104] ss:$8 sps:$4 sm:$0xff]  }
 0x19f   :  { %1088 = vmatprep.subr.bf16.mxu0 %v2411_v17  ;;  %v708_v17 = vrot.slane %v703_v16, %v3001_v41 }
 0x1a1   :  { %1406 = vmatpush1.bf16.msra.mxu1 %v2487_v14 }
 0x1a2   :  { %1089 = vmatpush1.bf16.msra.mxu0 %v2409_v22  ;;  %1842 = vmatprep.subr.bf16.mxu1 %v2492_v15 }
 0x1a3   :  { %1090 = vmatprep.subr.bf16.mxu0 %v2414_v24 }
 0x1a6   :  { %1091 = vmatpush1.bf16.msra.mxu0 %v2412_v26 }
 0x1a7   :  { %1092 = vmatprep.subr.bf16.mxu0 %v2417_v27 }
 0x1aa   :  { %1093 = vmatpush1.bf16.msra.mxu0 %v2415_v28 }
 0x1ab   :  { %1094 = vmatprep.subr.bf16.mxu0 %v2420_v29 }
 0x1ae   :  { %1095 = vmatpush1.bf16.msra.mxu0 %v2418_v30 }
 0x1af   :  { %1096 = vmatprep.subr.bf16.mxu0 %v2423_v31  ;;  %v1127_v31 = vld [vmem:[#allocation5] sm:$0xff] }
 0x1b2   :  { %1097 = vmatpush1.bf16.msra.mxu0 %v2421_v32 }
 0x1b3   :  { %1098 = vmatprep.subr.bf16.mxu0 %v2426_v33  ;;  %v1128_v33 = vld [vmem:[#allocation5 + $0x8] sm:$0xff] }
 0x1b6   :  { %1099 = vmatpush1.bf16.msra.mxu0 %v2424_v34 }
 0x1b7   :  { %1100 = vmatprep.subr.bf16.mxu0 %v2429_v35 }
 0x1ba   :  { %1101 = vmatpush1.bf16.msra.mxu0 %v2427_v36 }
 0x1bb   :  { %1102 = vmatprep.subr.bf16.mxu0 %v2432_v37 }
 0x1be   :  { %1103 = vmatpush1.bf16.msra.mxu0 %v2430_v38 }
 0x1bf   :  { %1104 = vmatprep.subr.bf16.mxu0 %v2435_v39  ;;  %v2490_v39 = vld [vmem:[#allocation11] ss:$8 sps:$4 sm:$0xff]  }
 0x1c2   :  { %1105 = vmatpush1.bf16.msra.mxu0 %v2433_v42 }
 0x1c3   :  { %1106 = vmatprep.subr.bf16.mxu0 %v2438_v44  ;;  %v2495_v44 = vld [vmem:[#allocation11 + $0x14] ss:$8 sps:$4 sm:$0xff]  }
 0x1c6   :  { %1107 = vmatpush1.bf16.msra.mxu0 %v2436_v45  ;;  %v2493_v45 = vld [vmem:[#allocation11 + $0x10] ss:$8 sps:$4 sm:$0xff]  }
 0x1c7   :  { %1108 = vmatprep.subr.bf16.mxu0 %v2441_v46  ;;  %v2498_v46 = vld [vmem:[#allocation11 + $0x24] ss:$8 sps:$4 sm:$0xff]  }
 0x1ca   :  { %1109 = vmatpush1.bf16.msra.mxu0 %v2439_v47  ;;  %v2496_v47 = vld [vmem:[#allocation11 + $0x20] ss:$8 sps:$4 sm:$0xff]  }
 0x1cb   :  { %1348 = vmatprep.subr.bf16.mxu0 %v2444_v48  ;;  %v2501_v48 = vld [vmem:[#allocation11 + $0x34] ss:$8 sps:$4 sm:$0xff]  }
 0x1cd   :  { %1111 = vmatmul.mubr.bf16.vlgmr.msra.gmra.mrb[4].mxu0 %v637_v23 }
 0x1ce   :  { %1349 = vmatpush1.bf16.msra.mxu0 %v2442_v49  ;;  %1380 = vmatprep.mubr.bf16.mxu0 %v2818_v8  ;;  %v2499_v49 = vld [vmem:[#allocation11 + $0x30] ss:$8 sps:$4 sm:$0xff]   ;;  %v2534_v8 = vld [vmem:[#allocation11 + $0xe4] ss:$8 sps:$4 sm:$0xff]  }
 0x1cf   :  { %1350 = vmatprep.subr.bf16.mxu0 %v2450_v50  ;;  %v2504_v50 = vld [vmem:[#allocation11 + $0x44] ss:$8 sps:$4 sm:$0xff]  }
 0x1d2   :  { %1351 = vmatpush1.bf16.msra.mxu0 %v2448_v51  ;;  %v2502_v51 = vld [vmem:[#allocation11 + $0x40] ss:$8 sps:$4 sm:$0xff]  }
 0x1d3   :  { %1352 = vmatprep.subr.bf16.mxu0 %v2456_v52  ;;  %v2507_v52 = vld [vmem:[#allocation11 + $0x54] ss:$8 sps:$4 sm:$0xff]  }
 0x1d6   :  { %1353 = vmatpush1.bf16.msra.mxu0 %v2454_v54  ;;  %v2510_v54 = vld [vmem:[#allocation11 + $0x64] ss:$8 sps:$4 sm:$0xff]  }
 0x1d7   :  { %1354 = vmatprep.subr.bf16.mxu0 %v2462_v56  ;;  %v2513_v56 = vld [vmem:[#allocation11 + $0x74] ss:$8 sps:$4 sm:$0xff]  }
 0x1da   :  { %1355 = vmatpush1.bf16.msra.mxu0 %v2460_v58  ;;  %v2516_v58 = vld [vmem:[#allocation11 + $0x84] ss:$8 sps:$4 sm:$0xff]  }
 0x1db   :  { %1356 = vmatprep.subr.bf16.mxu0 %v2468_v60  ;;  %v2519_v60 = vld [vmem:[#allocation11 + $0x94] ss:$8 sps:$4 sm:$0xff]  }
 0x1de   :  { %1357 = vmatpush1.bf16.msra.mxu0 %v2466_v62  ;;  %v2522_v62 = vld [vmem:[#allocation11 + $0xa4] ss:$8 sps:$4 sm:$0xff]  }
 0x1df   :  { %1358 = vmatprep.subr.bf16.mxu0 %v2474_v2  ;;  %v2525_v2 = vld [vmem:[#allocation11 + $0xb4] ss:$8 sps:$4 sm:$0xff]  }
 0x1e2   :  { %1359 = vmatpush1.bf16.msra.mxu0 %v2472_v4  ;;  %v2528_v4 = vld [vmem:[#allocation11 + $0xc4] ss:$8 sps:$4 sm:$0xff]  }
 0x1e3   :  { %1360 = vmatprep.subr.bf16.mxu0 %v2480_v6  ;;  %v2531_v6 = vld [vmem:[#allocation11 + $0xd4] ss:$8 sps:$4 sm:$0xff]  }
 0x1e6   :  { %1361 = vmatpush1.bf16.msra.mxu0 %v2478_v9  ;;  %v2532_v9 = vld [vmem:[#allocation11 + $0xe0] ss:$8 sps:$4 sm:$0xff]  }
 0x1e7   :  { %1362 = vmatprep.subr.bf16.mxu0 %v2486_v11  ;;  %v2535_v11 = vld [vmem:[#allocation11 + $0xf0] ss:$8 sps:$4 sm:$0xff]  }
 0x1ea   :  { %1363 = vmatpush1.bf16.msra.mxu0 %v2484_v13  ;;  %v1166_v13 = vld [vmem:[%s3091_s7] sm:$0xf]  ;;  %s2819_s7 = smov [#allocation14]  }
 0x1eb   :  { %v1171_v14 = vrot.slane %v1166_v13, %v3001_v41  ;;  %v1179_v15 = vrot.slane %v1166_v13, %v201_v0  ;;  %v1175_v16 = vrot.slane %v1166_v13, %v3007_v43  ;;  %s1957_s1 = sshll.u32 %s2819_s7, 4  ;;  %s1958_s1 = int_to_ptr.vmem [resolvable:$true] %s1957_s1 }
 0x1ec   :  { %s2730_s22 = scalar_lea.vmem %s1958_s1, 256  ;;  %p2735_p7 = scmp.lt.s32.totalorder %s1958_s1, %s1958_s1 }
 0x1ed   :  { %p2731_p6 = scmp.ne.s32.totalorder %s1958_s1, %s2730_s22  ;;  %p2736_p8 = scmp.lt.s32.totalorder %s2730_s22, %s2730_s22 }
 0x1ef   :  { %p2737_p9 = por %p2736_p8, %p2735_p7 }
 0x1f1   :  { %p2738_p10 = pnand %p2737_p9, %p2731_p6 }
 0x2a0   :  { %v1112_v19 = vpop.f32.mrb[4].mxu0 }
 0x2a1   :  { %v2217_v20 = vadd.f32 %v1112_v19, %v708_v17  ;;  %v1114_v21 = vpop.f32.mrb[5].mxu0 }
 0x2a2   :  { %v2218_v22 = vadd.f32 %v1114_v21, %v712_v18  ;;  %v1116_v23 = vpop.f32.mrb[6].mxu0 }
 0x2a3   :  { %1936 = vst [vmem:[#allocation14] sm:$0xff] %v2217_v20  ;;  %v2219_v24 = vadd.f32 %v1116_v23, %v708_v17  ;;  %v1118_v25 = vpop.f32.mrb[7].mxu0  ;;  %v1183_v17 = vrot.slane %v1166_v13, %v205_v1  ;;  %v2585_v13 = vld [vmem:[#allocation11 + $0x1f4] ss:$8 sps:$4 sm:$0xff]  }
 0x2a4   :  { %v1121_v26 = vmul.f32 0.5, %v2218_v22  ;;  %1938 = vst [vmem:[#allocation16] sm:$0xff] %v2218_v22  ;;  %v2220_v27 = vadd.f32 %v1118_v25, %v712_v18 }
 0x2a5   :  { %1937 = vst [vmem:[#allocation14 + $0x8] sm:$0xff] %v2219_v24 }
 0x2a6   :  { %v1123_v28 = vmul.f32 1.442695, %v1121_v26  ;;  %v1122_v29 = vmul.f32 0.5, %v2220_v27  ;;  %1939 = vst [vmem:[#allocation16 + $0x8] sm:$0xff] %v2220_v27 }
 0x2a8   :  { %2586 = vpow2.f32 %v1123_v28  ;;  %v1125_v30 = vmul.f32 1.442695, %v1122_v29 }
 0x2aa   :  { %2588 = vpow2.f32 %v1125_v30 }
 0x2b2   :  { %v2587_v32 = vpop.eup %2586 }
 0x2b3   :  { %v1129_v34 = vmul.f32 %v2587_v32, %v1127_v31 }
 0x2b4   :  { %v2589_v35 = vpop.eup %2588 }
 0x2b5   :  { %v1130_v36 = vmul.f32 %v2589_v35, %v1128_v33  ;;  %v1131_v37 = vadd.f32 %v2217_v20, %v1129_v34 }
 0x2b7   :  { %v1132_v38 = vadd.f32 %v2219_v24, %v1130_v36 }
 0x2b9   :  { %v1133_v42 = vpack.c.bf16 %v1132_v38, %v1131_v37 }
 0x2bb   :  { %1381 = vmatmul.mubr.bf16.vlgmr.msra.gmra.mrb[8].mxu0 %v1133_v42  ;;  %1424 = vmatmul.mubr.bf16.vlgmr.msra.gmra.mrb[4].mxu1 %v1133_v42 }
 0x2bc   :  { %1843 = vmatpush1.bf16.msra.mxu1 %v2490_v39 }
 0x2bd   :  { %1844 = vmatprep.subr.bf16.mxu1 %v2495_v44 }
 0x2c0   :  { %1845 = vmatpush1.bf16.msra.mxu1 %v2493_v45 }
 0x2c1   :  { %1846 = vmatprep.subr.bf16.mxu1 %v2498_v46  ;;  %v2538_v46 = vld [vmem:[#allocation11 + $0x100] ss:$8 sps:$4 sm:$0xff]  }
 0x2c4   :  { %1847 = vmatpush1.bf16.msra.mxu1 %v2496_v47  ;;  %v2543_v47 = vld [vmem:[#allocation11 + $0x114] ss:$8 sps:$4 sm:$0xff]  }
 0x2c5   :  { %1848 = vmatprep.subr.bf16.mxu1 %v2501_v48  ;;  %v2541_v48 = vld [vmem:[#allocation11 + $0x110] ss:$8 sps:$4 sm:$0xff]  }
 0x2c8   :  { %1849 = vmatpush1.bf16.msra.mxu1 %v2499_v49  ;;  %v2546_v49 = vld [vmem:[#allocation11 + $0x124] ss:$8 sps:$4 sm:$0xff]  }
 0x2c9   :  { %1850 = vmatprep.subr.bf16.mxu1 %v2504_v50  ;;  %v2544_v50 = vld [vmem:[#allocation11 + $0x120] ss:$8 sps:$4 sm:$0xff]  }
 0x2cc   :  { %1851 = vmatpush1.bf16.msra.mxu1 %v2502_v51  ;;  %v2549_v51 = vld [vmem:[#allocation11 + $0x134] ss:$8 sps:$4 sm:$0xff]  }
 0x2cd   :  { %1852 = vmatprep.subr.bf16.mxu1 %v2507_v52  ;;  %v2547_v52 = vld [vmem:[#allocation11 + $0x130] ss:$8 sps:$4 sm:$0xff]  }
 0x2d0   :  { %1853 = vmatpush1.bf16.msra.mxu1 %v2505_v53  ;;  %v2552_v53 = vld [vmem:[#allocation11 + $0x144] ss:$8 sps:$4 sm:$0xff]  }
 0x2d1   :  { %1854 = vmatprep.subr.bf16.mxu1 %v2510_v54  ;;  %v2550_v54 = vld [vmem:[#allocation11 + $0x140] ss:$8 sps:$4 sm:$0xff]  }
 0x2d4   :  { %1855 = vmatpush1.bf16.msra.mxu1 %v2508_v55  ;;  %v2555_v55 = vld [vmem:[#allocation11 + $0x154] ss:$8 sps:$4 sm:$0xff]  }
 0x2d5   :  { %1856 = vmatprep.subr.bf16.mxu1 %v2513_v56  ;;  %v2553_v56 = vld [vmem:[#allocation11 + $0x150] ss:$8 sps:$4 sm:$0xff]  }
 0x2d8   :  { %1857 = vmatpush1.bf16.msra.mxu1 %v2511_v57  ;;  %v2558_v57 = vld [vmem:[#allocation11 + $0x164] ss:$8 sps:$4 sm:$0xff]  }
 0x2d9   :  { %1858 = vmatprep.subr.bf16.mxu1 %v2516_v58  ;;  %v2556_v58 = vld [vmem:[#allocation11 + $0x160] ss:$8 sps:$4 sm:$0xff]  }
 0x2dc   :  { %1859 = vmatpush1.bf16.msra.mxu1 %v2514_v59  ;;  %v2561_v59 = vld [vmem:[#allocation11 + $0x174] ss:$8 sps:$4 sm:$0xff]  }
 0x2dd   :  { %1860 = vmatprep.subr.bf16.mxu1 %v2519_v60  ;;  %v2559_v60 = vld [vmem:[#allocation11 + $0x170] ss:$8 sps:$4 sm:$0xff]  }
 0x2e0   :  { %1861 = vmatpush1.bf16.msra.mxu1 %v2517_v61  ;;  %v2564_v61 = vld [vmem:[#allocation11 + $0x184] ss:$8 sps:$4 sm:$0xff]  }
 0x2e1   :  { %1862 = vmatprep.subr.bf16.mxu1 %v2522_v62  ;;  %v2562_v62 = vld [vmem:[#allocation11 + $0x180] ss:$8 sps:$4 sm:$0xff]  }
 0x2e4   :  { %1863 = vmatpush1.bf16.msra.mxu1 %v2520_v63  ;;  %v2567_v63 = vld [vmem:[#allocation11 + $0x194] ss:$8 sps:$4 sm:$0xff]  }
 0x2e5   :  { %1864 = vmatprep.subr.bf16.mxu1 %v2525_v2  ;;  %v2565_v2 = vld [vmem:[#allocation11 + $0x190] ss:$8 sps:$4 sm:$0xff]  }
 0x2e8   :  { %1865 = vmatpush1.bf16.msra.mxu1 %v2523_v3  ;;  %v2570_v3 = vld [vmem:[#allocation11 + $0x1a4] ss:$8 sps:$4 sm:$0xff]  }
 0x2e9   :  { %1866 = vmatprep.subr.bf16.mxu1 %v2528_v4  ;;  %v2568_v4 = vld [vmem:[#allocation11 + $0x1a0] ss:$8 sps:$4 sm:$0xff]  }
 0x2ec   :  { %1867 = vmatpush1.bf16.msra.mxu1 %v2526_v5  ;;  %v2573_v5 = vld [vmem:[#allocation11 + $0x1b4] ss:$8 sps:$4 sm:$0xff]  }
 0x2ed   :  { %1868 = vmatprep.subr.bf16.mxu1 %v2531_v6  ;;  %v2571_v6 = vld [vmem:[#allocation11 + $0x1b0] ss:$8 sps:$4 sm:$0xff]  }
 0x2f0   :  { %1869 = vmatpush1.bf16.msra.mxu1 %v2529_v7  ;;  %v2576_v7 = vld [vmem:[#allocation11 + $0x1c4] ss:$8 sps:$4 sm:$0xff]  }
 0x2f1   :  { %1870 = vmatprep.subr.bf16.mxu1 %v2534_v8  ;;  %v2574_v8 = vld [vmem:[#allocation11 + $0x1c0] ss:$8 sps:$4 sm:$0xff]  }
 0x2f4   :  { %1871 = vmatpush1.bf16.msra.mxu1 %v2532_v9  ;;  %v2579_v9 = vld [vmem:[#allocation11 + $0x1d4] ss:$8 sps:$4 sm:$0xff]  }
 0x2f5   :  { %1872 = vmatprep.subr.bf16.mxu1 %v2537_v10  ;;  %v2577_v10 = vld [vmem:[#allocation11 + $0x1d0] ss:$8 sps:$4 sm:$0xff]  }
 0x2f8   :  { %1873 = vmatpush1.bf16.msra.mxu1 %v2535_v11  ;;  %v2582_v11 = vld [vmem:[#allocation11 + $0x1e4] ss:$8 sps:$4 sm:$0xff]  }
 0x2f9   :  { %1885 = vmatprep.subr.bf16.mxu1 %v2540_v12  ;;  %v2580_v12 = vld [vmem:[#allocation11 + $0x1e0] ss:$8 sps:$4 sm:$0xff]  }
 0x38e   :  { %v1382_v18 = vpop.f32.mrb[8].mxu0  ;;  %v1425_v19 = vpop.f32.mrb[4].mxu1 }
 0x38f   :  { %v1383_v20 = vadd.f32 %v1382_v18, %v1171_v14  ;;  %v1426_v21 = vadd.f32 %v1425_v19, %v1179_v15  ;;  %v1384_v22 = vpop.f32.mrb[9].mxu0  ;;  %v1427_v23 = vpop.f32.mrb[5].mxu1 }
 0x390   :  { %v1385_v24 = vadd.f32 %v1384_v22, %v1175_v16  ;;  %v1428_v25 = vadd.f32 %v1427_v23, %v1183_v17  ;;  %v1386_v26 = vpop.f32.mrb[10].mxu0  ;;  %v1429_v27 = vpop.f32.mrb[6].mxu1 }
 0x391   :  { %v1387_v28 = vadd.f32 %v1386_v26, %v1171_v14  ;;  %v1430_v29 = vadd.f32 %v1429_v27, %v1179_v15  ;;  %v1388_v30 = vpop.f32.mrb[11].mxu0  ;;  %v1431_v31 = vpop.f32.mrb[7].mxu1  ;;  %v1434_v33 = vmax.f32 %v1383_v20, 0.0  ;;  %v1436_v34 = vmax.f32 %v1426_v21, 0.0  ;;  %v2583_v14 = vld [vmem:[#allocation11 + $0x1f0] ss:$8 sps:$4 sm:$0xff]  }
 0x392   :  { %v1389_v0 = vadd.f32 %v1388_v30, %v1175_v16  ;;  %v1432_v32 = vadd.f32 %v1431_v31, %v1183_v17  ;;  %v1435_v35 = vmax.f32 %v1385_v24, 0.0  ;;  %v1437_v36 = vmax.f32 %v1428_v25, 0.0 }
 0x393   :  { %v1438_v40 = vmax.f32 %v1387_v28, 0.0  ;;  %v1440_v1 = vmax.f32 %v1430_v29, 0.0 }
 0x394   :  { %v1439_v37 = vmax.f32 %v1389_v0, 0.0  ;;  %v1441_v38 = vmax.f32 %v1432_v32, 0.0 }
 0x395   :  { %v1442_v39 = vpack.c.bf16 %v1438_v40, %v1434_v33  ;;  %v3031_v42 = vpack.c.bf16 %v1440_v1, %v1436_v34 }
 0x396   :  { %v1443_v44 = vpack.c.bf16 %v1439_v37, %v1435_v35  ;;  %v1445_v45 = vpack.c.bf16 %v1441_v38, %v1437_v36 }
 0x398   :  { %1874 = vmatprep.mubr.bf16.mxu1 %v1443_v44 }
 0x399   :  { %1875 = vmatmul.mubr.bf16.vlgmr.msra.gmra.mrb[8].mxu1 %v1442_v39 }
 0x39a   :  { %1886 = vmatpush1.bf16.msra.mxu1 %v2538_v46  ;;  %1917 = vmatprep.mubr.bf16.mxu1 %v1445_v45 }
 0x39b   :  { %1887 = vmatprep.subr.bf16.mxu1 %v2543_v47 }
 0x39e   :  { %1888 = vmatpush1.bf16.msra.mxu1 %v2541_v48 }
 0x39f   :  { %1889 = vmatprep.subr.bf16.mxu1 %v2546_v49 }
 0x3a2   :  { %1890 = vmatpush1.bf16.msra.mxu1 %v2544_v50 }
 0x3a3   :  { %1891 = vmatprep.subr.bf16.mxu1 %v2549_v51 }
 0x3a6   :  { %1892 = vmatpush1.bf16.msra.mxu1 %v2547_v52 }
 0x3a7   :  { %1893 = vmatprep.subr.bf16.mxu1 %v2552_v53 }
 0x3aa   :  { %1894 = vmatpush1.bf16.msra.mxu1 %v2550_v54 }
 0x3ab   :  { %1895 = vmatprep.subr.bf16.mxu1 %v2555_v55 }
 0x3ae   :  { %1896 = vmatpush1.bf16.msra.mxu1 %v2553_v56 }
 0x3af   :  { %1897 = vmatprep.subr.bf16.mxu1 %v2558_v57 }
 0x3b2   :  { %1898 = vmatpush1.bf16.msra.mxu1 %v2556_v58 }
 0x3b3   :  { %1899 = vmatprep.subr.bf16.mxu1 %v2561_v59 }
 0x3b6   :  { %1900 = vmatpush1.bf16.msra.mxu1 %v2559_v60 }
 0x3b7   :  { %1901 = vmatprep.subr.bf16.mxu1 %v2564_v61 }
 0x3ba   :  { %1902 = vmatpush1.bf16.msra.mxu1 %v2562_v62 }
 0x3bb   :  { %1903 = vmatprep.subr.bf16.mxu1 %v2567_v63 }
 0x3be   :  { %1904 = vmatpush1.bf16.msra.mxu1 %v2565_v2 }
 0x3bf   :  { %1905 = vmatprep.subr.bf16.mxu1 %v2570_v3 }
 0x3c2   :  { %1906 = vmatpush1.bf16.msra.mxu1 %v2568_v4 }
 0x3c3   :  { %1907 = vmatprep.subr.bf16.mxu1 %v2573_v5 }
 0x3c6   :  { %1908 = vmatpush1.bf16.msra.mxu1 %v2571_v6 }
 0x3c7   :  { %1909 = vmatprep.subr.bf16.mxu1 %v2576_v7 }
 0x3ca   :  { %1910 = vmatpush1.bf16.msra.mxu1 %v2574_v8 }
 0x3cb   :  { %1911 = vmatprep.subr.bf16.mxu1 %v2579_v9 }
 0x3ce   :  { %1912 = vmatpush1.bf16.msra.mxu1 %v2577_v10 }
 0x3cf   :  { %1913 = vmatprep.subr.bf16.mxu1 %v2582_v11 }
 0x3d2   :  { %1914 = vmatpush1.bf16.msra.mxu1 %v2580_v12 }
 0x3d3   :  { %1915 = vmatprep.subr.bf16.mxu1 %v2585_v13 }
 0x3d6   :  { %1916 = vmatpush1.bf16.msra.mxu1 %v2583_v14 }
 0x3d9   :  { %1918 = vmatmul.mubr.bf16.vlgmr.msra.gmra.mrb[8].mxu1 %v3031_v42 }
 0x3da   :  { %2741 = shalt.err (!%p2738_p10)
}
 0x3db   :  { %s2742_s14 = scalar_lea.hbm %s3095_s11, 256 }
 0x3dc   :  { %p2743_p11 = scmp.ne.s32.totalorder %s3095_s11, %s2742_s14  ;;  %p2746_p12 = scmp.lt.u32.totalorder %s2742_s14, %s3095_s11 }
 0x3de   :  { %p2748_p13 = pnand %p2746_p12, %p2743_p11 }
 0x3e0   :  { %2751 = shalt.err (!%p2748_p13)
}
 0x3e1   :  { %1963 = dma.vmem_to_hbm [thread:$0]  %s1958_s1, 256, %s3095_s11, [#allocation15], %s2810_s15, %s2810_s15, %s2811_s16  }
 0x3e2   :  { %s2820_s25 = smov [#allocation16]  }
 0x3e3   :  { %s1969_s24 = sshll.u32 %s2820_s25, 4  ;;  %s1970_s24 = int_to_ptr.vmem [resolvable:$true] %s1969_s24 }
 0x3e4   :  { %s2752_s26 = scalar_lea.vmem %s1970_s24, 256  ;;  %p2757_p1 = scmp.lt.s32.totalorder %s1970_s24, %s1970_s24 }
 0x3e5   :  { %p2753_p0 = scmp.ne.s32.totalorder %s1970_s24, %s2752_s26  ;;  %p2758_p2 = scmp.lt.s32.totalorder %s2752_s26, %s2752_s26 }
 0x3e7   :  { %p2759_p3 = por %p2758_p2, %p2757_p1 }
 0x3e9   :  { %p2760_p4 = pnand %p2759_p3, %p2753_p0 }
 0x3eb   :  { %2763 = shalt.err (!%p2760_p4)
}
 0x3ec   :  { %s2764_s8 = scalar_lea.hbm %s3096_s12, 256 }
 0x3ed   :  { %p2765_p5 = scmp.ne.s32.totalorder %s3096_s12, %s2764_s8  ;;  %p2768_p6 = scmp.lt.u32.totalorder %s2764_s8, %s3096_s12 }
 0x3ef   :  { %p2770_p7 = pnand %p2768_p6, %p2765_p5 }
 0x3f1   :  { %2773 = shalt.err (!%p2770_p7)
}
 0x3f2   :  { %1975 = dma.vmem_to_hbm [thread:$0]  %s1970_s24, 256, %s3096_s12, [#allocation15], %s2810_s15, %s2810_s15, %s2811_s16  }
 0x3f3   :  { %v1510_v15 = vld [vmem:[%s3093_s9] sm:$0x3]  ;;  %s2821_s12 = smov [#allocation13]  }
 0x3f4   :  { %v1515_v16 = vrot.slane %v1510_v15, %v3001_v41  ;;  %v1519_v17 = vrot.slane %v1510_v15, %v3007_v43  ;;  %s1945_s15 = sshll.u32 %s2821_s12, 4  ;;  %s1946_s15 = int_to_ptr.vmem [resolvable:$true] %s1945_s15 }
 0x3f5   :  { %s2774_s9 = scalar_lea.vmem %s1946_s15, 512  ;;  %p2779_p9 = scmp.lt.s32.totalorder %s1946_s15, %s1946_s15 }
 0x3f6   :  { %p2775_p8 = scmp.ne.s32.totalorder %s1946_s15, %s2774_s9  ;;  %p2780_p10 = scmp.lt.s32.totalorder %s2774_s9, %s2774_s9 }
 0x3f8   :  { %p2781_p11 = por %p2780_p10, %p2779_p9 }
 0x3fa   :  { %p2782_p12 = pnand %p2781_p11, %p2775_p8 }
 0x4ac   :  { %v1919_v18 = vpop.f32.mrb[8].mxu1 }
 0x4ad   :  { %v2221_v19 = vadd.f32 %v1919_v18, %v1515_v16  ;;  %v1921_v20 = vpop.f32.mrb[9].mxu1 }
 0x4ae   :  { %v2222_v21 = vadd.f32 %v1921_v20, %v1519_v17  ;;  %v1923_v22 = vpop.f32.mrb[10].mxu1 }
 0x4af   :  { %2590 = vtanh.f32 %v2221_v19  ;;  %v2223_v23 = vadd.f32 %v1923_v22, %v1515_v16  ;;  %v1925_v24 = vpop.f32.mrb[11].mxu1 }
 0x4b0   :  { %2592 = vtanh.f32 %v2222_v21  ;;  %v2224_v25 = vadd.f32 %v1925_v24, %v1519_v17 }
 0x4b1   :  { %2594 = vtanh.f32 %v2223_v23 }
 0x4b2   :  { %2596 = vtanh.f32 %v2224_v25 }
 0x4b9   :  { %v2591_v26 = vpop.eup %2590 }
 0x4ba   :  { %v2593_v27 = vpop.eup %2592  ;;  %1932 = vst [vmem:[#allocation13] sm:$0xff] %v2591_v26 }
 0x4bb   :  { %v2595_v41 = vpop.eup %2594  ;;  %1933 = vst [vmem:[#allocation13 + $0x8] sm:$0xff] %v2593_v27 }
 0x4bc   :  { %v2597_v43 = vpop.eup %2596  ;;  %1934 = vst [vmem:[#allocation13 + $0x10] sm:$0xff] %v2595_v41 }
 0x4bd   :  { %1935 = vst [vmem:[#allocation13 + $0x18] sm:$0xff] %v2597_v43 }
 0x4be   :  { %2785 = shalt.err (!%p2782_p12)
}
 0x4bf   :  { %s2786_s29 = scalar_lea.hbm %s3094_s10, 512 }
 0x4c0   :  { %p2787_p13 = scmp.ne.s32.totalorder %s3094_s10, %s2786_s29  ;;  %p2790_p0 = scmp.lt.u32.totalorder %s2786_s29, %s3094_s10 }
 0x4c2   :  { %p2792_p1 = pnand %p2790_p0, %p2787_p13 }
 0x4c4   :  { %2795 = shalt.err (!%p2792_p1)
}
 0x4c5   :  { %1951 = dma.vmem_to_hbm [thread:$0]  %s1946_s15, 512, %s3094_s10, [#allocation4], %s2814_s0, %s2814_s0, %s2815_s30  }
 0x4c6   :  { %2804 = dma.done.wait [#allocation4], 512  }
 0x4c7   :  { %2805 = vsyncadd [#allocation4], 4294966784 }
 0x4c8   :  { %2806 = dma.done.wait [#allocation15], 512  }
 0x4c9   :  { %2807 = vsyncadd [#allocation15], 4294966784 }
 0x4ca   :  { %1985 = vsyncpa [#allocation3], 1 }
 0x4cb   :  { %1986 = vsyncpa [#allocation6], 1 }
 0x4cc   :  { %1987 = vsyncpa [#allocation9], 1 }
 0x4cd   :  { %1988 = vsyncpa [#allocation12], 1 }
 0x4ce   :  { %1989 = vsyncpa [#allocation4], 1 }
 0x4cf   :  { %1990 = vsyncpa [#allocation15], 1 }

// kernel: tpu_custom_call.1
= control target key start
LH: loop header
LB: loop body
LE: loop exit
PB: predicated region body
PF: predicated region fallthrough
CT: control target
= control target key end

     0   :  { %18 = vsyncpa [#allocation3], 0  ;;  %s3084_s0 = inlined_call_operand.hbm [shape: bf16[16,256], index: 0, kind: input, shape index: {}]   ;;  %s3085_s1 = inlined_call_operand.hbm [shape: f32[16,128], index: 1, kind: input, shape index: {}]   ;;  %s3086_s2 = inlined_call_operand.hbm [shape: bf16[256,512], index: 2, kind: input, shape index: {}]   ;;  %s3087_s3 = inlined_call_operand.vmem [shape: f32[1,512], index: 3, kind: input, shape index: {}]   ;;  %s3088_s4 = inlined_call_operand.hbm [shape: bf16[512,256], index: 4, kind: input, shape index: {}]   ;;  %s3089_s5 = inlined_call_operand.vmem [shape: f32[1,256], index: 5, kind: input, shape index: {}]   ;;  %s3090_s6 = inlined_call_operand.hbm [shape: bf16[128,512], index: 6, kind: input, shape index: {}]   ;;  %s3091_s7 = inlined_call_operand.vmem [shape: f32[1,512], index: 7, kind: input, shape index: {}]   ;;  %s3092_s8 = inlined_call_operand.hbm [shape: bf16[512,256], index: 8, kind: input, shape index: {}]   ;;  %s3093_s9 = inlined_call_operand.vmem [shape: f32[1,256], index: 9, kind: input, shape index: {}]   ;;  %s3094_s10 = inlined_call_operand.hbm [shape: f32[16,256], index: 10, kind: output, shape index: {0}]   ;;  %s3095_s11 = inlined_call_operand.hbm [shape: f32[16,128], index: 11, kind: output, shape index: {1}]   ;;  %s3096_s12 = inlined_call_operand.hbm [shape: f32[16,128], index: 12, kind: output, shape index: {2}]  }
   0x1   :  { %19 = vsyncpa [#allocation6], 0 }
   0x2   :  { %20 = vsyncpa [#allocation9], 0 }
   0x3   :  { %21 = vsyncpa [#allocation12], 0 }
   0x4   :  { %22 = vsyncpa [#allocation4], 0 }
   0x5   :  { %23 = vsyncpa [#allocation15], 0  ;;  %s2808_s21 = smov [#allocation5]   ;;  %s2809_s23 = smov [#allocation8]  }
   0x6   :  { %s41_s22 = sshll.u32 %s2808_s21, 4  ;;  %s67_s24 = sshll.u32 %s2809_s23, 4  ;;  %s42_s22 = int_to_ptr.vmem [resolvable:$true] %s41_s22  ;;  %s2887_s24 = int_to_ptr.vmem [resolvable:$true] %s67_s24 }
   0x7   :  { %s2598_s27 = scalar_lea.hbm %s3085_s1, 256 }
   0x8   :  { %p2599_p0 = scmp.ne.s32.totalorder %s3085_s1, %s2598_s27  ;;  %p2602_p1 = scmp.lt.u32.totalorder %s2598_s27, %s3085_s1 }
   0xa   :  { %p2604_p2 = pnand %p2602_p1, %p2599_p0 }
   0xc   :  { %2607 = shalt.err (!%p2604_p2)
}
   0xd   :  { %s2608_s14 = scalar_lea.vmem %s42_s22, 256  ;;  %p2613_p4 = scmp.lt.s32.totalorder %s42_s22, %s42_s22 }
   0xe   :  { %p2609_p3 = scmp.ne.s32.totalorder %s42_s22, %s2608_s14  ;;  %p2614_p5 = scmp.lt.s32.totalorder %s2608_s14, %s2608_s14 }
  0x10   :  { %p2615_p6 = por %p2614_p5, %p2613_p4 }
  0x12   :  { %p2616_p7 = pnand %p2615_p6, %p2609_p3 }
  0x14   :  { %2619 = shalt.err (!%p2616_p7)
}
  0x15   :  { %s2810_s15 = smov 128   ;;  %s2811_s16 = smov 8  }
  0x16   :  { %47 = dma.hbm_to_vmem [thread:$0]  %s3085_s1, 256, %s42_s22, [#allocation6], %s2810_s15, %s2810_s15, %s2811_s16  }
  0x17   :  { %s2620_s21 = scalar_lea.hbm %s3088_s4, 8192 }
  0x18   :  { %p2621_p8 = scmp.ne.s32.totalorder %s3088_s4, %s2620_s21  ;;  %p2624_p9 = scmp.lt.u32.totalorder %s2620_s21, %s3088_s4 }
  0x1a   :  { %p2626_p10 = pnand %p2624_p9, %p2621_p8 }
  0x1c   :  { %2629 = shalt.err (!%p2626_p10)
}
  0x1d   :  { %s2630_s28 = scalar_lea.vmem %s2887_s24, 8192  ;;  %p2635_p12 = scmp.lt.s32.totalorder %s2887_s24, %s2887_s24 }
  0x1e   :  { %p2631_p11 = scmp.ne.s32.totalorder %s2887_s24, %s2630_s28  ;;  %p2636_p13 = scmp.lt.s32.totalorder %s2630_s28, %s2630_s28 }
  0x20   :  { %p2637_p0 = por %p2636_p13, %p2635_p12 }
  0x22   :  { %p2638_p1 = pnand %p2637_p0, %p2631_p11 }
  0x24   :  { %2641 = shalt.err (!%p2638_p1)
}
  0x25   :  { %73 = dma.hbm_to_vmem [thread:$0]  %s3088_s4, 8192, %s2887_s24, [#allocation9], %s2810_s15, %s2810_s15, %s2811_s16  }
  0x26   :  { %s2812_s29 = smov [#allocation2]   ;;  %s2813_s13 = smov [#allocation7]  }
  0x27   :  { %s29_s30 = sshll.u32 %s2812_s29, 4  ;;  %s53_s14 = sshll.u32 %s2813_s13, 4  ;;  %s30_s30 = int_to_ptr.vmem [resolvable:$true] %s29_s30  ;;  %s2924_s14 = int_to_ptr.vmem [resolvable:$true] %s53_s14 }
  0x28   :  { %s2642_s19 = scalar_lea.hbm %s3084_s0, 256 }
  0x29   :  { %p2643_p2 = scmp.ne.s32.totalorder %s3084_s0, %s2642_s19  ;;  %p2646_p3 = scmp.lt.u32.totalorder %s2642_s19, %s3084_s0 }
  0x2b   :  { %p2648_p4 = pnand %p2646_p3, %p2643_p2 }
  0x2d   :  { %2651 = shalt.err (!%p2648_p4)
}
  0x2e   :  { %s2652_s4 = scalar_lea.vmem %s30_s30, 256  ;;  %p2657_p6 = scmp.lt.s32.totalorder %s30_s30, %s30_s30 }
  0x2f   :  { %p2653_p5 = scmp.ne.s32.totalorder %s30_s30, %s2652_s4  ;;  %p2658_p7 = scmp.lt.s32.totalorder %s2652_s4, %s2652_s4 }
  0x31   :  { %p2659_p8 = por %p2658_p7, %p2657_p6 }
  0x33   :  { %p2660_p9 = pnand %p2659_p8, %p2653_p5 }
  0x35   :  { %2663 = shalt.err (!%p2660_p9)
}
  0x36   :  { %35 = dma.hbm_to_vmem [thread:$0]  %s3084_s0, 256, %s30_s30, [#allocation3], %s2810_s15, %s2810_s15, %s2811_s16  }
  0x37   :  { %s2664_s1 = scalar_lea.hbm %s3086_s2, 8192 }
  0x38   :  { %p2665_p10 = scmp.ne.s32.totalorder %s3086_s2, %s2664_s1  ;;  %p2668_p11 = scmp.lt.u32.totalorder %s2664_s1, %s3086_s2 }
  0x3a   :  { %p2670_p12 = pnand %p2668_p11, %p2665_p10 }
  0x3c   :  { %2673 = shalt.err (!%p2670_p12)
}
  0x3d   :  { %s2674_s18 = scalar_lea.vmem %s2924_s14, 8192  ;;  %p2679_p0 = scmp.lt.s32.totalorder %s2924_s14, %s2924_s14 }
  0x3e   :  { %p2675_p13 = scmp.ne.s32.totalorder %s2924_s14, %s2674_s18  ;;  %p2680_p1 = scmp.lt.s32.totalorder %s2674_s18, %s2674_s18 }
  0x40   :  { %p2681_p2 = por %p2680_p1, %p2679_p0 }
  0x42   :  { %p2682_p3 = pnand %p2681_p2, %p2675_p13 }
  0x44   :  { %2685 = shalt.err (!%p2682_p3)
}
  0x45   :  { %s2814_s0 = smov 256   ;;  %s2815_s30 = smov 16  }
  0x46   :  { %59 = dma.hbm_to_vmem [thread:$0]  %s3086_s2, 8192, %s2924_s14, [#allocation6], %s2814_s0, %s2814_s0, %s2815_s30  }
  0x47   :  { %s2816_s21 = smov [#allocation10]   ;;  %s2817_s25 = smov [#allocation11]  }
  0x48   :  { %s81_s23 = sshll.u32 %s2816_s21, 4  ;;  %s95_s4 = sshll.u32 %s2817_s25, 4  ;;  %s82_s23 = int_to_ptr.vmem [resolvable:$true] %s81_s23  ;;  %s2961_s4 = int_to_ptr.vmem [resolvable:$true] %s95_s4 }
  0x49   :  { %s2686_s27 = scalar_lea.hbm %s3090_s6, 4096 }
  0x4a   :  { %p2687_p4 = scmp.ne.s32.totalorder %s3090_s6, %s2686_s27  ;;  %p2690_p5 = scmp.lt.u32.totalorder %s2686_s27, %s3090_s6 }
  0x4c   :  { %p2692_p6 = pnand %p2690_p5, %p2687_p4 }
  0x4e   :  { %2695 = shalt.err (!%p2692_p6)
}
  0x4f   :  { %s2696_s2 = scalar_lea.vmem %s82_s23, 4096  ;;  %p2701_p8 = scmp.lt.s32.totalorder %s82_s23, %s82_s23 }
  0x50   :  { %p2697_p7 = scmp.ne.s32.totalorder %s82_s23, %s2696_s2  ;;  %p2702_p9 = scmp.lt.s32.totalorder %s2696_s2, %s2696_s2 }
  0x52   :  { %p2703_p10 = por %p2702_p9, %p2701_p8 }
  0x54   :  { %p2704_p11 = pnand %p2703_p10, %p2697_p7 }
  0x56   :  { %2707 = shalt.err (!%p2704_p11)
}
  0x57   :  { %87 = dma.hbm_to_vmem [thread:$0]  %s3090_s6, 4096, %s82_s23, [#allocation9], %s2814_s0, %s2814_s0, %s2815_s30  }
  0x58   :  { %s2708_s19 = scalar_lea.hbm %s3092_s8, 8192 }
  0x59   :  { %p2709_p12 = scmp.ne.s32.totalorder %s3092_s8, %s2708_s19  ;;  %p2712_p13 = scmp.lt.u32.totalorder %s2708_s19, %s3092_s8 }
  0x5b   :  { %p2714_p0 = pnand %p2712_p13, %p2709_p12 }
  0x5d   :  { %2717 = shalt.err (!%p2714_p0)
}
  0x5e   :  { %s2718_s26 = scalar_lea.vmem %s2961_s4, 8192  ;;  %p2723_p2 = scmp.lt.s32.totalorder %s2961_s4, %s2961_s4 }
  0x5f   :  { %p2719_p1 = scmp.ne.s32.totalorder %s2961_s4, %s2718_s26  ;;  %p2724_p3 = scmp.lt.s32.totalorder %s2718_s26, %s2718_s26 }
  0x61   :  { %p2725_p4 = por %p2724_p3, %p2723_p2 }
  0x63   :  { %p2726_p5 = pnand %p2725_p4, %p2719_p1 }
  0x65   :  { %2729 = shalt.err (!%p2726_p5)
}
  0x66   :  { %101 = dma.hbm_to_vmem [thread:$0]  %s3092_s8, 8192, %s2961_s4, [#allocation12], %s2810_s15, %s2810_s15, %s2811_s16  }
  0x67   :  { %2796 = dma.done.wait [#allocation3], 256  }
  0x68   :  { %2797 = vsyncadd [#allocation3], 4294967040 }
  0x69   :  { %2798 = dma.done.wait [#allocation6], 8448  }
  0x6a   :  { %2799 = vsyncadd [#allocation6], 4294958848 }
  0x6b   :  { %2800 = dma.done.wait [#allocation9], 12288  }
  0x6c   :  { %2801 = vsyncadd [#allocation9], 4294955008 }
  0x6d   :  { %2802 = dma.done.wait [#allocation12], 8192  }
  0x6e   :  { %2803 = vsyncadd [#allocation12], 4294959104  ;;  %v2247_v0 = vld [vmem:[#allocation7 + $0x4] ss:$16 sps:$4 sm:$0xff]   ;;  %v2249_v1 = vld [vmem:[#allocation7] ss:$16 sps:$4 sm:$0xff]  }
  0x6f   :  { %541 = vmatprep.subr.bf16.mxu0 %v2247_v0  ;;  %v2250_v2 = vld [vmem:[#allocation7 + $0x24] ss:$16 sps:$4 sm:$0xff]   ;;  %v2252_v3 = vld [vmem:[#allocation7 + $0x20] ss:$16 sps:$4 sm:$0xff]   ;;  %v2294_v13 = vld [vmem:[#allocation7 + $0xc] ss:$16 sps:$4 sm:$0xff]  }
  0x70   :  { %542 = vmatpush1.bf16.msra.mxu0 %v2249_v1  ;;  %v2253_v4 = vld [vmem:[#allocation7 + $0x44] ss:$16 sps:$4 sm:$0xff]   ;;  %v2255_v5 = vld [vmem:[#allocation7 + $0x40] ss:$16 sps:$4 sm:$0xff]   ;;  %v2297_v15 = vld [vmem:[#allocation7 + $0x8] ss:$16 sps:$4 sm:$0xff]   ;;  %584 = vmatprep.subr.bf16.mxu1 %v2294_v13 }
  0x71   :  { %543 = vmatprep.subr.bf16.mxu0 %v2250_v2  ;;  %v2256_v6 = vld [vmem:[#allocation7 + $0x64] ss:$16 sps:$4 sm:$0xff]   ;;  %v2258_v7 = vld [vmem:[#allocation7 + $0x60] ss:$16 sps:$4 sm:$0xff]   ;;  %585 = vmatpush1.bf16.msra.mxu1 %v2297_v15  ;;  %v2301_v18 = vld [vmem:[#allocation7 + $0x2c] ss:$16 sps:$4 sm:$0xff]  }
  0x72   :  { %v2259_v8 = vld [vmem:[#allocation7 + $0x84] ss:$16 sps:$4 sm:$0xff]   ;;  %v2261_v9 = vld [vmem:[#allocation7 + $0x80] ss:$16 sps:$4 sm:$0xff]   ;;  %v2303_v19 = vld [vmem:[#allocation7 + $0x28] ss:$16 sps:$4 sm:$0xff]   ;;  %586 = vmatprep.subr.bf16.mxu1 %v2301_v18 }
  0x73   :  { %v2262_v10 = vld [vmem:[#allocation7 + $0xa4] ss:$16 sps:$4 sm:$0xff]   ;;  %v2264_v11 = vld [vmem:[#allocation7 + $0xa0] ss:$16 sps:$4 sm:$0xff]   ;;  %v2304_v20 = vld [vmem:[#allocation7 + $0x4c] ss:$16 sps:$4 sm:$0xff]  }
  0x74   :  { %544 = vmatpush1.bf16.msra.mxu0 %v2252_v3  ;;  %v2265_v12 = vld [vmem:[#allocation7 + $0xc4] ss:$16 sps:$4 sm:$0xff]   ;;  %v2267_v14 = vld [vmem:[#allocation7 + $0xc0] ss:$16 sps:$4 sm:$0xff]   ;;  %v2306_v23 = vld [vmem:[#allocation7 + $0x48] ss:$16 sps:$4 sm:$0xff]  }
  0x75   :  { %545 = vmatprep.subr.bf16.mxu0 %v2253_v4  ;;  %v2268_v16 = vld [vmem:[#allocation7 + $0xe4] ss:$16 sps:$4 sm:$0xff]   ;;  %v2270_v21 = vld [vmem:[#allocation7 + $0xe0] ss:$16 sps:$4 sm:$0xff]   ;;  %587 = vmatpush1.bf16.msra.mxu1 %v2303_v19  ;;  %v2307_v24 = vld [vmem:[#allocation7 + $0x6c] ss:$16 sps:$4 sm:$0xff]  }
  0x76   :  { %v2300_v17 = vld [vmem:[#allocation2 + $0x4] ss:$8 sps:$4 sm:$0xff]   ;;  %588 = vmatprep.subr.bf16.mxu1 %v2304_v20  ;;  %v2273_v25 = vld [vmem:[#allocation7 + $0x100] ss:$16 sps:$4 sm:$0xff]   ;;  %v2309_v27 = vld [vmem:[#allocation7 + $0x68] ss:$16 sps:$4 sm:$0xff]  }
  0x77   :  { %573 = vmatprep.mubr.bf16.mxu0 %v2300_v17  ;;  %616 = vmatprep.mubr.bf16.mxu1 %v2300_v17  ;;  %v2271_v22 = vld [vmem:[#allocation7 + $0x104] ss:$16 sps:$4 sm:$0xff]   ;;  %v2310_v28 = vld [vmem:[#allocation7 + $0x8c] ss:$16 sps:$4 sm:$0xff]   ;;  %v2276_v29 = vld [vmem:[#allocation7 + $0x120] ss:$16 sps:$4 sm:$0xff]  }
  0x78   :  { %546 = vmatpush1.bf16.msra.mxu0 %v2255_v5  ;;  %v2274_v26 = vld [vmem:[#allocation7 + $0x124] ss:$16 sps:$4 sm:$0xff]   ;;  %v2312_v31 = vld [vmem:[#allocation7 + $0x88] ss:$16 sps:$4 sm:$0xff]   ;;  %v2313_v32 = vld [vmem:[#allocation7 + $0xac] ss:$16 sps:$4 sm:$0xff]  }
  0x79   :  { %547 = vmatprep.subr.bf16.mxu0 %v2256_v6  ;;  %589 = vmatpush1.bf16.msra.mxu1 %v2306_v23  ;;  %v2277_v30 = vld [vmem:[#allocation7 + $0x144] ss:$16 sps:$4 sm:$0xff]   ;;  %v2279_v33 = vld [vmem:[#allocation7 + $0x140] ss:$16 sps:$4 sm:$0xff]   ;;  %v2315_v35 = vld [vmem:[#allocation7 + $0xa8] ss:$16 sps:$4 sm:$0xff]  }
  0x7a   :  { %590 = vmatprep.subr.bf16.mxu1 %v2307_v24  ;;  %v2280_v34 = vld [vmem:[#allocation7 + $0x164] ss:$16 sps:$4 sm:$0xff]   ;;  %v2316_v36 = vld [vmem:[#allocation7 + $0xcc] ss:$16 sps:$4 sm:$0xff]   ;;  %v2282_v37 = vld [vmem:[#allocation7 + $0x160] ss:$16 sps:$4 sm:$0xff]  }
  0x7b   :  { %v2283_v38 = vld [vmem:[#allocation7 + $0x184] ss:$16 sps:$4 sm:$0xff]   ;;  %v2318_v39 = vld [vmem:[#allocation7 + $0xc8] ss:$16 sps:$4 sm:$0xff]   ;;  %v2319_v40 = vld [vmem:[#allocation7 + $0xec] ss:$16 sps:$4 sm:$0xff]  }
  0x7c   :  { %548 = vmatpush1.bf16.msra.mxu0 %v2258_v7  ;;  %v2285_v41 = vld [vmem:[#allocation7 + $0x180] ss:$16 sps:$4 sm:$0xff]   ;;  %v2286_v42 = vld [vmem:[#allocation7 + $0x1a4] ss:$16 sps:$4 sm:$0xff]   ;;  %v2321_v43 = vld [vmem:[#allocation7 + $0xe8] ss:$16 sps:$4 sm:$0xff]  }
  0x7d   :  { %549 = vmatprep.subr.bf16.mxu0 %v2259_v8  ;;  %591 = vmatpush1.bf16.msra.mxu1 %v2309_v27  ;;  %v2322_v44 = vld [vmem:[#allocation7 + $0x10c] ss:$16 sps:$4 sm:$0xff]   ;;  %v2288_v45 = vld [vmem:[#allocation7 + $0x1a0] ss:$16 sps:$4 sm:$0xff]   ;;  %v2289_v46 = vld [vmem:[#allocation7 + $0x1c4] ss:$16 sps:$4 sm:$0xff]  }
  0x7e   :  { %592 = vmatprep.subr.bf16.mxu1 %v2310_v28  ;;  %v2324_v47 = vld [vmem:[#allocation7 + $0x108] ss:$16 sps:$4 sm:$0xff]   ;;  %v2325_v48 = vld [vmem:[#allocation7 + $0x12c] ss:$16 sps:$4 sm:$0xff]   ;;  %v2291_v49 = vld [vmem:[#allocation7 + $0x1c0] ss:$16 sps:$4 sm:$0xff]  }
  0x7f   :  { %v2292_v50 = vld [vmem:[#allocation7 + $0x1e4] ss:$16 sps:$4 sm:$0xff]   ;;  %v2327_v51 = vld [vmem:[#allocation7 + $0x128] ss:$16 sps:$4 sm:$0xff]   ;;  %v2328_v52 = vld [vmem:[#allocation7 + $0x14c] ss:$16 sps:$4 sm:$0xff]  }
  0x80   :  { %550 = vmatpush1.bf16.msra.mxu0 %v2261_v9  ;;  %v2296_v53 = vld [vmem:[#allocation7 + $0x1e0] ss:$16 sps:$4 sm:$0xff]   ;;  %v2330_v54 = vld [vmem:[#allocation7 + $0x148] ss:$16 sps:$4 sm:$0xff]   ;;  %v2348_v56 = vld [vmem:[#allocation8 + $0x4] ss:$8 sps:$4 sm:$0xff]  }
  0x81   :  { %551 = vmatprep.subr.bf16.mxu0 %v2262_v10  ;;  %593 = vmatpush1.bf16.msra.mxu1 %v2312_v31  ;;  %v2298_v55 = vld [vmem:[#allocation2] ss:$8 sps:$4 sm:$0xff]   ;;  %v2331_v57 = vld [vmem:[#allocation7 + $0x16c] ss:$16 sps:$4 sm:$0xff]   ;;  %v2349_v62 = vld [vmem:[#allocation8 + $0x10] ss:$8 sps:$4 sm:$0xff]  }
  0x82   :  { %594 = vmatprep.subr.bf16.mxu1 %v2313_v32  ;;  %v2333_v58 = vld [vmem:[#allocation7 + $0x168] ss:$16 sps:$4 sm:$0xff]   ;;  %v2351_v60 = vld [vmem:[#allocation8 + $0x14] ss:$8 sps:$4 sm:$0xff]   ;;  %v2354_v0 = vld [vmem:[#allocation8 + $0x24] ss:$8 sps:$4 sm:$0xff]  }
  0x83   :  { %v2346_v59 = vld [vmem:[#allocation8] ss:$8 sps:$4 sm:$0xff]   ;;  %v2334_v61 = vld [vmem:[#allocation7 + $0x18c] ss:$16 sps:$4 sm:$0xff]   ;;  %v2355_v6 = vld [vmem:[#allocation8 + $0x30] ss:$8 sps:$4 sm:$0xff]  }
  0x84   :  { %552 = vmatpush1.bf16.msra.mxu0 %v2264_v11  ;;  %v2336_v63 = vld [vmem:[#allocation7 + $0x188] ss:$16 sps:$4 sm:$0xff]   ;;  %v2337_v1 = vld [vmem:[#allocation7 + $0x1ac] ss:$16 sps:$4 sm:$0xff]  }
  0x85   :  { %553 = vmatprep.subr.bf16.mxu0 %v2265_v12  ;;  %595 = vmatpush1.bf16.msra.mxu1 %v2315_v35  ;;  %v2352_v2 = vld [vmem:[#allocation8 + $0x20] ss:$8 sps:$4 sm:$0xff]   ;;  %v2357_v4 = vld [vmem:[#allocation8 + $0x34] ss:$8 sps:$4 sm:$0xff]   ;;  %v2360_v8 = vld [vmem:[#allocation8 + $0x44] ss:$8 sps:$4 sm:$0xff]  }
  0x86   :  { %596 = vmatprep.subr.bf16.mxu1 %v2316_v36  ;;  %v2339_v3 = vld [vmem:[#allocation7 + $0x1a8] ss:$16 sps:$4 sm:$0xff]   ;;  %v2340_v5 = vld [vmem:[#allocation7 + $0x1cc] ss:$16 sps:$4 sm:$0xff]  }
  0x87   :  { %v2342_v7 = vld [vmem:[#allocation7 + $0x1c8] ss:$16 sps:$4 sm:$0xff]   ;;  %v2343_v9 = vld [vmem:[#allocation7 + $0x1ec] ss:$16 sps:$4 sm:$0xff]  }
  0x88   :  { %554 = vmatpush1.bf16.msra.mxu0 %v2267_v14  ;;  %v2358_v10 = vld [vmem:[#allocation8 + $0x40] ss:$8 sps:$4 sm:$0xff]   ;;  %v2363_v12 = vld [vmem:[#allocation8 + $0x54] ss:$8 sps:$4 sm:$0xff]   ;;  %v2361_v13 = vld [vmem:[#allocation8 + $0x50] ss:$8 sps:$4 sm:$0xff]  }
  0x89   :  { %555 = vmatprep.subr.bf16.mxu0 %v2268_v16  ;;  %597 = vmatpush1.bf16.msra.mxu1 %v2318_v39  ;;  %v2345_v11 = vld [vmem:[#allocation7 + $0x1e8] ss:$16 sps:$4 sm:$0xff]   ;;  %v2366_v14 = vld [vmem:[#allocation8 + $0x64] ss:$8 sps:$4 sm:$0xff]   ;;  %v2369_v16 = vld [vmem:[#allocation8 + $0x74] ss:$8 sps:$4 sm:$0xff]   ;;  %v191_v39 = vlaneseq }
  0x8a   :  { %598 = vmatprep.subr.bf16.mxu1 %v2319_v40  ;;  %v2364_v15 = vld [vmem:[#allocation8 + $0x60] ss:$8 sps:$4 sm:$0xff]   ;;  %v2367_v17 = vld [vmem:[#allocation8 + $0x70] ss:$8 sps:$4 sm:$0xff]   ;;  %v2372_v18 = vld [vmem:[#allocation8 + $0x84] ss:$8 sps:$4 sm:$0xff]  }
  0x8b   :  { %v2370_v19 = vld [vmem:[#allocation8 + $0x80] ss:$8 sps:$4 sm:$0xff]   ;;  %v2375_v20 = vld [vmem:[#allocation8 + $0x94] ss:$8 sps:$4 sm:$0xff]   ;;  %v2998_v40 = vshrl.u32 %v191_v39, 7 }
  0x8c   :  { %556 = vmatpush1.bf16.msra.mxu0 %v2270_v21  ;;  %v2373_v21 = vld [vmem:[#allocation8 + $0x90] ss:$8 sps:$4 sm:$0xff]   ;;  %v2376_v23 = vld [vmem:[#allocation8 + $0xa0] ss:$8 sps:$4 sm:$0xff]   ;;  %v2381_v24 = vld [vmem:[#allocation8 + $0xb4] ss:$8 sps:$4 sm:$0xff]  }
  0x8d   :  { %557 = vmatprep.subr.bf16.mxu0 %v2271_v22  ;;  %599 = vmatpush1.bf16.msra.mxu1 %v2321_v43  ;;  %v2378_v22 = vld [vmem:[#allocation8 + $0xa4] ss:$8 sps:$4 sm:$0xff]   ;;  %v2382_v27 = vld [vmem:[#allocation8 + $0xc0] ss:$8 sps:$4 sm:$0xff]   ;;  %v2387_v28 = vld [vmem:[#allocation8 + $0xd4] ss:$8 sps:$4 sm:$0xff]  }
  0x8e   :  { %600 = vmatprep.subr.bf16.mxu1 %v2322_v44  ;;  %v2388_v31 = vld [vmem:[#allocation8 + $0xe0] ss:$8 sps:$4 sm:$0xff]   ;;  %v2393_v32 = vld [vmem:[#allocation8 + $0xf4] ss:$8 sps:$4 sm:$0xff]   ;;  %v3007_v43 = vsub.s32 1, %v2998_v40 }
  0x8f   :  { %v2445_v35 = vld [vmem:[#allocation10 + $0x8] ss:$16 sps:$4 sm:$0xff]   ;;  %v2447_v36 = vld [vmem:[#allocation10 + $0xc] ss:$16 sps:$4 sm:$0xff]  }
  0x90   :  { %558 = vmatpush1.bf16.msra.mxu0 %v2273_v25  ;;  %v2379_v25 = vld [vmem:[#allocation8 + $0xb0] ss:$8 sps:$4 sm:$0xff]   ;;  %v2435_v39 = vld [vmem:[#allocation8 + $0x1d4] ss:$8 sps:$4 sm:$0xff]  }
  0x91   :  { %559 = vmatprep.subr.bf16.mxu0 %v2274_v26  ;;  %601 = vmatpush1.bf16.msra.mxu1 %v2324_v47  ;;  %v2384_v26 = vld [vmem:[#allocation8 + $0xc4] ss:$8 sps:$4 sm:$0xff]  }
  0x92   :  { %602 = vmatprep.subr.bf16.mxu1 %v2325_v48 }
  0x94   :  { %560 = vmatpush1.bf16.msra.mxu0 %v2276_v29  ;;  %v2385_v29 = vld [vmem:[#allocation8 + $0xd0] ss:$8 sps:$4 sm:$0xff]  }
  0x95   :  { %561 = vmatprep.subr.bf16.mxu0 %v2277_v30  ;;  %603 = vmatpush1.bf16.msra.mxu1 %v2327_v51  ;;  %v2390_v30 = vld [vmem:[#allocation8 + $0xe4] ss:$8 sps:$4 sm:$0xff]  }
  0x96   :  { %604 = vmatprep.subr.bf16.mxu1 %v2328_v52 }
  0x98   :  { %562 = vmatpush1.bf16.msra.mxu0 %v2279_v33  ;;  %v2391_v33 = vld [vmem:[#allocation8 + $0xf0] ss:$8 sps:$4 sm:$0xff]  }
  0x99   :  { %563 = vmatprep.subr.bf16.mxu0 %v2280_v34  ;;  %605 = vmatpush1.bf16.msra.mxu1 %v2330_v54  ;;  %v2396_v34 = vld [vmem:[#allocation8 + $0x104] ss:$8 sps:$4 sm:$0xff]  }
  0x9a   :  { %606 = vmatprep.subr.bf16.mxu1 %v2331_v57 }
  0x9c   :  { %564 = vmatpush1.bf16.msra.mxu0 %v2282_v37  ;;  %v2453_v37 = vld [vmem:[#allocation10 + $0x2c] ss:$16 sps:$4 sm:$0xff]  }
  0x9d   :  { %565 = vmatprep.subr.bf16.mxu0 %v2283_v38  ;;  %607 = vmatpush1.bf16.msra.mxu1 %v2333_v58  ;;  %v2451_v38 = vld [vmem:[#allocation10 + $0x28] ss:$16 sps:$4 sm:$0xff]  }
  0x9e   :  { %608 = vmatprep.subr.bf16.mxu1 %v2334_v61  ;;  %v2399_v61 = vld [vmem:[#allocation8 + $0x114] ss:$8 sps:$4 sm:$0xff]  }
  0xa0   :  { %566 = vmatpush1.bf16.msra.mxu0 %v2285_v41  ;;  %v3001_v41 = vsub.s32 0, %v2998_v40 }
  0xa1   :  { %567 = vmatprep.subr.bf16.mxu0 %v2286_v42  ;;  %609 = vmatpush1.bf16.msra.mxu1 %v2336_v63  ;;  %v189_v42 = vld [vmem:[%s3087_s3] sm:$0xf]  ;;  %v2402_v63 = vld [vmem:[#allocation8 + $0x124] ss:$8 sps:$4 sm:$0xff]  }
  0xa2   :  { %610 = vmatprep.subr.bf16.mxu1 %v2337_v1  ;;  %v194_v44 = vrot.slane %v189_v42, %v3001_v41  ;;  %v205_v1 = vsub.s32 3, %v2998_v40 }
  0xa4   :  { %568 = vmatpush1.bf16.msra.mxu0 %v2288_v45  ;;  %v198_v45 = vrot.slane %v189_v42, %v3007_v43 }
  0xa5   :  { %569 = vmatprep.subr.bf16.mxu0 %v2289_v46  ;;  %611 = vmatpush1.bf16.msra.mxu1 %v2339_v3  ;;  %v2405_v3 = vld [vmem:[#allocation8 + $0x134] ss:$8 sps:$4 sm:$0xff]  }
  0xa6   :  { %612 = vmatprep.subr.bf16.mxu1 %v2340_v5  ;;  %v206_v5 = vrot.slane %v189_v42, %v205_v1 }
  0xa8   :  { %570 = vmatpush1.bf16.msra.mxu0 %v2291_v49 }
  0xa9   :  { %571 = vmatprep.subr.bf16.mxu0 %v2292_v50  ;;  %613 = vmatpush1.bf16.msra.mxu1 %v2342_v7  ;;  %v2408_v7 = vld [vmem:[#allocation8 + $0x144] ss:$8 sps:$4 sm:$0xff]  }
  0xaa   :  { %614 = vmatprep.subr.bf16.mxu1 %v2343_v9 }
  0xac   :  { %572 = vmatpush1.bf16.msra.mxu0 %v2296_v53 }
  0xad   :  { %1035 = vmatprep.subr.bf16.mxu0 %v2348_v56  ;;  %615 = vmatpush1.bf16.msra.mxu1 %v2345_v11 }
  0xae   :  { %1391 = vmatprep.subr.bf16.mxu1 %v2447_v36  ;;  %v2427_v36 = vld [vmem:[#allocation8 + $0x1b0] ss:$8 sps:$4 sm:$0xff]  }
  0xaf   :  { %574 = vmatmul.mubr.bf16.vlgmr.msra.gmra.mrb[0].mxu0 %v2298_v55 }
  0xb0   :  { %1036 = vmatpush1.bf16.msra.mxu0 %v2346_v59  ;;  %617 = vmatmul.mubr.bf16.vlgmr.msra.gmra.mrb[0].mxu1 %v2298_v55 }
  0xb1   :  { %1037 = vmatprep.subr.bf16.mxu0 %v2351_v60  ;;  %1392 = vmatpush1.bf16.msra.mxu1 %v2445_v35  ;;  %v2394_v60 = vld [vmem:[#allocation8 + $0x100] ss:$8 sps:$4 sm:$0xff]   ;;  %v2429_v35 = vld [vmem:[#allocation8 + $0x1b4] ss:$8 sps:$4 sm:$0xff]  }
  0xb2   :  { %1393 = vmatprep.subr.bf16.mxu1 %v2453_v37  ;;  %v2432_v37 = vld [vmem:[#allocation8 + $0x1c4] ss:$8 sps:$4 sm:$0xff]  }
  0xb4   :  { %1038 = vmatpush1.bf16.msra.mxu0 %v2349_v62  ;;  %v2397_v62 = vld [vmem:[#allocation8 + $0x110] ss:$8 sps:$4 sm:$0xff]  }
  0xb5   :  { %1039 = vmatprep.subr.bf16.mxu0 %v2354_v0  ;;  %1394 = vmatpush1.bf16.msra.mxu1 %v2451_v38  ;;  %v201_v0 = vsub.s32 2, %v2998_v40  ;;  %v2430_v38 = vld [vmem:[#allocation8 + $0x1c0] ss:$8 sps:$4 sm:$0xff]  }
  0xb8   :  { %1040 = vmatpush1.bf16.msra.mxu0 %v2352_v2  ;;  %v2400_v2 = vld [vmem:[#allocation8 + $0x120] ss:$8 sps:$4 sm:$0xff]  }
  0xb9   :  { %1041 = vmatprep.subr.bf16.mxu0 %v2357_v4  ;;  %v202_v4 = vrot.slane %v189_v42, %v201_v0  ;;  %v2433_v42 = vld [vmem:[#allocation8 + $0x1d0] ss:$8 sps:$4 sm:$0xff]  }
  0xbc   :  { %1042 = vmatpush1.bf16.msra.mxu0 %v2355_v6  ;;  %v2403_v6 = vld [vmem:[#allocation8 + $0x130] ss:$8 sps:$4 sm:$0xff]  }
  0xbd   :  { %1043 = vmatprep.subr.bf16.mxu0 %v2360_v8 }
  0xc0   :  { %1044 = vmatpush1.bf16.msra.mxu0 %v2358_v10 }
  0xc1   :  { %1045 = vmatprep.subr.bf16.mxu0 %v2363_v12 }
  0xc4   :  { %1046 = vmatpush1.bf16.msra.mxu0 %v2361_v13  ;;  %v2406_v13 = vld [vmem:[#allocation8 + $0x140] ss:$8 sps:$4 sm:$0xff]  }
  0xc5   :  { %1047 = vmatprep.subr.bf16.mxu0 %v2366_v14 }
  0xc8   :  { %1048 = vmatpush1.bf16.msra.mxu0 %v2364_v15 }
  0xc9   :  { %1049 = vmatprep.subr.bf16.mxu0 %v2369_v16 }
  0xcc   :  { %1050 = vmatpush1.bf16.msra.mxu0 %v2367_v17  ;;  %v2411_v17 = vld [vmem:[#allocation8 + $0x154] ss:$8 sps:$4 sm:$0xff]  }
  0xcd   :  { %1051 = vmatprep.subr.bf16.mxu0 %v2372_v18 }
  0xd0   :  { %1052 = vmatpush1.bf16.msra.mxu0 %v2370_v19 }
  0xd1   :  { %1053 = vmatprep.subr.bf16.mxu0 %v2375_v20 }
  0xd4   :  { %1054 = vmatpush1.bf16.msra.mxu0 %v2373_v21 }
  0xd5   :  { %1055 = vmatprep.subr.bf16.mxu0 %v2378_v22  ;;  %v2409_v22 = vld [vmem:[#allocation8 + $0x150] ss:$8 sps:$4 sm:$0xff]  }
  0xd8   :  { %1056 = vmatpush1.bf16.msra.mxu0 %v2376_v23 }
  0xd9   :  { %1057 = vmatprep.subr.bf16.mxu0 %v2381_v24  ;;  %v2414_v24 = vld [vmem:[#allocation8 + $0x164] ss:$8 sps:$4 sm:$0xff]  }
  0xdc   :  { %1058 = vmatpush1.bf16.msra.mxu0 %v2379_v25 }
  0xdd   :  { %1059 = vmatprep.subr.bf16.mxu0 %v2384_v26  ;;  %v2412_v26 = vld [vmem:[#allocation8 + $0x160] ss:$8 sps:$4 sm:$0xff]  }
  0xe0   :  { %1060 = vmatpush1.bf16.msra.mxu0 %v2382_v27  ;;  %v2417_v27 = vld [vmem:[#allocation8 + $0x174] ss:$8 sps:$4 sm:$0xff]  }
  0xe1   :  { %1061 = vmatprep.subr.bf16.mxu0 %v2387_v28  ;;  %v2415_v28 = vld [vmem:[#allocation8 + $0x170] ss:$8 sps:$4 sm:$0xff]  }
  0xe4   :  { %1062 = vmatpush1.bf16.msra.mxu0 %v2385_v29  ;;  %v2420_v29 = vld [vmem:[#allocation8 + $0x184] ss:$8 sps:$4 sm:$0xff]  }
  0xe5   :  { %1063 = vmatprep.subr.bf16.mxu0 %v2390_v30  ;;  %v2418_v30 = vld [vmem:[#allocation8 + $0x180] ss:$8 sps:$4 sm:$0xff]  }
  0xe8   :  { %1064 = vmatpush1.bf16.msra.mxu0 %v2388_v31  ;;  %v2423_v31 = vld [vmem:[#allocation8 + $0x194] ss:$8 sps:$4 sm:$0xff]  }
  0xe9   :  { %1065 = vmatprep.subr.bf16.mxu0 %v2393_v32  ;;  %v2421_v32 = vld [vmem:[#allocation8 + $0x190] ss:$8 sps:$4 sm:$0xff]  }
  0xec   :  { %1066 = vmatpush1.bf16.msra.mxu0 %v2391_v33  ;;  %v2426_v33 = vld [vmem:[#allocation8 + $0x1a4] ss:$8 sps:$4 sm:$0xff]  }
  0xed   :  { %1078 = vmatprep.subr.bf16.mxu0 %v2396_v34  ;;  %v2424_v34 = vld [vmem:[#allocation8 + $0x1a0] ss:$8 sps:$4 sm:$0xff]  }
 0x182   :  { %v575_v46 = vpop.f32.mrb[0].mxu0 }
 0x183   :  { %v576_v47 = vadd.f32 %v575_v46, %v194_v44  ;;  %v577_v48 = vpop.f32.mrb[1].mxu0  ;;  %v618_v8 = vpop.f32.mrb[0].mxu1  ;;  %v2441_v46 = vld [vmem:[#allocation8 + $0x1f4] ss:$8 sps:$4 sm:$0xff]  }
 0x184   :  { %v578_v49 = vadd.f32 %v577_v48, %v198_v45  ;;  %v579_v50 = vpop.f32.mrb[2].mxu0  ;;  %v619_v9 = vadd.f32 %v618_v8, %v202_v4  ;;  %v620_v10 = vpop.f32.mrb[1].mxu1  ;;  %v2444_v48 = vld [vmem:[#allocation10 + $0x4] ss:$16 sps:$4 sm:$0xff]   ;;  %v2818_v8 = vmov 0  }
 0x185   :  { %v580_v51 = vadd.f32 %v579_v50, %v194_v44  ;;  %v581_v52 = vpop.f32.mrb[3].mxu0  ;;  %v627_v54 = vmax.f32 %v576_v47, 0.0  ;;  %v621_v11 = vadd.f32 %v620_v10, %v206_v5  ;;  %v622_v12 = vpop.f32.mrb[2].mxu1  ;;  %v2438_v44 = vld [vmem:[#allocation8 + $0x1e4] ss:$8 sps:$4 sm:$0xff]   ;;  %1423 = vmatprep.mubr.bf16.mxu1 %v2818_v8 }
 0x186   :  { %v582_v53 = vadd.f32 %v581_v52, %v198_v45  ;;  %v628_v56 = vmax.f32 %v578_v49, 0.0  ;;  %v629_v14 = vmax.f32 %v619_v9, 0.0  ;;  %v623_v15 = vadd.f32 %v622_v12, %v202_v4  ;;  %v624_v16 = vpop.f32.mrb[3].mxu1  ;;  %v2436_v45 = vld [vmem:[#allocation8 + $0x1e0] ss:$8 sps:$4 sm:$0xff]  }
 0x187   :  { %v631_v55 = vmax.f32 %v580_v51, 0.0  ;;  %v630_v18 = vmax.f32 %v621_v11, 0.0  ;;  %v625_v19 = vadd.f32 %v624_v16, %v206_v5  ;;  %v2439_v47 = vld [vmem:[#allocation8 + $0x1f0] ss:$8 sps:$4 sm:$0xff]   ;;  %v2450_v50 = vld [vmem:[#allocation10 + $0x24] ss:$16 sps:$4 sm:$0xff]  }
 0x188   :  { %v632_v57 = vmax.f32 %v582_v53, 0.0  ;;  %v633_v20 = vmax.f32 %v623_v15, 0.0  ;;  %v2442_v49 = vld [vmem:[#allocation10] ss:$16 sps:$4 sm:$0xff]   ;;  %v2456_v52 = vld [vmem:[#allocation10 + $0x44] ss:$16 sps:$4 sm:$0xff]  }
 0x189   :  { %v635_v58 = vpack.c.bf16 %v631_v55, %v627_v54  ;;  %v634_v21 = vmax.f32 %v625_v19, 0.0  ;;  %v2448_v51 = vld [vmem:[#allocation10 + $0x20] ss:$16 sps:$4 sm:$0xff]   ;;  %v2459_v53 = vld [vmem:[#allocation10 + $0x4c] ss:$16 sps:$4 sm:$0xff]  }
 0x18a   :  { %v636_v59 = vpack.c.bf16 %v632_v57, %v628_v56  ;;  %v637_v23 = vpack.c.bf16 %v633_v20, %v629_v14  ;;  %v2454_v54 = vld [vmem:[#allocation10 + $0x40] ss:$16 sps:$4 sm:$0xff]   ;;  %v2457_v55 = vld [vmem:[#allocation10 + $0x48] ss:$16 sps:$4 sm:$0xff]   ;;  %1395 = vmatprep.subr.bf16.mxu1 %v2459_v53  ;;  %v2462_v56 = vld [vmem:[#allocation10 + $0x64] ss:$16 sps:$4 sm:$0xff]  }
 0x18b   :  { %v638_v25 = vpack.c.bf16 %v634_v21, %v630_v18  ;;  %1396 = vmatpush1.bf16.msra.mxu1 %v2457_v55  ;;  %v2465_v57 = vld [vmem:[#allocation10 + $0x6c] ss:$16 sps:$4 sm:$0xff]   ;;  %v2472_v4 = vld [vmem:[#allocation10 + $0xa0] ss:$16 sps:$4 sm:$0xff]   ;;  %v2475_v5 = vld [vmem:[#allocation10 + $0xa8] ss:$16 sps:$4 sm:$0xff]  }
 0x18c   :  { %1067 = vmatprep.mubr.bf16.mxu0 %v636_v59  ;;  %v2463_v59 = vld [vmem:[#allocation10 + $0x68] ss:$16 sps:$4 sm:$0xff]   ;;  %1397 = vmatprep.subr.bf16.mxu1 %v2465_v57  ;;  %v2478_v9 = vld [vmem:[#allocation10 + $0xc0] ss:$16 sps:$4 sm:$0xff]   ;;  %v2486_v11 = vld [vmem:[#allocation10 + $0xe4] ss:$16 sps:$4 sm:$0xff]  }
 0x18d   :  { %1068 = vmatmul.mubr.bf16.vlgmr.msra.gmra.mrb[4].mxu0 %v635_v58  ;;  %v2460_v58 = vld [vmem:[#allocation10 + $0x60] ss:$16 sps:$4 sm:$0xff]   ;;  %v2481_v10 = vld [vmem:[#allocation10 + $0xc8] ss:$16 sps:$4 sm:$0xff]   ;;  %v2489_v12 = vld [vmem:[#allocation10 + $0xec] ss:$16 sps:$4 sm:$0xff]  }
 0x18e   :  { %1079 = vmatpush1.bf16.msra.mxu0 %v2394_v60  ;;  %1110 = vmatprep.mubr.bf16.mxu0 %v638_v25  ;;  %v2468_v60 = vld [vmem:[#allocation10 + $0x84] ss:$16 sps:$4 sm:$0xff]   ;;  %v2487_v14 = vld [vmem:[#allocation10 + $0xe8] ss:$16 sps:$4 sm:$0xff]   ;;  %v703_v16 = vld [vmem:[%s3089_s5] sm:$0x3] }
 0x18f   :  { %1080 = vmatprep.subr.bf16.mxu0 %v2399_v61  ;;  %1398 = vmatpush1.bf16.msra.mxu1 %v2463_v59  ;;  %v2471_v61 = vld [vmem:[#allocation10 + $0x8c] ss:$16 sps:$4 sm:$0xff]   ;;  %v712_v18 = vrot.slane %v703_v16, %v3007_v43  ;;  %v2505_v53 = vld [vmem:[#allocation11 + $0x50] ss:$8 sps:$4 sm:$0xff]   ;;  %v2508_v55 = vld [vmem:[#allocation11 + $0x60] ss:$8 sps:$4 sm:$0xff]  }
 0x190   :  { %1399 = vmatprep.subr.bf16.mxu1 %v2471_v61  ;;  %v2492_v15 = vld [vmem:[#allocation11 + $0x4] ss:$8 sps:$4 sm:$0xff]   ;;  %v2511_v57 = vld [vmem:[#allocation11 + $0x70] ss:$8 sps:$4 sm:$0xff]   ;;  %v2514_v59 = vld [vmem:[#allocation11 + $0x80] ss:$8 sps:$4 sm:$0xff]  }
 0x191   :  { %v2517_v61 = vld [vmem:[#allocation11 + $0x90] ss:$8 sps:$4 sm:$0xff]  }
 0x192   :  { %1081 = vmatpush1.bf16.msra.mxu0 %v2397_v62  ;;  %v2466_v62 = vld [vmem:[#allocation10 + $0x80] ss:$16 sps:$4 sm:$0xff]  }
 0x193   :  { %1082 = vmatprep.subr.bf16.mxu0 %v2402_v63  ;;  %v2469_v63 = vld [vmem:[#allocation10 + $0x88] ss:$16 sps:$4 sm:$0xff]  }
 0x194   :  { %1400 = vmatpush1.bf16.msra.mxu1 %v2469_v63  ;;  %v2520_v63 = vld [vmem:[#allocation11 + $0xa0] ss:$8 sps:$4 sm:$0xff]  }
 0x196   :  { %1083 = vmatpush1.bf16.msra.mxu0 %v2400_v2  ;;  %v2474_v2 = vld [vmem:[#allocation10 + $0xa4] ss:$16 sps:$4 sm:$0xff]  }
 0x197   :  { %1084 = vmatprep.subr.bf16.mxu0 %v2405_v3  ;;  %v2477_v3 = vld [vmem:[#allocation10 + $0xac] ss:$16 sps:$4 sm:$0xff]  }
 0x198   :  { %1401 = vmatprep.subr.bf16.mxu1 %v2477_v3  ;;  %v2523_v3 = vld [vmem:[#allocation11 + $0xb0] ss:$8 sps:$4 sm:$0xff]  }
 0x199   :  { %1402 = vmatpush1.bf16.msra.mxu1 %v2475_v5  ;;  %v2526_v5 = vld [vmem:[#allocation11 + $0xc0] ss:$8 sps:$4 sm:$0xff]  }
 0x19a   :  { %1085 = vmatpush1.bf16.msra.mxu0 %v2403_v6  ;;  %v2480_v6 = vld [vmem:[#allocation10 + $0xc4] ss:$16 sps:$4 sm:$0xff]  }
 0x19b   :  { %1086 = vmatprep.subr.bf16.mxu0 %v2408_v7  ;;  %v2483_v7 = vld [vmem:[#allocation10 + $0xcc] ss:$16 sps:$4 sm:$0xff]  }
 0x19c   :  { %1403 = vmatprep.subr.bf16.mxu1 %v2483_v7  ;;  %v2529_v7 = vld [vmem:[#allocation11 + $0xd0] ss:$8 sps:$4 sm:$0xff]  }
 0x19d   :  { %1404 = vmatpush1.bf16.msra.mxu1 %v2481_v10  ;;  %v2537_v10 = vld [vmem:[#allocation11 + $0xf4] ss:$8 sps:$4 sm:$0xff]  }
 0x19e   :  { %1087 = vmatpush1.bf16.msra.mxu0 %v2406_v13  ;;  %v2484_v13 = vld [vmem:[#allocation10 + $0xe0] ss:$16 sps:$4 sm:$0xff]   ;;  %1405 = vmatprep.subr.bf16.mxu1 %v2489_v12  ;;  %v2540_v12 = vld [vmem:[#allocation11 + $0x104] ss:$8 sps:$4 sm:$0xff]  }
 0x19f   :  { %1088 = vmatprep.subr.bf16.mxu0 %v2411_v17  ;;  %v708_v17 = vrot.slane %v703_v16, %v3001_v41 }
 0x1a1   :  { %1406 = vmatpush1.bf16.msra.mxu1 %v2487_v14 }
 0x1a2   :  { %1089 = vmatpush1.bf16.msra.mxu0 %v2409_v22  ;;  %1842 = vmatprep.subr.bf16.mxu1 %v2492_v15 }
 0x1a3   :  { %1090 = vmatprep.subr.bf16.mxu0 %v2414_v24 }
 0x1a6   :  { %1091 = vmatpush1.bf16.msra.mxu0 %v2412_v26 }
 0x1a7   :  { %1092 = vmatprep.subr.bf16.mxu0 %v2417_v27 }
 0x1aa   :  { %1093 = vmatpush1.bf16.msra.mxu0 %v2415_v28 }
 0x1ab   :  { %1094 = vmatprep.subr.bf16.mxu0 %v2420_v29 }
 0x1ae   :  { %1095 = vmatpush1.bf16.msra.mxu0 %v2418_v30 }
 0x1af   :  { %1096 = vmatprep.subr.bf16.mxu0 %v2423_v31  ;;  %v1127_v31 = vld [vmem:[#allocation5] sm:$0xff] }
 0x1b2   :  { %1097 = vmatpush1.bf16.msra.mxu0 %v2421_v32 }
 0x1b3   :  { %1098 = vmatprep.subr.bf16.mxu0 %v2426_v33  ;;  %v1128_v33 = vld [vmem:[#allocation5 + $0x8] sm:$0xff] }
 0x1b6   :  { %1099 = vmatpush1.bf16.msra.mxu0 %v2424_v34 }
 0x1b7   :  { %1100 = vmatprep.subr.bf16.mxu0 %v2429_v35 }
 0x1ba   :  { %1101 = vmatpush1.bf16.msra.mxu0 %v2427_v36 }
 0x1bb   :  { %1102 = vmatprep.subr.bf16.mxu0 %v2432_v37 }
 0x1be   :  { %1103 = vmatpush1.bf16.msra.mxu0 %v2430_v38 }
 0x1bf   :  { %1104 = vmatprep.subr.bf16.mxu0 %v2435_v39  ;;  %v2490_v39 = vld [vmem:[#allocation11] ss:$8 sps:$4 sm:$0xff]  }
 0x1c2   :  { %1105 = vmatpush1.bf16.msra.mxu0 %v2433_v42 }
 0x1c3   :  { %1106 = vmatprep.subr.bf16.mxu0 %v2438_v44  ;;  %v2495_v44 = vld [vmem:[#allocation11 + $0x14] ss:$8 sps:$4 sm:$0xff]  }
 0x1c6   :  { %1107 = vmatpush1.bf16.msra.mxu0 %v2436_v45  ;;  %v2493_v45 = vld [vmem:[#allocation11 + $0x10] ss:$8 sps:$4 sm:$0xff]  }
 0x1c7   :  { %1108 = vmatprep.subr.bf16.mxu0 %v2441_v46  ;;  %v2498_v46 = vld [vmem:[#allocation11 + $0x24] ss:$8 sps:$4 sm:$0xff]  }
 0x1ca   :  { %1109 = vmatpush1.bf16.msra.mxu0 %v2439_v47  ;;  %v2496_v47 = vld [vmem:[#allocation11 + $0x20] ss:$8 sps:$4 sm:$0xff]  }
 0x1cb   :  { %1348 = vmatprep.subr.bf16.mxu0 %v2444_v48  ;;  %v2501_v48 = vld [vmem:[#allocation11 + $0x34] ss:$8 sps:$4 sm:$0xff]  }
 0x1cd   :  { %1111 = vmatmul.mubr.bf16.vlgmr.msra.gmra.mrb[4].mxu0 %v637_v23 }
 0x1ce   :  { %1349 = vmatpush1.bf16.msra.mxu0 %v2442_v49  ;;  %1380 = vmatprep.mubr.bf16.mxu0 %v2818_v8  ;;  %v2499_v49 = vld [vmem:[#allocation11 + $0x30] ss:$8 sps:$4 sm:$0xff]   ;;  %v2534_v8 = vld [vmem:[#allocation11 + $0xe4] ss:$8 sps:$4 sm:$0xff]  }
 0x1cf   :  { %1350 = vmatprep.subr.bf16.mxu0 %v2450_v50  ;;  %v2504_v50 = vld [vmem:[#allocation11 + $0x44] ss:$8 sps:$4 sm:$0xff]  }
 0x1d2   :  { %1351 = vmatpush1.bf16.msra.mxu0 %v2448_v51  ;;  %v2502_v51 = vld [vmem:[#allocation11 + $0x40] ss:$8 sps:$4 sm:$0xff]  }
 0x1d3   :  { %1352 = vmatprep.subr.bf16.mxu0 %v2456_v52  ;;  %v2507_v52 = vld [vmem:[#allocation11 + $0x54] ss:$8 sps:$4 sm:$0xff]  }
 0x1d6   :  { %1353 = vmatpush1.bf16.msra.mxu0 %v2454_v54  ;;  %v2510_v54 = vld [vmem:[#allocation11 + $0x64] ss:$8 sps:$4 sm:$0xff]  }
 0x1d7   :  { %1354 = vmatprep.subr.bf16.mxu0 %v2462_v56  ;;  %v2513_v56 = vld [vmem:[#allocation11 + $0x74] ss:$8 sps:$4 sm:$0xff]  }
 0x1da   :  { %1355 = vmatpush1.bf16.msra.mxu0 %v2460_v58  ;;  %v2516_v58 = vld [vmem:[#allocation11 + $0x84] ss:$8 sps:$4 sm:$0xff]  }
 0x1db   :  { %1356 = vmatprep.subr.bf16.mxu0 %v2468_v60  ;;  %v2519_v60 = vld [vmem:[#allocation11 + $0x94] ss:$8 sps:$4 sm:$0xff]  }
 0x1de   :  { %1357 = vmatpush1.bf16.msra.mxu0 %v2466_v62  ;;  %v2522_v62 = vld [vmem:[#allocation11 + $0xa4] ss:$8 sps:$4 sm:$0xff]  }
 0x1df   :  { %1358 = vmatprep.subr.bf16.mxu0 %v2474_v2  ;;  %v2525_v2 = vld [vmem:[#allocation11 + $0xb4] ss:$8 sps:$4 sm:$0xff]  }
 0x1e2   :  { %1359 = vmatpush1.bf16.msra.mxu0 %v2472_v4  ;;  %v2528_v4 = vld [vmem:[#allocation11 + $0xc4] ss:$8 sps:$4 sm:$0xff]  }
 0x1e3   :  { %1360 = vmatprep.subr.bf16.mxu0 %v2480_v6  ;;  %v2531_v6 = vld [vmem:[#allocation11 + $0xd4] ss:$8 sps:$4 sm:$0xff]  }
 0x1e6   :  { %1361 = vmatpush1.bf16.msra.mxu0 %v2478_v9  ;;  %v2532_v9 = vld [vmem:[#allocation11 + $0xe0] ss:$8 sps:$4 sm:$0xff]  }
 0x1e7   :  { %1362 = vmatprep.subr.bf16.mxu0 %v2486_v11  ;;  %v2535_v11 = vld [vmem:[#allocation11 + $0xf0] ss:$8 sps:$4 sm:$0xff]  }
 0x1ea   :  { %1363 = vmatpush1.bf16.msra.mxu0 %v2484_v13  ;;  %v1166_v13 = vld [vmem:[%s3091_s7] sm:$0xf]  ;;  %s2819_s7 = smov [#allocation14]  }
 0x1eb   :  { %v1171_v14 = vrot.slane %v1166_v13, %v3001_v41  ;;  %v1179_v15 = vrot.slane %v1166_v13, %v201_v0  ;;  %v1175_v16 = vrot.slane %v1166_v13, %v3007_v43  ;;  %s1957_s1 = sshll.u32 %s2819_s7, 4  ;;  %s1958_s1 = int_to_ptr.vmem [resolvable:$true] %s1957_s1 }
 0x1ec   :  { %s2730_s22 = scalar_lea.vmem %s1958_s1, 256  ;;  %p2735_p7 = scmp.lt.s32.totalorder %s1958_s1, %s1958_s1 }
 0x1ed   :  { %p2731_p6 = scmp.ne.s32.totalorder %s1958_s1, %s2730_s22  ;;  %p2736_p8 = scmp.lt.s32.totalorder %s2730_s22, %s2730_s22 }
 0x1ef   :  { %p2737_p9 = por %p2736_p8, %p2735_p7 }
 0x1f1   :  { %p2738_p10 = pnand %p2737_p9, %p2731_p6 }
 0x2a0   :  { %v1112_v19 = vpop.f32.mrb[4].mxu0 }
 0x2a1   :  { %v2217_v20 = vadd.f32 %v1112_v19, %v708_v17  ;;  %v1114_v21 = vpop.f32.mrb[5].mxu0 }
 0x2a2   :  { %v2218_v22 = vadd.f32 %v1114_v21, %v712_v18  ;;  %v1116_v23 = vpop.f32.mrb[6].mxu0 }
 0x2a3   :  { %1936 = vst [vmem:[#allocation14] sm:$0xff] %v2217_v20  ;;  %v2219_v24 = vadd.f32 %v1116_v23, %v708_v17  ;;  %v1118_v25 = vpop.f32.mrb[7].mxu0  ;;  %v1183_v17 = vrot.slane %v1166_v13, %v205_v1  ;;  %v2585_v13 = vld [vmem:[#allocation11 + $0x1f4] ss:$8 sps:$4 sm:$0xff]  }
 0x2a4   :  { %v1121_v26 = vmul.f32 0.5, %v2218_v22  ;;  %1938 = vst [vmem:[#allocation16] sm:$0xff] %v2218_v22  ;;  %v2220_v27 = vadd.f32 %v1118_v25, %v712_v18 }
 0x2a5   :  { %1937 = vst [vmem:[#allocation14 + $0x8] sm:$0xff] %v2219_v24 }
 0x2a6   :  { %v1123_v28 = vmul.f32 1.442695, %v1121_v26  ;;  %v1122_v29 = vmul.f32 0.5, %v2220_v27  ;;  %1939 = vst [vmem:[#allocation16 + $0x8] sm:$0xff] %v2220_v27 }
 0x2a8   :  { %2586 = vpow2.f32 %v1123_v28  ;;  %v1125_v30 = vmul.f32 1.442695, %v1122_v29 }
 0x2aa   :  { %2588 = vpow2.f32 %v1125_v30 }
 0x2b2   :  { %v2587_v32 = vpop.eup %2586 }
 0x2b3   :  { %v1129_v34 = vmul.f32 %v2587_v32, %v1127_v31 }
 0x2b4   :  { %v2589_v35 = vpop.eup %2588 }
 0x2b5   :  { %v1130_v36 = vmul.f32 %v2589_v35, %v1128_v33  ;;  %v1131_v37 = vadd.f32 %v2217_v20, %v1129_v34 }
 0x2b7   :  { %v1132_v38 = vadd.f32 %v2219_v24, %v1130_v36 }
 0x2b9   :  { %v1133_v42 = vpack.c.bf16 %v1132_v38, %v1131_v37 }
 0x2bb   :  { %1381 = vmatmul.mubr.bf16.vlgmr.msra.gmra.mrb[8].mxu0 %v1133_v42  ;;  %1424 = vmatmul.mubr.bf16.vlgmr.msra.gmra.mrb[4].mxu1 %v1133_v42 }
 0x2bc   :  { %1843 = vmatpush1.bf16.msra.mxu1 %v2490_v39 }
 0x2bd   :  { %1844 = vmatprep.subr.bf16.mxu1 %v2495_v44 }
 0x2c0   :  { %1845 = vmatpush1.bf16.msra.mxu1 %v2493_v45 }
 0x2c1   :  { %1846 = vmatprep.subr.bf16.mxu1 %v2498_v46  ;;  %v2538_v46 = vld [vmem:[#allocation11 + $0x100] ss:$8 sps:$4 sm:$0xff]  }
 0x2c4   :  { %1847 = vmatpush1.bf16.msra.mxu1 %v2496_v47  ;;  %v2543_v47 = vld [vmem:[#allocation11 + $0x114] ss:$8 sps:$4 sm:$0xff]  }
 0x2c5   :  { %1848 = vmatprep.subr.bf16.mxu1 %v2501_v48  ;;  %v2541_v48 = vld [vmem:[#allocation11 + $0x110] ss:$8 sps:$4 sm:$0xff]  }
 0x2c8   :  { %1849 = vmatpush1.bf16.msra.mxu1 %v2499_v49  ;;  %v2546_v49 = vld [vmem:[#allocation11 + $0x124] ss:$8 sps:$4 sm:$0xff]  }
 0x2c9   :  { %1850 = vmatprep.subr.bf16.mxu1 %v2504_v50  ;;  %v2544_v50 = vld [vmem:[#allocation11 + $0x120] ss:$8 sps:$4 sm:$0xff]  }
 0x2cc   :  { %1851 = vmatpush1.bf16.msra.mxu1 %v2502_v51  ;;  %v2549_v51 = vld [vmem:[#allocation11 + $0x134] ss:$8 sps:$4 sm:$0xff]  }
 0x2cd   :  { %1852 = vmatprep.subr.bf16.mxu1 %v2507_v52  ;;  %v2547_v52 = vld [vmem:[#allocation11 + $0x130] ss:$8 sps:$4 sm:$0xff]  }
 0x2d0   :  { %1853 = vmatpush1.bf16.msra.mxu1 %v2505_v53  ;;  %v2552_v53 = vld [vmem:[#allocation11 + $0x144] ss:$8 sps:$4 sm:$0xff]  }
 0x2d1   :  { %1854 = vmatprep.subr.bf16.mxu1 %v2510_v54  ;;  %v2550_v54 = vld [vmem:[#allocation11 + $0x140] ss:$8 sps:$4 sm:$0xff]  }
 0x2d4   :  { %1855 = vmatpush1.bf16.msra.mxu1 %v2508_v55  ;;  %v2555_v55 = vld [vmem:[#allocation11 + $0x154] ss:$8 sps:$4 sm:$0xff]  }
 0x2d5   :  { %1856 = vmatprep.subr.bf16.mxu1 %v2513_v56  ;;  %v2553_v56 = vld [vmem:[#allocation11 + $0x150] ss:$8 sps:$4 sm:$0xff]  }
 0x2d8   :  { %1857 = vmatpush1.bf16.msra.mxu1 %v2511_v57  ;;  %v2558_v57 = vld [vmem:[#allocation11 + $0x164] ss:$8 sps:$4 sm:$0xff]  }
 0x2d9   :  { %1858 = vmatprep.subr.bf16.mxu1 %v2516_v58  ;;  %v2556_v58 = vld [vmem:[#allocation11 + $0x160] ss:$8 sps:$4 sm:$0xff]  }
 0x2dc   :  { %1859 = vmatpush1.bf16.msra.mxu1 %v2514_v59  ;;  %v2561_v59 = vld [vmem:[#allocation11 + $0x174] ss:$8 sps:$4 sm:$0xff]  }
 0x2dd   :  { %1860 = vmatprep.subr.bf16.mxu1 %v2519_v60  ;;  %v2559_v60 = vld [vmem:[#allocation11 + $0x170] ss:$8 sps:$4 sm:$0xff]  }
 0x2e0   :  { %1861 = vmatpush1.bf16.msra.mxu1 %v2517_v61  ;;  %v2564_v61 = vld [vmem:[#allocation11 + $0x184] ss:$8 sps:$4 sm:$0xff]  }
 0x2e1   :  { %1862 = vmatprep.subr.bf16.mxu1 %v2522_v62  ;;  %v2562_v62 = vld [vmem:[#allocation11 + $0x180] ss:$8 sps:$4 sm:$0xff]  }
 0x2e4   :  { %1863 = vmatpush1.bf16.msra.mxu1 %v2520_v63  ;;  %v2567_v63 = vld [vmem:[#allocation11 + $0x194] ss:$8 sps:$4 sm:$0xff]  }
 0x2e5   :  { %1864 = vmatprep.subr.bf16.mxu1 %v2525_v2  ;;  %v2565_v2 = vld [vmem:[#allocation11 + $0x190] ss:$8 sps:$4 sm:$0xff]  }
 0x2e8   :  { %1865 = vmatpush1.bf16.msra.mxu1 %v2523_v3  ;;  %v2570_v3 = vld [vmem:[#allocation11 + $0x1a4] ss:$8 sps:$4 sm:$0xff]  }
 0x2e9   :  { %1866 = vmatprep.subr.bf16.mxu1 %v2528_v4  ;;  %v2568_v4 = vld [vmem:[#allocation11 + $0x1a0] ss:$8 sps:$4 sm:$0xff]  }
 0x2ec   :  { %1867 = vmatpush1.bf16.msra.mxu1 %v2526_v5  ;;  %v2573_v5 = vld [vmem:[#allocation11 + $0x1b4] ss:$8 sps:$4 sm:$0xff]  }
 0x2ed   :  { %1868 = vmatprep.subr.bf16.mxu1 %v2531_v6  ;;  %v2571_v6 = vld [vmem:[#allocation11 + $0x1b0] ss:$8 sps:$4 sm:$0xff]  }
 0x2f0   :  { %1869 = vmatpush1.bf16.msra.mxu1 %v2529_v7  ;;  %v2576_v7 = vld [vmem:[#allocation11 + $0x1c4] ss:$8 sps:$4 sm:$0xff]  }
 0x2f1   :  { %1870 = vmatprep.subr.bf16.mxu1 %v2534_v8  ;;  %v2574_v8 = vld [vmem:[#allocation11 + $0x1c0] ss:$8 sps:$4 sm:$0xff]  }
 0x2f4   :  { %1871 = vmatpush1.bf16.msra.mxu1 %v2532_v9  ;;  %v2579_v9 = vld [vmem:[#allocation11 + $0x1d4] ss:$8 sps:$4 sm:$0xff]  }
 0x2f5   :  { %1872 = vmatprep.subr.bf16.mxu1 %v2537_v10  ;;  %v2577_v10 = vld [vmem:[#allocation11 + $0x1d0] ss:$8 sps:$4 sm:$0xff]  }
 0x2f8   :  { %1873 = vmatpush1.bf16.msra.mxu1 %v2535_v11  ;;  %v2582_v11 = vld [vmem:[#allocation11 + $0x1e4] ss:$8 sps:$4 sm:$0xff]  }
 0x2f9   :  { %1885 = vmatprep.subr.bf16.mxu1 %v2540_v12  ;;  %v2580_v12 = vld [vmem:[#allocation11 + $0x1e0] ss:$8 sps:$4 sm:$0xff]  }
 0x38e   :  { %v1382_v18 = vpop.f32.mrb[8].mxu0  ;;  %v1425_v19 = vpop.f32.mrb[4].mxu1 }
 0x38f   :  { %v1383_v20 = vadd.f32 %v1382_v18, %v1171_v14  ;;  %v1426_v21 = vadd.f32 %v1425_v19, %v1179_v15  ;;  %v1384_v22 = vpop.f32.mrb[9].mxu0  ;;  %v1427_v23 = vpop.f32.mrb[5].mxu1 }
 0x390   :  { %v1385_v24 = vadd.f32 %v1384_v22, %v1175_v16  ;;  %v1428_v25 = vadd.f32 %v1427_v23, %v1183_v17  ;;  %v1386_v26 = vpop.f32.mrb[10].mxu0  ;;  %v1429_v27 = vpop.f32.mrb[6].mxu1 }
 0x391   :  { %v1387_v28 = vadd.f32 %v1386_v26, %v1171_v14  ;;  %v1430_v29 = vadd.f32 %v1429_v27, %v1179_v15  ;;  %v1388_v30 = vpop.f32.mrb[11].mxu0  ;;  %v1431_v31 = vpop.f32.mrb[7].mxu1  ;;  %v1434_v33 = vmax.f32 %v1383_v20, 0.0  ;;  %v1436_v34 = vmax.f32 %v1426_v21, 0.0  ;;  %v2583_v14 = vld [vmem:[#allocation11 + $0x1f0] ss:$8 sps:$4 sm:$0xff]  }
 0x392   :  { %v1389_v0 = vadd.f32 %v1388_v30, %v1175_v16  ;;  %v1432_v32 = vadd.f32 %v1431_v31, %v1183_v17  ;;  %v1435_v35 = vmax.f32 %v1385_v24, 0.0  ;;  %v1437_v36 = vmax.f32 %v1428_v25, 0.0 }
 0x393   :  { %v1438_v40 = vmax.f32 %v1387_v28, 0.0  ;;  %v1440_v1 = vmax.f32 %v1430_v29, 0.0 }
 0x394   :  { %v1439_v37 = vmax.f32 %v1389_v0, 0.0  ;;  %v1441_v38 = vmax.f32 %v1432_v32, 0.0 }
 0x395   :  { %v1442_v39 = vpack.c.bf16 %v1438_v40, %v1434_v33  ;;  %v3031_v42 = vpack.c.bf16 %v1440_v1, %v1436_v34 }
 0x396   :  { %v1443_v44 = vpack.c.bf16 %v1439_v37, %v1435_v35  ;;  %v1445_v45 = vpack.c.bf16 %v1441_v38, %v1437_v36 }
 0x398   :  { %1874 = vmatprep.mubr.bf16.mxu1 %v1443_v44 }
 0x399   :  { %1875 = vmatmul.mubr.bf16.vlgmr.msra.gmra.mrb[8].mxu1 %v1442_v39 }
 0x39a   :  { %1886 = vmatpush1.bf16.msra.mxu1 %v2538_v46  ;;  %1917 = vmatprep.mubr.bf16.mxu1 %v1445_v45 }
 0x39b   :  { %1887 = vmatprep.subr.bf16.mxu1 %v2543_v47 }
 0x39e   :  { %1888 = vmatpush1.bf16.msra.mxu1 %v2541_v48 }
 0x39f   :  { %1889 = vmatprep.subr.bf16.mxu1 %v2546_v49 }
 0x3a2   :  { %1890 = vmatpush1.bf16.msra.mxu1 %v2544_v50 }
 0x3a3   :  { %1891 = vmatprep.subr.bf16.mxu1 %v2549_v51 }
 0x3a6   :  { %1892 = vmatpush1.bf16.msra.mxu1 %v2547_v52 }
 0x3a7   :  { %1893 = vmatprep.subr.bf16.mxu1 %v2552_v53 }
 0x3aa   :  { %1894 = vmatpush1.bf16.msra.mxu1 %v2550_v54 }
 0x3ab   :  { %1895 = vmatprep.subr.bf16.mxu1 %v2555_v55 }
 0x3ae   :  { %1896 = vmatpush1.bf16.msra.mxu1 %v2553_v56 }
 0x3af   :  { %1897 = vmatprep.subr.bf16.mxu1 %v2558_v57 }
 0x3b2   :  { %1898 = vmatpush1.bf16.msra.mxu1 %v2556_v58 }
 0x3b3   :  { %1899 = vmatprep.subr.bf16.mxu1 %v2561_v59 }
 0x3b6   :  { %1900 = vmatpush1.bf16.msra.mxu1 %v2559_v60 }
 0x3b7   :  { %1901 = vmatprep.subr.bf16.mxu1 %v2564_v61 }
 0x3ba   :  { %1902 = vmatpush1.bf16.msra.mxu1 %v2562_v62 }
 0x3bb   :  { %1903 = vmatprep.subr.bf16.mxu1 %v2567_v63 }
 0x3be   :  { %1904 = vmatpush1.bf16.msra.mxu1 %v2565_v2 }
 0x3bf   :  { %1905 = vmatprep.subr.bf16.mxu1 %v2570_v3 }
 0x3c2   :  { %1906 = vmatpush1.bf16.msra.mxu1 %v2568_v4 }
 0x3c3   :  { %1907 = vmatprep.subr.bf16.mxu1 %v2573_v5 }
 0x3c6   :  { %1908 = vmatpush1.bf16.msra.mxu1 %v2571_v6 }
 0x3c7   :  { %1909 = vmatprep.subr.bf16.mxu1 %v2576_v7 }
 0x3ca   :  { %1910 = vmatpush1.bf16.msra.mxu1 %v2574_v8 }
 0x3cb   :  { %1911 = vmatprep.subr.bf16.mxu1 %v2579_v9 }
 0x3ce   :  { %1912 = vmatpush1.bf16.msra.mxu1 %v2577_v10 }
 0x3cf   :  { %1913 = vmatprep.subr.bf16.mxu1 %v2582_v11 }
 0x3d2   :  { %1914 = vmatpush1.bf16.msra.mxu1 %v2580_v12 }
 0x3d3   :  { %1915 = vmatprep.subr.bf16.mxu1 %v2585_v13 }
 0x3d6   :  { %1916 = vmatpush1.bf16.msra.mxu1 %v2583_v14 }
 0x3d9   :  { %1918 = vmatmul.mubr.bf16.vlgmr.msra.gmra.mrb[8].mxu1 %v3031_v42 }
 0x3da   :  { %2741 = shalt.err (!%p2738_p10)
}
 0x3db   :  { %s2742_s14 = scalar_lea.hbm %s3095_s11, 256 }
 0x3dc   :  { %p2743_p11 = scmp.ne.s32.totalorder %s3095_s11, %s2742_s14  ;;  %p2746_p12 = scmp.lt.u32.totalorder %s2742_s14, %s3095_s11 }
 0x3de   :  { %p2748_p13 = pnand %p2746_p12, %p2743_p11 }
 0x3e0   :  { %2751 = shalt.err (!%p2748_p13)
}
 0x3e1   :  { %1963 = dma.vmem_to_hbm [thread:$0]  %s1958_s1, 256, %s3095_s11, [#allocation15], %s2810_s15, %s2810_s15, %s2811_s16  }
 0x3e2   :  { %s2820_s25 = smov [#allocation16]  }
 0x3e3   :  { %s1969_s24 = sshll.u32 %s2820_s25, 4  ;;  %s1970_s24 = int_to_ptr.vmem [resolvable:$true] %s1969_s24 }
 0x3e4   :  { %s2752_s26 = scalar_lea.vmem %s1970_s24, 256  ;;  %p2757_p1 = scmp.lt.s32.totalorder %s1970_s24, %s1970_s24 }
 0x3e5   :  { %p2753_p0 = scmp.ne.s32.totalorder %s1970_s24, %s2752_s26  ;;  %p2758_p2 = scmp.lt.s32.totalorder %s2752_s26, %s2752_s26 }
 0x3e7   :  { %p2759_p3 = por %p2758_p2, %p2757_p1 }
 0x3e9   :  { %p2760_p4 = pnand %p2759_p3, %p2753_p0 }
 0x3eb   :  { %2763 = shalt.err (!%p2760_p4)
}
 0x3ec   :  { %s2764_s8 = scalar_lea.hbm %s3096_s12, 256 }
 0x3ed   :  { %p2765_p5 = scmp.ne.s32.totalorder %s3096_s12, %s2764_s8  ;;  %p2768_p6 = scmp.lt.u32.totalorder %s2764_s8, %s3096_s12 }
 0x3ef   :  { %p2770_p7 = pnand %p2768_p6, %p2765_p5 }
 0x3f1   :  { %2773 = shalt.err (!%p2770_p7)
}
 0x3f2   :  { %1975 = dma.vmem_to_hbm [thread:$0]  %s1970_s24, 256, %s3096_s12, [#allocation15], %s2810_s15, %s2810_s15, %s2811_s16  }
 0x3f3   :  { %v1510_v15 = vld [vmem:[%s3093_s9] sm:$0x3]  ;;  %s2821_s12 = smov [#allocation13]  }
 0x3f4   :  { %v1515_v16 = vrot.slane %v1510_v15, %v3001_v41  ;;  %v1519_v17 = vrot.slane %v1510_v15, %v3007_v43  ;;  %s1945_s15 = sshll.u32 %s2821_s12, 4  ;;  %s1946_s15 = int_to_ptr.vmem [resolvable:$true] %s1945_s15 }
 0x3f5   :  { %s2774_s9 = scalar_lea.vmem %s1946_s15, 512  ;;  %p2779_p9 = scmp.lt.s32.totalorder %s1946_s15, %s1946_s15 }
 0x3f6   :  { %p2775_p8 = scmp.ne.s32.totalorder %s1946_s15, %s2774_s9  ;;  %p2780_p10 = scmp.lt.s32.totalorder %s2774_s9, %s2774_s9 }
 0x3f8   :  { %p2781_p11 = por %p2780_p10, %p2779_p9 }
 0x3fa   :  { %p2782_p12 = pnand %p2781_p11, %p2775_p8 }
 0x4ac   :  { %v1919_v18 = vpop.f32.mrb[8].mxu1 }
 0x4ad   :  { %v2221_v19 = vadd.f32 %v1919_v18, %v1515_v16  ;;  %v1921_v20 = vpop.f32.mrb[9].mxu1 }
 0x4ae   :  { %v2222_v21 = vadd.f32 %v1921_v20, %v1519_v17  ;;  %v1923_v22 = vpop.f32.mrb[10].mxu1 }
 0x4af   :  { %2590 = vtanh.f32 %v2221_v19  ;;  %v2223_v23 = vadd.f32 %v1923_v22, %v1515_v16  ;;  %v1925_v24 = vpop.f32.mrb[11].mxu1 }
 0x4b0   :  { %2592 = vtanh.f32 %v2222_v21  ;;  %v2224_v25 = vadd.f32 %v1925_v24, %v1519_v17 }
 0x4b1   :  { %2594 = vtanh.f32 %v2223_v23 }
 0x4b2   :  { %2596 = vtanh.f32 %v2224_v25 }
 0x4b9   :  { %v2591_v26 = vpop.eup %2590 }
 0x4ba   :  { %v2593_v27 = vpop.eup %2592  ;;  %1932 = vst [vmem:[#allocation13] sm:$0xff] %v2591_v26 }
 0x4bb   :  { %v2595_v41 = vpop.eup %2594  ;;  %1933 = vst [vmem:[#allocation13 + $0x8] sm:$0xff] %v2593_v27 }
 0x4bc   :  { %v2597_v43 = vpop.eup %2596  ;;  %1934 = vst [vmem:[#allocation13 + $0x10] sm:$0xff] %v2595_v41 }
 0x4bd   :  { %1935 = vst [vmem:[#allocation13 + $0x18] sm:$0xff] %v2597_v43 }
 0x4be   :  { %2785 = shalt.err (!%p2782_p12)
}
 0x4bf   :  { %s2786_s29 = scalar_lea.hbm %s3094_s10, 512 }
 0x4c0   :  { %p2787_p13 = scmp.ne.s32.totalorder %s3094_s10, %s2786_s29  ;;  %p2790_p0 = scmp.lt.u32.totalorder %s2786_s29, %s3094_s10 }
 0x4c2   :  { %p2792_p1 = pnand %p2790_p0, %p2787_p13 }
 0x4c4   :  { %2795 = shalt.err (!%p2792_p1)
}
 0x4c5   :  { %1951 = dma.vmem_to_hbm [thread:$0]  %s1946_s15, 512, %s3094_s10, [#allocation4], %s2814_s0, %s2814_s0, %s2815_s30  }
 0x4c6   :  { %2804 = dma.done.wait [#allocation4], 512  }
 0x4c7   :  { %2805 = vsyncadd [#allocation4], 4294966784 }
 0x4c8   :  { %2806 = dma.done.wait [#allocation15], 512  }
 0x4c9   :  { %2807 = vsyncadd [#allocation15], 4294966784 }
 0x4ca   :  { %1985 = vsyncpa [#allocation3], 1 }
 0x4cb   :  { %1986 = vsyncpa [#allocation6], 1 }
 0x4cc   :  { %1987 = vsyncpa [#allocation9], 1 }
 0x4cd   :  { %1988 = vsyncpa [#allocation12], 1 }
 0x4ce   :  { %1989 = vsyncpa [#allocation4], 1 }
 0x4cf   :  { %1990 = vsyncpa [#allocation15], 1 }

</bundles_post_ra>
